<compile_context>
chip_gen: v5e
topology: v5e:2x2
jax: 0.10.0
libtpu: 0.0.40
codegen_flags: <defaults>
</compile_context>

<pallas_src>
import math
import functools

import jax
import jax.numpy as jnp
from jax.experimental import pallas as pl
from jax.experimental.pallas import tpu as pltpu

NHEAD = 8
NEG_INF = -1e9   # finite additive-mask value (keeps fully-masked rows finite)


# ----------------------------- in-kernel helpers -----------------------------

def _ln(x, g, b):
    """LayerNorm over last dim, eps=1e-5 (PyTorch default). x f32 (L, E), g/b (1, E)."""
    mean = jnp.mean(x, axis=-1, keepdims=True)
    xc = x - mean
    var = jnp.mean(xc * xc, axis=-1, keepdims=True)
    return xc * jax.lax.rsqrt(var + 1e-5) * g + b


def _mha(xq, xkv, mask, wq, bq, wkv, bkv, wo, bo, *, nhead):
    """Multi-head attention for a single batch item.

    xq: (Lq, E) f32, xkv: (Lk, E) f32/bf16, mask: (Lq, Lk) or (1, Lk) additive f32.
    wq/wkv/wo are bf16 (1/sqrt(Dh) already folded into wq & bq), biases f32.
    Returns (Lq, E) f32 including the output projection + bias.
    """
    Lq, E = xq.shape
    Dh = E // nhead

    q = jnp.dot(xq.astype(jnp.bfloat16), wq, preferred_element_type=jnp.float32) + bq
    kv = jnp.dot(xkv.astype(jnp.bfloat16), wkv, preferred_element_type=jnp.float32) + bkv

    qb = q.astype(jnp.bfloat16)                 # (Lq, E), already scaled via wq/bq
    ktb = kv[:, :E].T.astype(jnp.bfloat16)      # (E, Lk): one transpose shared by all heads
    vb = kv[:, E:].astype(jnp.bfloat16)         # (Lk, E)

    y = jnp.zeros((Lq, E), jnp.float32)
    for h in range(nhead):                      # static unroll, nhead = 8
        sl = slice(h * Dh, (h + 1) * Dh)
        s = jnp.dot(qb[:, sl], ktb[sl, :], preferred_element_type=jnp.float32) + mask
        s = s - jnp.max(s, axis=-1, keepdims=True)
        p = jnp.exp(s)
        p = p * pl.reciprocal(jnp.sum(p, axis=-1, keepdims=True), approx=True)
        oh = jnp.dot(p.astype(jnp.bfloat16), vb[:, sl], preferred_element_type=jnp.float32)
        # fold head h straight into the output projection (no lane-sparse concat)
        y = y + jnp.dot(oh.astype(jnp.bfloat16), wo[sl, :],
                        preferred_element_type=jnp.float32)
    return y + bo


def _ffn(x, w1, b1, w2, b2):
    h = jnp.dot(x.astype(jnp.bfloat16), w1, preferred_element_type=jnp.float32) + b1
    h = jnp.maximum(h, 0.0)                     # relu; dropout = identity at inference
    return jnp.dot(h.astype(jnp.bfloat16), w2, preferred_element_type=jnp.float32) + b2


# ----------------------------- fused encoder kernel -----------------------------

def _encoder_kernel(x_ref, mask_ref,
                    wq_ref, bq_ref, wkv_ref, bkv_ref, wo_ref, bo_ref,
                    ln1g_ref, ln1b_ref,
                    w1_ref, b1_ref, w2_ref, b2_ref, ln2g_ref, ln2b_ref,
                    o_ref, x_sc, *, nhead):
    """grid = (batch, num_layers). One full encoder layer per step; activation is
    carried across the layer axis in the x_sc VMEM scratch."""
    l = pl.program_id(1)

    @pl.when(l == 0)
    def _():
        x_sc[...] = x_ref[...].astype(jnp.float32)

    x = x_sc[...]                                              # (S, E) f32

    y = _mha(x, x, mask_ref[...],
             wq_ref[...], bq_ref[...], wkv_ref[...], bkv_ref[...],
             wo_ref[...], bo_ref[...], nhead=nhead)
    x = _ln(x + y, ln1g_ref[...], ln1b_ref[...])               # residual + norm1
    y = _ffn(x, w1_ref[...], b1_ref[...], w2_ref[...], b2_ref[...])
    x = _ln(x + y, ln2g_ref[...], ln2b_ref[...])               # residual + norm2
    x_sc[...] = x

    @pl.when(l == pl.num_programs(1) - 1)
    def _():
        o_ref[...] = x.astype(o_ref.dtype)


# ----------------------------- fused decoder (+heads) kernel -----------------------------

def _decoder_kernel(x_ref, mem_ref, smask_ref, mmask_ref,
                    swq_ref, sbq_ref, swkv_ref, sbkv_ref, swo_ref, sbo_ref,
                    ln1g_ref, ln1b_ref,
                    cwq_ref, cbq_ref, cwkv_ref, cbkv_ref, cwo_ref, cbo_ref,
                    ln2g_ref, ln2b_ref,
                    w1_ref, b1_ref, w2_ref, b2_ref, ln3g_ref, ln3b_ref,
                    wh_ref, bh_ref,
                    o_ref, x_sc, *, nhead):
    """grid = (batch, num_layers). Self-attn + cross-attn + FFN per step; the fused
    29-way output-head projection runs only at the last layer (lane-dense 128 store)."""
    l = pl.program_id(1)

    @pl.when(l == 0)
    def _():
        x_sc[...] = x_ref[...].astype(jnp.float32)

    x = x_sc[...]                                              # (T, E) f32
    mem = mem_ref[...]                                         # (S, E) bf16

    # masked self-attention + LayerNorm 1
    y = _mha(x, x, smask_ref[...],
             swq_ref[...], sbq_ref[...], swkv_ref[...], sbkv_ref[...],
             swo_ref[...], sbo_ref[...], nhead=nhead)
    x = _ln(x + y, ln1g_ref[...], ln1b_ref[...])

    # cross-attention (memory_mask is None -> key-padding mask only) + LayerNorm 2
    y = _mha(x, mem, mmask_ref[...],
             cwq_ref[...], cbq_ref[...], cwkv_ref[...], cbkv_ref[...],
             cwo_ref[...], cbo_ref[...], nhead=nhead)
    x = _ln(x + y, ln2g_ref[...], ln2b_ref[...])

    # FFN + LayerNorm 3
    y = _ffn(x, w1_ref[...], b1_ref[...], w2_ref[...], b2_ref[...])
    x = _ln(x + y, ln3g_ref[...], ln3b_ref[...])
    x_sc[...] = x

    @pl.when(l == pl.num_programs(1) - 1)
    def _():
        o_ref[...] = (jnp.dot(x.astype(jnp.bfloat16), wh_ref[...],
                              preferred_element_type=jnp.float32)
                      + bh_ref[...]).astype(o_ref.dtype)


# ----------------------------- pallas_call wrappers -----------------------------

def _im_batch(n, l):
    return (n, 0, 0)


def _im_layer(n, l):
    return (l, 0, 0)


def _im_const2(n, l):
    return (0, 0)


def run_encoder(x3, mask, ep, nhead=NHEAD):
    """x3: (N, S, E) bf16, mask: (N, S, S) additive f32, ep: stacked encoder params."""
    N, S, E = x3.shape
    n_layers = ep['wq'].shape[0]
    F = ep['w1'].shape[2]

    def wspec(d1, d2):
        return pl.BlockSpec((None, d1, d2), _im_layer)

    in_specs = [
        pl.BlockSpec((None, S, E), _im_batch),       # x
        pl.BlockSpec((None, S, S), _im_batch),       # combined additive mask
        wspec(E, E), wspec(1, E),                    # wq, bq (scale folded in)
        wspec(E, 2 * E), wspec(1, 2 * E),            # wkv, bkv
        wspec(E, E), wspec(1, E),                    # wo, bo
        wspec(1, E), wspec(1, E),                    # ln1 g, b
        wspec(E, F), wspec(1, F),                    # w1, b1
        wspec(F, E), wspec(1, E),                    # w2, b2
        wspec(1, E), wspec(1, E),                    # ln2 g, b
    ]
    args = [x3, mask,
            ep['wq'], ep['bq'], ep['wkv'], ep['bkv'], ep['wo'], ep['bo'],
            ep['ln1g'], ep['ln1b'],
            ep['w1'], ep['b1'], ep['w2'], ep['b2'], ep['ln2g'], ep['ln2b']]

    return pl.pallas_call(
        functools.partial(_encoder_kernel, nhead=nhead),
        out_shape=jax.ShapeDtypeStruct((N, S, E), jnp.bfloat16),
        grid=(N, n_layers),
        in_specs=in_specs,
        out_specs=pl.BlockSpec((None, S, E), _im_batch),
        scratch_shapes=[pltpu.VMEM((S, E), jnp.float32)],
        compiler_params=pltpu.CompilerParams(
            dimension_semantics=("parallel", "arbitrary")),
    )(*args)


def run_decoder(x3, mem3, self_mask, mem_mask, dp, heads, nhead=NHEAD):
    """x3: (N, T, E) bf16, mem3: (N, S, E) bf16, self_mask: (N, T, T) f32,
    mem_mask: (N, 1, S) f32, dp: stacked decoder params, heads: fused head weights."""
    N, T, E = x3.shape
    S = mem3.shape[1]
    n_layers = dp['w1'].shape[0]
    F = dp['w1'].shape[2]
    P = heads['w'].shape[1]

    def wspec(d1, d2):
        return pl.BlockSpec((None, d1, d2), _im_layer)

    in_specs = [
        pl.BlockSpec((None, T, E), _im_batch),       # x (gl embedding)
        pl.BlockSpec((None, S, E), _im_batch),       # encoder memory
        pl.BlockSpec((None, T, T), _im_batch),       # self-attn additive mask
        pl.BlockSpec((None, 1, S), _im_batch),       # memory key-padding mask
        wspec(E, E), wspec(1, E), wspec(E, 2 * E), wspec(1, 2 * E),
        wspec(E, E), wspec(1, E),                    # self-attn
        wspec(1, E), wspec(1, E),                    # ln1
        wspec(E, E), wspec(1, E), wspec(E, 2 * E), wspec(1, 2 * E),
        wspec(E, E), wspec(1, E),                    # cross-attn
        wspec(1, E), wspec(1, E),                    # ln2
        wspec(E, F), wspec(1, F), wspec(F, E), wspec(1, E),   # ffn
        wspec(1, E), wspec(1, E),                    # ln3
        pl.BlockSpec((E, P), _im_const2),            # fused head weights (E, 128)
        pl.BlockSpec((1, P), _im_const2),            # fused head bias
    ]
    args = [x3, mem3, self_mask, mem_mask,
            dp['swq'], dp['sbq'], dp['swkv'], dp['sbkv'], dp['swo'], dp['sbo'],
            dp['ln1g'], dp['ln1b'],
            dp['cwq'], dp['cbq'], dp['cwkv'], dp['cbkv'], dp['cwo'], dp['cbo'],
            dp['ln2g'], dp['ln2b'],
            dp['w1'], dp['b1'], dp['w2'], dp['b2'], dp['ln3g'], dp['ln3b'],
            heads['w'], heads['b']]

    return pl.pallas_call(
        functools.partial(_decoder_kernel, nhead=nhead),
        out_shape=jax.ShapeDtypeStruct((N, T, P), jnp.float32),
        grid=(N, n_layers),
        in_specs=in_specs,
        out_specs=pl.BlockSpec((None, T, P), _im_batch),
        scratch_shapes=[pltpu.VMEM((T, E), jnp.float32)],
        compiler_params=pltpu.CompilerParams(
            dimension_semantics=("parallel", "arbitrary")),
    )(*args)


# ----------------------------- parameter packing (once, outside jit) -----------------------------

def pack_params(params, nhead=NHEAD):
    """Stack per-layer weights along a leading layer axis, cast matmul weights to bf16,
    fold the 1/sqrt(head_dim) attention scale into wq/bq, and fuse the 29 output heads
    into one lane-dense (E, 128) matmul.  Returns (packed_params, head_sizes)."""
    E = params['src_emb'].shape[1]
    scale = 1.0 / math.sqrt(E // nhead)
    bf16 = jnp.bfloat16

    def row(v):
        return v.reshape(1, -1)

    def attn_stack(layers, key):
        wq = jnp.stack([lyr[key]['wq'] for lyr in layers]) * scale
        bq = jnp.stack([row(lyr[key]['bq']) for lyr in layers]) * scale
        wkv = jnp.stack([lyr[key]['wkv'] for lyr in layers])
        bkv = jnp.stack([row(lyr[key]['bkv']) for lyr in layers])
        wo = jnp.stack([lyr[key]['wo'] for lyr in layers])
        bo = jnp.stack([row(lyr[key]['bo']) for lyr in layers])
        return wq.astype(bf16), bq, wkv.astype(bf16), bkv, wo.astype(bf16), bo

    def ffn_stack(layers):
        w1 = jnp.stack([lyr['w1'] for lyr in layers]).astype(bf16)
        b1 = jnp.stack([row(lyr['b1']) for lyr in layers])
        w2 = jnp.stack([lyr['w2'] for lyr in layers]).astype(bf16)
        b2 = jnp.stack([row(lyr['b2']) for lyr in layers])
        return w1, b1, w2, b2

    def ln_stack(layers, gk, bk):
        return (jnp.stack([row(lyr[gk]) for lyr in layers]),
                jnp.stack([row(lyr[bk]) for lyr in layers]))

    enc = params['enc_layers']
    ewq, ebq, ewkv, ebkv, ewo, ebo = attn_stack(enc, 'self_attn')
    ew1, eb1, ew2, eb2 = ffn_stack(enc)
    eln1g, eln1b = ln_stack(enc, 'ln1_g', 'ln1_b')
    eln2g, eln2b = ln_stack(enc, 'ln2_g', 'ln2_b')
    enc_p = dict(wq=ewq, bq=ebq, wkv=ewkv, bkv=ebkv, wo=ewo, bo=ebo,
                 ln1g=eln1g, ln1b=eln1b, w1=ew1, b1=eb1, w2=ew2, b2=eb2,
                 ln2g=eln2g, ln2b=eln2b)

    dec = params['dec_layers']
    swq, sbq, swkv, sbkv, swo, sbo = attn_stack(dec, 'self_attn')
    cwq, cbq, cwkv, cbkv, cwo, cbo = attn_stack(dec, 'cross_attn')
    dw1, db1, dw2, db2 = ffn_stack(dec)
    dln1g, dln1b = ln_stack(dec, 'ln1_g', 'ln1_b')
    dln2g, dln2b = ln_stack(dec, 'ln2_g', 'ln2_b')
    dln3g, dln3b = ln_stack(dec, 'ln3_g', 'ln3_b')
    dec_p = dict(swq=swq, sbq=sbq, swkv=swkv, sbkv=sbkv, swo=swo, sbo=sbo,
                 ln1g=dln1g, ln1b=dln1b,
                 cwq=cwq, cbq=cbq, cwkv=cwkv, cbkv=cbkv, cwo=cwo, cbo=cbo,
                 ln2g=dln2g, ln2b=dln2b,
                 w1=dw1, b1=db1, w2=dw2, b2=db2, ln3g=dln3g, ln3b=dln3b)

    # fused output heads -> one lane-dense (E, 128) matmul
    head_ws = [params['gl_gen_w'], params['dom_gen_w'], params['ndom_gen_w']] \
        + list(params['bool_w']) + list(params['real_w'])
    head_bs = [params['gl_gen_b'], params['dom_gen_b'], params['ndom_gen_b']] \
        + list(params['bool_b']) + list(params['real_b'])
    head_sizes = tuple(int(w.shape[1]) for w in head_ws)
    total = sum(head_sizes)
    pad_to = ((total + 127) // 128) * 128
    w_cat = jnp.pad(jnp.concatenate(head_ws, axis=1), ((0, 0), (0, pad_to - total)))
    b_cat = jnp.pad(jnp.concatenate(head_bs, axis=0), (0, pad_to - total))
    heads = dict(w=w_cat.astype(bf16), b=b_cat.reshape(1, pad_to))

    packed = dict(enc=enc_p, dec=dec_p, heads=heads,
                  src_emb=params['src_emb'], gl_emb=params['gl_emb'],
                  pos_emb=params['pos_emb'])
    return packed, head_sizes


# ----------------------------- forward (glue in plain JAX) -----------------------------

def make_pos_embedding(emb_size, maxlen=512):
    den = jnp.exp(-jnp.arange(0, emb_size, 2, dtype=jnp.float32)
                  * (math.log(10000.0) / emb_size))
    pos = jnp.arange(0, maxlen, dtype=jnp.float32).reshape(maxlen, 1)
    pe = jnp.zeros((maxlen, emb_size), jnp.float32)
    pe = pe.at[:, 0::2].set(jnp.sin(pos * den))
    pe = pe.at[:, 1::2].set(jnp.cos(pos * den))
    return pe.reshape(maxlen, 1, emb_size)


def forward(packed, src, gl, src_mask, gl_mask,
            src_padding_mask, gl_padding_mask, memory_key_padding_mask,
            *, head_sizes):
    pe = packed['pos_emb']
    E = packed['src_emb'].shape[1]
    S, N = src.shape
    T = gl.shape[0]

    # TODO(synk): token-embedding gather stays in plain JAX (no useful Pallas gather at this size).
    src_emb = jnp.take(packed['src_emb'], src, axis=0) * math.sqrt(E) + pe[:S]   # (S, N, E)
    gl_emb = jnp.take(packed['gl_emb'], gl, axis=0) * math.sqrt(E) + pe[:T]      # (T, N, E)

    # batch-first bf16 activations for the fused kernels
    x_src = jnp.transpose(src_emb, (1, 0, 2)).astype(jnp.bfloat16)   # (N, S, E)
    x_gl = jnp.transpose(gl_emb, (1, 0, 2)).astype(jnp.bfloat16)     # (N, T, E)

    # additive masks, combined once (never broadcast over heads in HBM)
    kp_src = jnp.where(src_padding_mask, NEG_INF, 0.0).astype(jnp.float32)[:, None, :]
    kp_gl = jnp.where(gl_padding_mask, NEG_INF, 0.0).astype(jnp.float32)[:, None, :]
    kp_mem = jnp.where(memory_key_padding_mask, NEG_INF, 0.0).astype(jnp.float32)[:, None, :]
    enc_mask = src_mask.astype(jnp.float32)[None, :, :] + kp_src      # (N, S, S)
    dec_self_mask = gl_mask.astype(jnp.float32)[None, :, :] + kp_gl   # (N, T, T)
    # cross-attention memory_mask is None in the module -> only key-padding mask is passed

    memory = run_encoder(x_src, enc_mask, packed['enc'])               # (N, S, E) bf16
    head_out = run_decoder(x_gl, memory, dec_self_mask, kp_mem,
                           packed['dec'], packed['heads'])             # (N, T, 128) f32

    y = jnp.transpose(head_out, (1, 0, 2))                             # (T, N, 128)
    outs = []
    off = 0
    for sz in head_sizes:
        outs.append(y[:, :, off:off + sz])
        off += sz
    return outs


# ----------------------------- deterministic parameter init -----------------------------

def init_params(key, num_enc, num_dec, emb, src_v, gl_v, dom_v, ndom_v, ffn_dim):
    keys = iter(jax.random.split(key, 512))

    def nrm(shape, scale=0.05):
        return scale * jax.random.normal(next(keys), shape, dtype=jnp.float32)

    zeros = lambda s: jnp.zeros(s, jnp.float32)
    ones = lambda s: jnp.ones(s, jnp.float32)

    def mha_p():
        # q separate (cross-attn has a different source); k|v packed into one (E, 2E).
        # NOTE: layout differs from PyTorch's packed q|k|v in_proj; re-pack if porting weights.
        return dict(wq=nrm((emb, emb)), bq=zeros((emb,)),
                    wkv=nrm((emb, 2 * emb)), bkv=zeros((2 * emb,)),
                    wo=nrm((emb, emb)), bo=zeros((emb,)))

    def ffn_p():
        return dict(w1=nrm((emb, ffn_dim)), b1=zeros((ffn_dim,)),
                    w2=nrm((ffn_dim, emb)), b2=zeros((emb,)))

    enc_layers = [dict(self_attn=mha_p(), **ffn_p(),
                       ln1_g=ones((emb,)), ln1_b=zeros((emb,)),
                       ln2_g=ones((emb,)), ln2_b=zeros((emb,)))
                  for _ in range(num_enc)]
    dec_layers = [dict(self_attn=mha_p(), cross_attn=mha_p(), **ffn_p(),
                       ln1_g=ones((emb,)), ln1_b=zeros((emb,)),
                       ln2_g=ones((emb,)), ln2_b=zeros((emb,)),
                       ln3_g=ones((emb,)), ln3_b=zeros((emb,)))
                  for _ in range(num_dec)]

    return dict(
        enc_layers=enc_layers,
        dec_layers=dec_layers,
        src_emb=nrm((src_v, emb), 1.0),
        gl_emb=nrm((gl_v, emb), 1.0),
        dom_emb=nrm((dom_v, emb), 1.0),     # present in module, unused in forward
        ndom_emb=nrm((ndom_v, emb), 1.0),   # present in module, unused in forward
        gl_gen_w=nrm((emb, gl_v)), gl_gen_b=zeros((gl_v,)),
        dom_gen_w=nrm((emb, dom_v)), dom_gen_b=zeros((dom_v,)),
        ndom_gen_w=nrm((emb, ndom_v)), ndom_gen_b=zeros((ndom_v,)),
        bool_w=[nrm((emb, 2)) for _ in range(2)],
        bool_b=[zeros((2,)) for _ in range(2)],
        real_w=[nrm((emb, 1)) for _ in range(24)],
        real_b=[zeros((1,)) for _ in range(24)],
        pos_emb=make_pos_embedding(emb),
    )


# ----------------------------- driver -----------------------------

if __name__ == "__main__":
    num_encoder_layers, num_decoder_layers = 2, 2
    emb_size, dim_feedforward = 64, 128        # emb_size % NHEAD == 0 -> head_dim = 8
    src_vocab, gl_vocab, dom_vocab, ndom_vocab = 53, 37, 29, 19
    S, T, N = 12, 10, 2                        # src len, gl len, batch

    key = jax.random.PRNGKey(0)
    pkey, skey, gkey = jax.random.split(key, 3)
    params = init_params(pkey, num_encoder_layers, num_decoder_layers, emb_size,
                         src_vocab, gl_vocab, dom_vocab, ndom_vocab, dim_feedforward)
    packed, head_sizes = pack_params(params)

    # token ids are (seq, batch), matching PyTorch batch_first=False
    src = jax.random.randint(skey, (S, N), 0, src_vocab, dtype=jnp.int32)
    gl = jax.random.randint(gkey, (T, N), 0, gl_vocab, dtype=jnp.int32)

    src_mask = jnp.zeros((S, S), jnp.float32)
    gl_mask = jnp.where(jnp.triu(jnp.ones((T, T), bool), k=1), NEG_INF, 0.0).astype(jnp.float32)
    src_padding_mask = jnp.zeros((N, S), bool).at[:, -1].set(True)   # pad last src token
    gl_padding_mask = jnp.zeros((N, T), bool)
    memory_key_padding_mask = src_padding_mask

    fwd = jax.jit(functools.partial(forward, head_sizes=head_sizes))
    outs = fwd(packed, src, gl, src_mask, gl_mask,
               src_padding_mask, gl_padding_mask, memory_key_padding_mask)
    outs = jax.block_until_ready(outs)

    assert len(outs) == 3 + 2 + 24
    assert outs[0].shape == (T, N, gl_vocab)
    assert outs[1].shape == (T, N, dom_vocab)
    assert outs[2].shape == (T, N, ndom_vocab)
    assert all(o.shape == (T, N, 2) for o in outs[3:5])
    assert all(o.shape == (T, N, 1) for o in outs[5:])
    assert all(bool(jnp.all(jnp.isfinite(o))) for o in outs)
    print("KERNEL_OK")
</pallas_src>

<mosaic_0001>
module attributes {stable_mosaic.version = 11 : i64} {
  func.func @_encoder_kernel(%arg0: i32, %arg1: i32, %arg2: memref<1x12x64xbf16, #tpu.memory_space<vmem>>, %arg3: memref<1x12x12xf32, #tpu.memory_space<vmem>>, %arg4: memref<1x64x64xbf16, #tpu.memory_space<vmem>>, %arg5: memref<1x1x64xf32, #tpu.memory_space<vmem>>, %arg6: memref<1x64x128xbf16, #tpu.memory_space<vmem>>, %arg7: memref<1x1x128xf32, #tpu.memory_space<vmem>>, %arg8: memref<1x64x64xbf16, #tpu.memory_space<vmem>>, %arg9: memref<1x1x64xf32, #tpu.memory_space<vmem>>, %arg10: memref<1x1x64xf32, #tpu.memory_space<vmem>>, %arg11: memref<1x1x64xf32, #tpu.memory_space<vmem>>, %arg12: memref<1x64x128xbf16, #tpu.memory_space<vmem>>, %arg13: memref<1x1x128xf32, #tpu.memory_space<vmem>>, %arg14: memref<1x128x64xbf16, #tpu.memory_space<vmem>>, %arg15: memref<1x1x64xf32, #tpu.memory_space<vmem>>, %arg16: memref<1x1x64xf32, #tpu.memory_space<vmem>>, %arg17: memref<1x1x64xf32, #tpu.memory_space<vmem>>, %arg18: memref<1x12x64xbf16, #tpu.memory_space<vmem>>, %arg19: memref<12x64xf32, #tpu.memory_space<vmem>>) attributes {dimension_semantics = [#tpu.dimension_semantics<parallel>, #tpu.dimension_semantics<arbitrary>], iteration_bounds = array<i64: 2, 2>, scalar_prefetch = 0 : i64, scratch_operands = 1 : i64, tpu.core_type = #tpu.core_type<tc>, window_params = [{transform_indices = @transform_0, window_bounds = array<i64: 1, 12, 64>}, {transform_indices = @transform_1, window_bounds = array<i64: 1, 12, 12>}, {transform_indices = @transform_2, window_bounds = array<i64: 1, 64, 64>}, {transform_indices = @transform_3, window_bounds = array<i64: 1, 1, 64>}, {transform_indices = @transform_4, window_bounds = array<i64: 1, 64, 128>}, {transform_indices = @transform_5, window_bounds = array<i64: 1, 1, 128>}, {transform_indices = @transform_6, window_bounds = array<i64: 1, 64, 64>}, {transform_indices = @transform_7, window_bounds = array<i64: 1, 1, 64>}, {transform_indices = @transform_8, window_bounds = array<i64: 1, 1, 64>}, {transform_indices = @transform_9, window_bounds = array<i64: 1, 1, 64>}, {transform_indices = @transform_10, window_bounds = array<i64: 1, 64, 128>}, {transform_indices = @transform_11, window_bounds = array<i64: 1, 1, 128>}, {transform_indices = @transform_12, window_bounds = array<i64: 1, 128, 64>}, {transform_indices = @transform_13, window_bounds = array<i64: 1, 1, 64>}, {transform_indices = @transform_14, window_bounds = array<i64: 1, 1, 64>}, {transform_indices = @transform_15, window_bounds = array<i64: 1, 1, 64>}, {transform_indices = @transform_16, window_bounds = array<i64: 1, 12, 64>}]} {
    %c0_i32 = arith.constant 0 : i32
    %0 = arith.cmpi eq, %arg1, %c0_i32 : i32
    %1 = arith.extui %0 : i1 to i32
    %c0_i32_0 = arith.constant 0 : i32
    %2 = arith.cmpi ne, %1, %c0_i32_0 : i32
    scf.if %2 {
      %c0_105 = arith.constant 0 : index
      %c0_106 = arith.constant 0 : index
      %c0_107 = arith.constant 0 : index
      %275 = vector.load %arg2[%c0_105, %c0_106, %c0_107] : memref<1x12x64xbf16, #tpu.memory_space<vmem>>, vector<1x12x64xbf16>
      %276 = vector.shape_cast %275 : vector<1x12x64xbf16> to vector<12x64xbf16>
      %277 = arith.extf %276 : vector<12x64xbf16> to vector<12x64xf32>
      %c0_108 = arith.constant 0 : index
      %c0_109 = arith.constant 0 : index
      %278 = vector.load %arg19[%c0_108, %c0_109] : memref<12x64xf32, #tpu.memory_space<vmem>>, vector<12x64xf32>
      tpu.vector_store %arg19[%c0_108, %c0_109], %277 {strides = array<i32>} : memref<12x64xf32, #tpu.memory_space<vmem>>, vector<12x64xf32>,
    } else {
    }
    %c0 = arith.constant 0 : index
    %c0_1 = arith.constant 0 : index
    %3 = vector.load %arg19[%c0, %c0_1] : memref<12x64xf32, #tpu.memory_space<vmem>>, vector<12x64xf32>
    %c0_2 = arith.constant 0 : index
    %c0_3 = arith.constant 0 : index
    %c0_4 = arith.constant 0 : index
    %4 = vector.load %arg3[%c0_2, %c0_3, %c0_4] : memref<1x12x12xf32, #tpu.memory_space<vmem>>, vector<1x12x12xf32>
    %5 = vector.shape_cast %4 : vector<1x12x12xf32> to vector<12x12xf32>
    %c0_5 = arith.constant 0 : index
    %c0_6 = arith.constant 0 : index
    %c0_7 = arith.constant 0 : index
    %6 = vector.load %arg4[%c0_5, %c0_6, %c0_7] : memref<1x64x64xbf16, #tpu.memory_space<vmem>>, vector<1x64x64xbf16>
    %7 = vector.shape_cast %6 : vector<1x64x64xbf16> to vector<64x64xbf16>
    %c0_8 = arith.constant 0 : index
    %c0_9 = arith.constant 0 : index
    %c0_10 = arith.constant 0 : index
    %8 = vector.load %arg5[%c0_8, %c0_9, %c0_10] : memref<1x1x64xf32, #tpu.memory_space<vmem>>, vector<1x1x64xf32>
    %9 = vector.shape_cast %8 : vector<1x1x64xf32> to vector<1x64xf32>
    %c0_11 = arith.constant 0 : index
    %c0_12 = arith.constant 0 : index
    %c0_13 = arith.constant 0 : index
    %10 = vector.load %arg6[%c0_11, %c0_12, %c0_13] : memref<1x64x128xbf16, #tpu.memory_space<vmem>>, vector<1x64x128xbf16>
    %11 = vector.shape_cast %10 : vector<1x64x128xbf16> to vector<64x128xbf16>
    %c0_14 = arith.constant 0 : index
    %c0_15 = arith.constant 0 : index
    %c0_16 = arith.constant 0 : index
    %12 = vector.load %arg7[%c0_14, %c0_15, %c0_16] : memref<1x1x128xf32, #tpu.memory_space<vmem>>, vector<1x1x128xf32>
    %13 = vector.shape_cast %12 : vector<1x1x128xf32> to vector<1x128xf32>
    %c0_17 = arith.constant 0 : index
    %c0_18 = arith.constant 0 : index
    %c0_19 = arith.constant 0 : index
    %14 = vector.load %arg8[%c0_17, %c0_18, %c0_19] : memref<1x64x64xbf16, #tpu.memory_space<vmem>>, vector<1x64x64xbf16>
    %15 = vector.shape_cast %14 : vector<1x64x64xbf16> to vector<64x64xbf16>
    %c0_20 = arith.constant 0 : index
    %c0_21 = arith.constant 0 : index
    %c0_22 = arith.constant 0 : index
    %16 = vector.load %arg9[%c0_20, %c0_21, %c0_22] : memref<1x1x64xf32, #tpu.memory_space<vmem>>, vector<1x1x64xf32>
    %17 = vector.shape_cast %16 : vector<1x1x64xf32> to vector<1x64xf32>
    %18 = arith.truncf %3 : vector<12x64xf32> to vector<12x64xbf16>
    %cst = arith.constant dense<0.000000e+00> : vector<12x64xf32>
    %19 = tpu.matmul %18, %7, %cst {dimension_numbers = #tpu.dot_dimension_numbers<[1], [0], [0], [1], [0, 0, 1, 1], [], []>} : vector<12x64xbf16>, vector<64x64xbf16>, vector<12x64xf32> -> vector<12x64xf32>
    %20 = vector.broadcast %9 : vector<1x64xf32> to vector<12x64xf32>
    %21 = arith.addf %19, %20 : vector<12x64xf32>
    %22 = arith.truncf %3 : vector<12x64xf32> to vector<12x64xbf16>
    %cst_23 = arith.constant dense<0.000000e+00> : vector<12x128xf32>
    %23 = tpu.matmul %22, %11, %cst_23 {dimension_numbers = #tpu.dot_dimension_numbers<[1], [0], [0], [1], [0, 0, 1, 1], [], []>} : vector<12x64xbf16>, vector<64x128xbf16>, vector<12x128xf32> -> vector<12x128xf32>
    %24 = vector.broadcast %13 : vector<1x128xf32> to vector<12x128xf32>
    %25 = arith.addf %23, %24 : vector<12x128xf32>
    %26 = arith.truncf %21 : vector<12x64xf32> to vector<12x64xbf16>
    %27 = vector.extract_strided_slice %25 {offsets = [0, 0], sizes = [12, 64], strides = [1, 1]} : vector<12x128xf32> to vector<12x64xf32>
    %28 = tpu.transpose %27, [1, 0] : vector<12x64xf32> -> vector<64x12xf32>
    %29 = arith.truncf %28 : vector<64x12xf32> to vector<64x12xbf16>
    %30 = vector.extract_strided_slice %25 {offsets = [0, 64], sizes = [12, 64], strides = [1, 1]} : vector<12x128xf32> to vector<12x64xf32>
    %31 = arith.truncf %30 : vector<12x64xf32> to vector<12x64xbf16>
    %cst_24 = arith.constant 0.000000e+00 : f32
    %32 = vector.broadcast %cst_24 : f32 to vector<12x64xf32>
    %33 = vector.extract_strided_slice %26 {offsets = [0, 0], sizes = [12, 8], strides = [1, 1]} : vector<12x64xbf16> to vector<12x8xbf16>
    %34 = vector.extract_strided_slice %29 {offsets = [0, 0], sizes = [8, 12], strides = [1, 1]} : vector<64x12xbf16> to vector<8x12xbf16>
    %cst_25 = arith.constant dense<0.000000e+00> : vector<12x12xf32>
    %35 = tpu.matmul %33, %34, %cst_25 {dimension_numbers = #tpu.dot_dimension_numbers<[1], [0], [0], [1], [0, 0, 1, 1], [], []>} : vector<12x8xbf16>, vector<8x12xbf16>, vector<12x12xf32> -> vector<12x12xf32>
    %36 = arith.addf %35, %5 : vector<12x12xf32>
    %cst_26 = arith.constant dense<0xFF800000> : vector<12xf32>
    %37 = vector.multi_reduction <maximumf>, %36, %cst_26 [1] : vector<12x12xf32> to vector<12xf32>
    %38 = vector.shape_cast %37 : vector<12xf32> to vector<12x1xf32>
    %39 = vector.broadcast %38 : vector<12x1xf32> to vector<12x12xf32>
    %40 = arith.subf %36, %39 : vector<12x12xf32>
    %41 = math.exp %40 : vector<12x12xf32>
    %cst_27 = arith.constant dense<0.000000e+00> : vector<12xf32>
    %42 = vector.multi_reduction <add>, %41, %cst_27 [1] : vector<12x12xf32> to vector<12xf32>
    %43 = vector.shape_cast %42 : vector<12xf32> to vector<12x1xf32>
    %44 = tpu.reciprocal %43 {approx = true} : vector<12x1xf32> -> vector<12x1xf32>
    %45 = vector.broadcast %44 : vector<12x1xf32> to vector<12x12xf32>
    %46 = arith.mulf %41, %45 : vector<12x12xf32>
    %47 = arith.truncf %46 : vector<12x12xf32> to vector<12x12xbf16>
    %48 = vector.extract_strided_slice %31 {offsets = [0, 0], sizes = [12, 8], strides = [1, 1]} : vector<12x64xbf16> to vector<12x8xbf16>
    %cst_28 = arith.constant dense<0.000000e+00> : vector<12x8xf32>
    %49 = tpu.matmul %47, %48, %cst_28 {dimension_numbers = #tpu.dot_dimension_numbers<[1], [0], [0], [1], [0, 0, 1, 1], [], []>} : vector<12x12xbf16>, vector<12x8xbf16>, vector<12x8xf32> -> vector<12x8xf32>
    %50 = arith.truncf %49 : vector<12x8xf32> to vector<12x8xbf16>
    %51 = vector.extract_strided_slice %15 {offsets = [0, 0], sizes = [8, 64], strides = [1, 1]} : vector<64x64xbf16> to vector<8x64xbf16>
    %cst_29 = arith.constant dense<0.000000e+00> : vector<12x64xf32>
    %52 = tpu.matmul %50, %51, %cst_29 {dimension_numbers = #tpu.dot_dimension_numbers<[1], [0], [0], [1], [0, 0, 1, 1], [], []>} : vector<12x8xbf16>, vector<8x64xbf16>, vector<12x64xf32> -> vector<12x64xf32>
    %53 = arith.addf %32, %52 : vector<12x64xf32>
    %54 = vector.extract_strided_slice %26 {offsets = [0, 8], sizes = [12, 8], strides = [1, 1]} : vector<12x64xbf16> to vector<12x8xbf16>
    %55 = vector.extract_strided_slice %29 {offsets = [8, 0], sizes = [8, 12], strides = [1, 1]} : vector<64x12xbf16> to vector<8x12xbf16>
    %cst_30 = arith.constant dense<0.000000e+00> : vector<12x12xf32>
    %56 = tpu.matmul %54, %55, %cst_30 {dimension_numbers = #tpu.dot_dimension_numbers<[1], [0], [0], [1], [0, 0, 1, 1], [], []>} : vector<12x8xbf16>, vector<8x12xbf16>, vector<12x12xf32> -> vector<12x12xf32>
    %57 = arith.addf %56, %5 : vector<12x12xf32>
    %cst_31 = arith.constant dense<0xFF800000> : vector<12xf32>
    %58 = vector.multi_reduction <maximumf>, %57, %cst_31 [1] : vector<12x12xf32> to vector<12xf32>
    %59 = vector.shape_cast %58 : vector<12xf32> to vector<12x1xf32>
    %60 = vector.broadcast %59 : vector<12x1xf32> to vector<12x12xf32>
    %61 = arith.subf %57, %60 : vector<12x12xf32>
    %62 = math.exp %61 : vector<12x12xf32>
    %cst_32 = arith.constant dense<0.000000e+00> : vector<12xf32>
    %63 = vector.multi_reduction <add>, %62, %cst_32 [1] : vector<12x12xf32> to vector<12xf32>
    %64 = vector.shape_cast %63 : vector<12xf32> to vector<12x1xf32>
    %65 = tpu.reciprocal %64 {approx = true} : vector<12x1xf32> -> vector<12x1xf32>
    %66 = vector.broadcast %65 : vector<12x1xf32> to vector<12x12xf32>
    %67 = arith.mulf %62, %66 : vector<12x12xf32>
    %68 = arith.truncf %67 : vector<12x12xf32> to vector<12x12xbf16>
    %69 = vector.extract_strided_slice %31 {offsets = [0, 8], sizes = [12, 8], strides = [1, 1]} : vector<12x64xbf16> to vector<12x8xbf16>
    %cst_33 = arith.constant dense<0.000000e+00> : vector<12x8xf32>
    %70 = tpu.matmul %68, %69, %cst_33 {dimension_numbers = #tpu.dot_dimension_numbers<[1], [0], [0], [1], [0, 0, 1, 1], [], []>} : vector<12x12xbf16>, vector<12x8xbf16>, vector<12x8xf32> -> vector<12x8xf32>
    %71 = arith.truncf %70 : vector<12x8xf32> to vector<12x8xbf16>
    %72 = vector.extract_strided_slice %15 {offsets = [8, 0], sizes = [8, 64], strides = [1, 1]} : vector<64x64xbf16> to vector<8x64xbf16>
    %cst_34 = arith.constant dense<0.000000e+00> : vector<12x64xf32>
    %73 = tpu.matmul %71, %72, %cst_34 {dimension_numbers = #tpu.dot_dimension_numbers<[1], [0], [0], [1], [0, 0, 1, 1], [], []>} : vector<12x8xbf16>, vector<8x64xbf16>, vector<12x64xf32> -> vector<12x64xf32>
    %74 = arith.addf %53, %73 : vector<12x64xf32>
    %75 = vector.extract_strided_slice %26 {offsets = [0, 16], sizes = [12, 8], strides = [1, 1]} : vector<12x64xbf16> to vector<12x8xbf16>
    %76 = vector.extract_strided_slice %29 {offsets = [16, 0], sizes = [8, 12], strides = [1, 1]} : vector<64x12xbf16> to vector<8x12xbf16>
    %cst_35 = arith.constant dense<0.000000e+00> : vector<12x12xf32>
    %77 = tpu.matmul %75, %76, %cst_35 {dimension_numbers = #tpu.dot_dimension_numbers<[1], [0], [0], [1], [0, 0, 1, 1], [], []>} : vector<12x8xbf16>, vector<8x12xbf16>, vector<12x12xf32> -> vector<12x12xf32>
    %78 = arith.addf %77, %5 : vector<12x12xf32>
    %cst_36 = arith.constant dense<0xFF800000> : vector<12xf32>
    %79 = vector.multi_reduction <maximumf>, %78, %cst_36 [1] : vector<12x12xf32> to vector<12xf32>
    %80 = vector.shape_cast %79 : vector<12xf32> to vector<12x1xf32>
    %81 = vector.broadcast %80 : vector<12x1xf32> to vector<12x12xf32>
    %82 = arith.subf %78, %81 : vector<12x12xf32>
    %83 = math.exp %82 : vector<12x12xf32>
    %cst_37 = arith.constant dense<0.000000e+00> : vector<12xf32>
    %84 = vector.multi_reduction <add>, %83, %cst_37 [1] : vector<12x12xf32> to vector<12xf32>
    %85 = vector.shape_cast %84 : vector<12xf32> to vector<12x1xf32>
    %86 = tpu.reciprocal %85 {approx = true} : vector<12x1xf32> -> vector<12x1xf32>
    %87 = vector.broadcast %86 : vector<12x1xf32> to vector<12x12xf32>
    %88 = arith.mulf %83, %87 : vector<12x12xf32>
    %89 = arith.truncf %88 : vector<12x12xf32> to vector<12x12xbf16>
    %90 = vector.extract_strided_slice %31 {offsets = [0, 16], sizes = [12, 8], strides = [1, 1]} : vector<12x64xbf16> to vector<12x8xbf16>
    %cst_38 = arith.constant dense<0.000000e+00> : vector<12x8xf32>
    %91 = tpu.matmul %89, %90, %cst_38 {dimension_numbers = #tpu.dot_dimension_numbers<[1], [0], [0], [1], [0, 0, 1, 1], [], []>} : vector<12x12xbf16>, vector<12x8xbf16>, vector<12x8xf32> -> vector<12x8xf32>
    %92 = arith.truncf %91 : vector<12x8xf32> to vector<12x8xbf16>
    %93 = vector.extract_strided_slice %15 {offsets = [16, 0], sizes = [8, 64], strides = [1, 1]} : vector<64x64xbf16> to vector<8x64xbf16>
    %cst_39 = arith.constant dense<0.000000e+00> : vector<12x64xf32>
    %94 = tpu.matmul %92, %93, %cst_39 {dimension_numbers = #tpu.dot_dimension_numbers<[1], [0], [0], [1], [0, 0, 1, 1], [], []>} : vector<12x8xbf16>, vector<8x64xbf16>, vector<12x64xf32> -> vector<12x64xf32>
    %95 = arith.addf %74, %94 : vector<12x64xf32>
    %96 = vector.extract_strided_slice %26 {offsets = [0, 24], sizes = [12, 8], strides = [1, 1]} : vector<12x64xbf16> to vector<12x8xbf16>
    %97 = vector.extract_strided_slice %29 {offsets = [24, 0], sizes = [8, 12], strides = [1, 1]} : vector<64x12xbf16> to vector<8x12xbf16>
    %cst_40 = arith.constant dense<0.000000e+00> : vector<12x12xf32>
    %98 = tpu.matmul %96, %97, %cst_40 {dimension_numbers = #tpu.dot_dimension_numbers<[1], [0], [0], [1], [0, 0, 1, 1], [], []>} : vector<12x8xbf16>, vector<8x12xbf16>, vector<12x12xf32> -> vector<12x12xf32>
    %99 = arith.addf %98, %5 : vector<12x12xf32>
    %cst_41 = arith.constant dense<0xFF800000> : vector<12xf32>
    %100 = vector.multi_reduction <maximumf>, %99, %cst_41 [1] : vector<12x12xf32> to vector<12xf32>
    %101 = vector.shape_cast %100 : vector<12xf32> to vector<12x1xf32>
    %102 = vector.broadcast %101 : vector<12x1xf32> to vector<12x12xf32>
    %103 = arith.subf %99, %102 : vector<12x12xf32>
    %104 = math.exp %103 : vector<12x12xf32>
    %cst_42 = arith.constant dense<0.000000e+00> : vector<12xf32>
    %105 = vector.multi_reduction <add>, %104, %cst_42 [1] : vector<12x12xf32> to vector<12xf32>
    %106 = vector.shape_cast %105 : vector<12xf32> to vector<12x1xf32>
    %107 = tpu.reciprocal %106 {approx = true} : vector<12x1xf32> -> vector<12x1xf32>
    %108 = vector.broadcast %107 : vector<12x1xf32> to vector<12x12xf32>
    %109 = arith.mulf %104, %108 : vector<12x12xf32>
    %110 = arith.truncf %109 : vector<12x12xf32> to vector<12x12xbf16>
    %111 = vector.extract_strided_slice %31 {offsets = [0, 24], sizes = [12, 8], strides = [1, 1]} : vector<12x64xbf16> to vector<12x8xbf16>
    %cst_43 = arith.constant dense<0.000000e+00> : vector<12x8xf32>
    %112 = tpu.matmul %110, %111, %cst_43 {dimension_numbers = #tpu.dot_dimension_numbers<[1], [0], [0], [1], [0, 0, 1, 1], [], []>} : vector<12x12xbf16>, vector<12x8xbf16>, vector<12x8xf32> -> vector<12x8xf32>
    %113 = arith.truncf %112 : vector<12x8xf32> to vector<12x8xbf16>
    %114 = vector.extract_strided_slice %15 {offsets = [24, 0], sizes = [8, 64], strides = [1, 1]} : vector<64x64xbf16> to vector<8x64xbf16>
    %cst_44 = arith.constant dense<0.000000e+00> : vector<12x64xf32>
    %115 = tpu.matmul %113, %114, %cst_44 {dimension_numbers = #tpu.dot_dimension_numbers<[1], [0], [0], [1], [0, 0, 1, 1], [], []>} : vector<12x8xbf16>, vector<8x64xbf16>, vector<12x64xf32> -> vector<12x64xf32>
    %116 = arith.addf %95, %115 : vector<12x64xf32>
    %117 = vector.extract_strided_slice %26 {offsets = [0, 32], sizes = [12, 8], strides = [1, 1]} : vector<12x64xbf16> to vector<12x8xbf16>
    %118 = vector.extract_strided_slice %29 {offsets = [32, 0], sizes = [8, 12], strides = [1, 1]} : vector<64x12xbf16> to vector<8x12xbf16>
    %cst_45 = arith.constant dense<0.000000e+00> : vector<12x12xf32>
    %119 = tpu.matmul %117, %118, %cst_45 {dimension_numbers = #tpu.dot_dimension_numbers<[1], [0], [0], [1], [0, 0, 1, 1], [], []>} : vector<12x8xbf16>, vector<8x12xbf16>, vector<12x12xf32> -> vector<12x12xf32>
    %120 = arith.addf %119, %5 : vector<12x12xf32>
    %cst_46 = arith.constant dense<0xFF800000> : vector<12xf32>
    %121 = vector.multi_reduction <maximumf>, %120, %cst_46 [1] : vector<12x12xf32> to vector<12xf32>
    %122 = vector.shape_cast %121 : vector<12xf32> to vector<12x1xf32>
    %123 = vector.broadcast %122 : vector<12x1xf32> to vector<12x12xf32>
    %124 = arith.subf %120, %123 : vector<12x12xf32>
    %125 = math.exp %124 : vector<12x12xf32>
    %cst_47 = arith.constant dense<0.000000e+00> : vector<12xf32>
    %126 = vector.multi_reduction <add>, %125, %cst_47 [1] : vector<12x12xf32> to vector<12xf32>
    %127 = vector.shape_cast %126 : vector<12xf32> to vector<12x1xf32>
    %128 = tpu.reciprocal %127 {approx = true} : vector<12x1xf32> -> vector<12x1xf32>
    %129 = vector.broadcast %128 : vector<12x1xf32> to vector<12x12xf32>
    %130 = arith.mulf %125, %129 : vector<12x12xf32>
    %131 = arith.truncf %130 : vector<12x12xf32> to vector<12x12xbf16>
    %132 = vector.extract_strided_slice %31 {offsets = [0, 32], sizes = [12, 8], strides = [1, 1]} : vector<12x64xbf16> to vector<12x8xbf16>
    %cst_48 = arith.constant dense<0.000000e+00> : vector<12x8xf32>
    %133 = tpu.matmul %131, %132, %cst_48 {dimension_numbers = #tpu.dot_dimension_numbers<[1], [0], [0], [1], [0, 0, 1, 1], [], []>} : vector<12x12xbf16>, vector<12x8xbf16>, vector<12x8xf32> -> vector<12x8xf32>
    %134 = arith.truncf %133 : vector<12x8xf32> to vector<12x8xbf16>
    %135 = vector.extract_strided_slice %15 {offsets = [32, 0], sizes = [8, 64], strides = [1, 1]} : vector<64x64xbf16> to vector<8x64xbf16>
    %cst_49 = arith.constant dense<0.000000e+00> : vector<12x64xf32>
    %136 = tpu.matmul %134, %135, %cst_49 {dimension_numbers = #tpu.dot_dimension_numbers<[1], [0], [0], [1], [0, 0, 1, 1], [], []>} : vector<12x8xbf16>, vector<8x64xbf16>, vector<12x64xf32> -> vector<12x64xf32>
    %137 = arith.addf %116, %136 : vector<12x64xf32>
    %138 = vector.extract_strided_slice %26 {offsets = [0, 40], sizes = [12, 8], strides = [1, 1]} : vector<12x64xbf16> to vector<12x8xbf16>
    %139 = vector.extract_strided_slice %29 {offsets = [40, 0], sizes = [8, 12], strides = [1, 1]} : vector<64x12xbf16> to vector<8x12xbf16>
    %cst_50 = arith.constant dense<0.000000e+00> : vector<12x12xf32>
    %140 = tpu.matmul %138, %139, %cst_50 {dimension_numbers = #tpu.dot_dimension_numbers<[1], [0], [0], [1], [0, 0, 1, 1], [], []>} : vector<12x8xbf16>, vector<8x12xbf16>, vector<12x12xf32> -> vector<12x12xf32>
    %141 = arith.addf %140, %5 : vector<12x12xf32>
    %cst_51 = arith.constant dense<0xFF800000> : vector<12xf32>
    %142 = vector.multi_reduction <maximumf>, %141, %cst_51 [1] : vector<12x12xf32> to vector<12xf32>
    %143 = vector.shape_cast %142 : vector<12xf32> to vector<12x1xf32>
    %144 = vector.broadcast %143 : vector<12x1xf32> to vector<12x12xf32>
    %145 = arith.subf %141, %144 : vector<12x12xf32>
    %146 = math.exp %145 : vector<12x12xf32>
    %cst_52 = arith.constant dense<0.000000e+00> : vector<12xf32>
    %147 = vector.multi_reduction <add>, %146, %cst_52 [1] : vector<12x12xf32> to vector<12xf32>
    %148 = vector.shape_cast %147 : vector<12xf32> to vector<12x1xf32>
    %149 = tpu.reciprocal %148 {approx = true} : vector<12x1xf32> -> vector<12x1xf32>
    %150 = vector.broadcast %149 : vector<12x1xf32> to vector<12x12xf32>
    %151 = arith.mulf %146, %150 : vector<12x12xf32>
    %152 = arith.truncf %151 : vector<12x12xf32> to vector<12x12xbf16>
    %153 = vector.extract_strided_slice %31 {offsets = [0, 40], sizes = [12, 8], strides = [1, 1]} : vector<12x64xbf16> to vector<12x8xbf16>
    %cst_53 = arith.constant dense<0.000000e+00> : vector<12x8xf32>
    %154 = tpu.matmul %152, %153, %cst_53 {dimension_numbers = #tpu.dot_dimension_numbers<[1], [0], [0], [1], [0, 0, 1, 1], [], []>} : vector<12x12xbf16>, vector<12x8xbf16>, vector<12x8xf32> -> vector<12x8xf32>
    %155 = arith.truncf %154 : vector<12x8xf32> to vector<12x8xbf16>
    %156 = vector.extract_strided_slice %15 {offsets = [40, 0], sizes = [8, 64], strides = [1, 1]} : vector<64x64xbf16> to vector<8x64xbf16>
    %cst_54 = arith.constant dense<0.000000e+00> : vector<12x64xf32>
    %157 = tpu.matmul %155, %156, %cst_54 {dimension_numbers = #tpu.dot_dimension_numbers<[1], [0], [0], [1], [0, 0, 1, 1], [], []>} : vector<12x8xbf16>, vector<8x64xbf16>, vector<12x64xf32> -> vector<12x64xf32>
    %158 = arith.addf %137, %157 : vector<12x64xf32>
    %159 = vector.extract_strided_slice %26 {offsets = [0, 48], sizes = [12, 8], strides = [1, 1]} : vector<12x64xbf16> to vector<12x8xbf16>
    %160 = vector.extract_strided_slice %29 {offsets = [48, 0], sizes = [8, 12], strides = [1, 1]} : vector<64x12xbf16> to vector<8x12xbf16>
    %cst_55 = arith.constant dense<0.000000e+00> : vector<12x12xf32>
    %161 = tpu.matmul %159, %160, %cst_55 {dimension_numbers = #tpu.dot_dimension_numbers<[1], [0], [0], [1], [0, 0, 1, 1], [], []>} : vector<12x8xbf16>, vector<8x12xbf16>, vector<12x12xf32> -> vector<12x12xf32>
    %162 = arith.addf %161, %5 : vector<12x12xf32>
    %cst_56 = arith.constant dense<0xFF800000> : vector<12xf32>
    %163 = vector.multi_reduction <maximumf>, %162, %cst_56 [1] : vector<12x12xf32> to vector<12xf32>
    %164 = vector.shape_cast %163 : vector<12xf32> to vector<12x1xf32>
    %165 = vector.broadcast %164 : vector<12x1xf32> to vector<12x12xf32>
    %166 = arith.subf %162, %165 : vector<12x12xf32>
    %167 = math.exp %166 : vector<12x12xf32>
    %cst_57 = arith.constant dense<0.000000e+00> : vector<12xf32>
    %168 = vector.multi_reduction <add>, %167, %cst_57 [1] : vector<12x12xf32> to vector<12xf32>
    %169 = vector.shape_cast %168 : vector<12xf32> to vector<12x1xf32>
    %170 = tpu.reciprocal %169 {approx = true} : vector<12x1xf32> -> vector<12x1xf32>
    %171 = vector.broadcast %170 : vector<12x1xf32> to vector<12x12xf32>
    %172 = arith.mulf %167, %171 : vector<12x12xf32>
    %173 = arith.truncf %172 : vector<12x12xf32> to vector<12x12xbf16>
    %174 = vector.extract_strided_slice %31 {offsets = [0, 48], sizes = [12, 8], strides = [1, 1]} : vector<12x64xbf16> to vector<12x8xbf16>
    %cst_58 = arith.constant dense<0.000000e+00> : vector<12x8xf32>
    %175 = tpu.matmul %173, %174, %cst_58 {dimension_numbers = #tpu.dot_dimension_numbers<[1], [0], [0], [1], [0, 0, 1, 1], [], []>} : vector<12x12xbf16>, vector<12x8xbf16>, vector<12x8xf32> -> vector<12x8xf32>
    %176 = arith.truncf %175 : vector<12x8xf32> to vector<12x8xbf16>
    %177 = vector.extract_strided_slice %15 {offsets = [48, 0], sizes = [8, 64], strides = [1, 1]} : vector<64x64xbf16> to vector<8x64xbf16>
    %cst_59 = arith.constant dense<0.000000e+00> : vector<12x64xf32>
    %178 = tpu.matmul %176, %177, %cst_59 {dimension_numbers = #tpu.dot_dimension_numbers<[1], [0], [0], [1], [0, 0, 1, 1], [], []>} : vector<12x8xbf16>, vector<8x64xbf16>, vector<12x64xf32> -> vector<12x64xf32>
    %179 = arith.addf %158, %178 : vector<12x64xf32>
    %180 = vector.extract_strided_slice %26 {offsets = [0, 56], sizes = [12, 8], strides = [1, 1]} : vector<12x64xbf16> to vector<12x8xbf16>
    %181 = vector.extract_strided_slice %29 {offsets = [56, 0], sizes = [8, 12], strides = [1, 1]} : vector<64x12xbf16> to vector<8x12xbf16>
    %cst_60 = arith.constant dense<0.000000e+00> : vector<12x12xf32>
    %182 = tpu.matmul %180, %181, %cst_60 {dimension_numbers = #tpu.dot_dimension_numbers<[1], [0], [0], [1], [0, 0, 1, 1], [], []>} : vector<12x8xbf16>, vector<8x12xbf16>, vector<12x12xf32> -> vector<12x12xf32>
    %183 = arith.addf %182, %5 : vector<12x12xf32>
    %cst_61 = arith.constant dense<0xFF800000> : vector<12xf32>
    %184 = vector.multi_reduction <maximumf>, %183, %cst_61 [1] : vector<12x12xf32> to vector<12xf32>
    %185 = vector.shape_cast %184 : vector<12xf32> to vector<12x1xf32>
    %186 = vector.broadcast %185 : vector<12x1xf32> to vector<12x12xf32>
    %187 = arith.subf %183, %186 : vector<12x12xf32>
    %188 = math.exp %187 : vector<12x12xf32>
    %cst_62 = arith.constant dense<0.000000e+00> : vector<12xf32>
    %189 = vector.multi_reduction <add>, %188, %cst_62 [1] : vector<12x12xf32> to vector<12xf32>
    %190 = vector.shape_cast %189 : vector<12xf32> to vector<12x1xf32>
    %191 = tpu.reciprocal %190 {approx = true} : vector<12x1xf32> -> vector<12x1xf32>
    %192 = vector.broadcast %191 : vector<12x1xf32> to vector<12x12xf32>
    %193 = arith.mulf %188, %192 : vector<12x12xf32>
    %194 = arith.truncf %193 : vector<12x12xf32> to vector<12x12xbf16>
    %195 = vector.extract_strided_slice %31 {offsets = [0, 56], sizes = [12, 8], strides = [1, 1]} : vector<12x64xbf16> to vector<12x8xbf16>
    %cst_63 = arith.constant dense<0.000000e+00> : vector<12x8xf32>
    %196 = tpu.matmul %194, %195, %cst_63 {dimension_numbers = #tpu.dot_dimension_numbers<[1], [0], [0], [1], [0, 0, 1, 1], [], []>} : vector<12x12xbf16>, vector<12x8xbf16>, vector<12x8xf32> -> vector<12x8xf32>
    %197 = arith.truncf %196 : vector<12x8xf32> to vector<12x8xbf16>
    %198 = vector.extract_strided_slice %15 {offsets = [56, 0], sizes = [8, 64], strides = [1, 1]} : vector<64x64xbf16> to vector<8x64xbf16>
    %cst_64 = arith.constant dense<0.000000e+00> : vector<12x64xf32>
    %199 = tpu.matmul %197, %198, %cst_64 {dimension_numbers = #tpu.dot_dimension_numbers<[1], [0], [0], [1], [0, 0, 1, 1], [], []>} : vector<12x8xbf16>, vector<8x64xbf16>, vector<12x64xf32> -> vector<12x64xf32>
    %200 = arith.addf %179, %199 : vector<12x64xf32>
    %201 = vector.broadcast %17 : vector<1x64xf32> to vector<12x64xf32>
    %202 = arith.addf %200, %201 : vector<12x64xf32>
    %203 = arith.addf %3, %202 : vector<12x64xf32>
    %c0_65 = arith.constant 0 : index
    %c0_66 = arith.constant 0 : index
    %c0_67 = arith.constant 0 : index
    %204 = vector.load %arg10[%c0_65, %c0_66, %c0_67] : memref<1x1x64xf32, #tpu.memory_space<vmem>>, vector<1x1x64xf32>
    %205 = vector.shape_cast %204 : vector<1x1x64xf32> to vector<1x64xf32>
    %c0_68 = arith.constant 0 : index
    %c0_69 = arith.constant 0 : index
    %c0_70 = arith.constant 0 : index
    %206 = vector.load %arg11[%c0_68, %c0_69, %c0_70] : memref<1x1x64xf32, #tpu.memory_space<vmem>>, vector<1x1x64xf32>
    %207 = vector.shape_cast %206 : vector<1x1x64xf32> to vector<1x64xf32>
    %cst_71 = arith.constant dense<0.000000e+00> : vector<12xf32>
    %208 = vector.multi_reduction <add>, %203, %cst_71 [1] : vector<12x64xf32> to vector<12xf32>
    %209 = vector.shape_cast %208 : vector<12xf32> to vector<12x1xf32>
    %cst_72 = arith.constant 6.400000e+01 : f32
    %210 = vector.broadcast %cst_72 : f32 to vector<12x1xf32>
    %211 = arith.divf %209, %210 : vector<12x1xf32>
    %212 = vector.broadcast %211 : vector<12x1xf32> to vector<12x64xf32>
    %213 = arith.subf %203, %212 : vector<12x64xf32>
    %214 = arith.mulf %213, %213 : vector<12x64xf32>
    %cst_73 = arith.constant dense<0.000000e+00> : vector<12xf32>
    %215 = vector.multi_reduction <add>, %214, %cst_73 [1] : vector<12x64xf32> to vector<12xf32>
    %216 = vector.shape_cast %215 : vector<12xf32> to vector<12x1xf32>
    %cst_74 = arith.constant 6.400000e+01 : f32
    %217 = vector.broadcast %cst_74 : f32 to vector<12x1xf32>
    %218 = arith.divf %216, %217 : vector<12x1xf32>
    %cst_75 = arith.constant 9.99999974E-6 : f32
    %219 = vector.broadcast %cst_75 : f32 to vector<12x1xf32>
    %220 = arith.addf %218, %219 : vector<12x1xf32>
    %221 = math.rsqrt %220 : vector<12x1xf32>
    %222 = vector.broadcast %221 : vector<12x1xf32> to vector<12x64xf32>
    %223 = arith.mulf %213, %222 : vector<12x64xf32>
    %224 = vector.broadcast %205 : vector<1x64xf32> to vector<12x64xf32>
    %225 = arith.mulf %223, %224 : vector<12x64xf32>
    %226 = vector.broadcast %207 : vector<1x64xf32> to vector<12x64xf32>
    %227 = arith.addf %225, %226 : vector<12x64xf32>
    %c0_76 = arith.constant 0 : index
    %c0_77 = arith.constant 0 : index
    %c0_78 = arith.constant 0 : index
    %228 = vector.load %arg12[%c0_76, %c0_77, %c0_78] : memref<1x64x128xbf16, #tpu.memory_space<vmem>>, vector<1x64x128xbf16>
    %229 = vector.shape_cast %228 : vector<1x64x128xbf16> to vector<64x128xbf16>
    %c0_79 = arith.constant 0 : index
    %c0_80 = arith.constant 0 : index
    %c0_81 = arith.constant 0 : index
    %230 = vector.load %arg13[%c0_79, %c0_80, %c0_81] : memref<1x1x128xf32, #tpu.memory_space<vmem>>, vector<1x1x128xf32>
    %231 = vector.shape_cast %230 : vector<1x1x128xf32> to vector<1x128xf32>
    %c0_82 = arith.constant 0 : index
    %c0_83 = arith.constant 0 : index
    %c0_84 = arith.constant 0 : index
    %232 = vector.load %arg14[%c0_82, %c0_83, %c0_84] : memref<1x128x64xbf16, #tpu.memory_space<vmem>>, vector<1x128x64xbf16>
    %233 = vector.shape_cast %232 : vector<1x128x64xbf16> to vector<128x64xbf16>
    %c0_85 = arith.constant 0 : index
    %c0_86 = arith.constant 0 : index
    %c0_87 = arith.constant 0 : index
    %234 = vector.load %arg15[%c0_85, %c0_86, %c0_87] : memref<1x1x64xf32, #tpu.memory_space<vmem>>, vector<1x1x64xf32>
    %235 = vector.shape_cast %234 : vector<1x1x64xf32> to vector<1x64xf32>
    %236 = arith.truncf %227 : vector<12x64xf32> to vector<12x64xbf16>
    %cst_88 = arith.constant dense<0.000000e+00> : vector<12x128xf32>
    %237 = tpu.matmul %236, %229, %cst_88 {dimension_numbers = #tpu.dot_dimension_numbers<[1], [0], [0], [1], [0, 0, 1, 1], [], []>} : vector<12x64xbf16>, vector<64x128xbf16>, vector<12x128xf32> -> vector<12x128xf32>
    %238 = vector.broadcast %231 : vector<1x128xf32> to vector<12x128xf32>
    %239 = arith.addf %237, %238 : vector<12x128xf32>
    %cst_89 = arith.constant 0.000000e+00 : f32
    %240 = vector.broadcast %cst_89 : f32 to vector<12x128xf32>
    %241 = arith.maximumf %239, %240 : vector<12x128xf32>
    %242 = arith.truncf %241 : vector<12x128xf32> to vector<12x128xbf16>
    %cst_90 = arith.constant dense<0.000000e+00> : vector<12x64xf32>
    %243 = tpu.matmul %242, %233, %cst_90 {dimension_numbers = #tpu.dot_dimension_numbers<[1], [0], [0], [1], [0, 0, 1, 1], [], []>} : vector<12x128xbf16>, vector<128x64xbf16>, vector<12x64xf32> -> vector<12x64xf32>
    %244 = vector.broadcast %235 : vector<1x64xf32> to vector<12x64xf32>
    %245 = arith.addf %243, %244 : vector<12x64xf32>
    %246 = arith.addf %227, %245 : vector<12x64xf32>
    %c0_91 = arith.constant 0 : index
    %c0_92 = arith.constant 0 : index
    %c0_93 = arith.constant 0 : index
    %247 = vector.load %arg16[%c0_91, %c0_92, %c0_93] : memref<1x1x64xf32, #tpu.memory_space<vmem>>, vector<1x1x64xf32>
    %248 = vector.shape_cast %247 : vector<1x1x64xf32> to vector<1x64xf32>
    %c0_94 = arith.constant 0 : index
    %c0_95 = arith.constant 0 : index
    %c0_96 = arith.constant 0 : index
    %249 = vector.load %arg17[%c0_94, %c0_95, %c0_96] : memref<1x1x64xf32, #tpu.memory_space<vmem>>, vector<1x1x64xf32>
    %250 = vector.shape_cast %249 : vector<1x1x64xf32> to vector<1x64xf32>
    %cst_97 = arith.constant dense<0.000000e+00> : vector<12xf32>
    %251 = vector.multi_reduction <add>, %246, %cst_97 [1] : vector<12x64xf32> to vector<12xf32>
    %252 = vector.shape_cast %251 : vector<12xf32> to vector<12x1xf32>
    %cst_98 = arith.constant 6.400000e+01 : f32
    %253 = vector.broadcast %cst_98 : f32 to vector<12x1xf32>
    %254 = arith.divf %252, %253 : vector<12x1xf32>
    %255 = vector.broadcast %254 : vector<12x1xf32> to vector<12x64xf32>
    %256 = arith.subf %246, %255 : vector<12x64xf32>
    %257 = arith.mulf %256, %256 : vector<12x64xf32>
    %cst_99 = arith.constant dense<0.000000e+00> : vector<12xf32>
    %258 = vector.multi_reduction <add>, %257, %cst_99 [1] : vector<12x64xf32> to vector<12xf32>
    %259 = vector.shape_cast %258 : vector<12xf32> to vector<12x1xf32>
    %cst_100 = arith.constant 6.400000e+01 : f32
    %260 = vector.broadcast %cst_100 : f32 to vector<12x1xf32>
    %261 = arith.divf %259, %260 : vector<12x1xf32>
    %cst_101 = arith.constant 9.99999974E-6 : f32
    %262 = vector.broadcast %cst_101 : f32 to vector<12x1xf32>
    %263 = arith.addf %261, %262 : vector<12x1xf32>
    %264 = math.rsqrt %263 : vector<12x1xf32>
    %265 = vector.broadcast %264 : vector<12x1xf32> to vector<12x64xf32>
    %266 = arith.mulf %256, %265 : vector<12x64xf32>
    %267 = vector.broadcast %248 : vector<1x64xf32> to vector<12x64xf32>
    %268 = arith.mulf %266, %267 : vector<12x64xf32>
    %269 = vector.broadcast %250 : vector<1x64xf32> to vector<12x64xf32>
    %270 = arith.addf %268, %269 : vector<12x64xf32>
    %c0_102 = arith.constant 0 : index
    %c0_103 = arith.constant 0 : index
    %271 = vector.load %arg19[%c0_102, %c0_103] : memref<12x64xf32, #tpu.memory_space<vmem>>, vector<12x64xf32>
    tpu.vector_store %arg19[%c0_102, %c0_103], %270 {strides = array<i32>} : memref<12x64xf32, #tpu.memory_space<vmem>>, vector<12x64xf32>,
    %c1_i32 = arith.constant 1 : i32
    %272 = arith.cmpi eq, %arg1, %c1_i32 : i32
    %273 = arith.extui %272 : i1 to i32
    %c0_i32_104 = arith.constant 0 : i32
    %274 = arith.cmpi ne, %273, %c0_i32_104 : i32
    scf.if %274 {
      %275 = arith.truncf %270 : vector<12x64xf32> to vector<12x64xbf16>
      %c0_105 = arith.constant 0 : index
      %c0_106 = arith.constant 0 : index
      %c0_107 = arith.constant 0 : index
      %276 = vector.load %arg18[%c0_105, %c0_106, %c0_107] : memref<1x12x64xbf16, #tpu.memory_space<vmem>>, vector<1x12x64xbf16>
      %277 = vector.shape_cast %276 : vector<1x12x64xbf16> to vector<12x64xbf16>
      %278 = vector.shape_cast %275 : vector<12x64xbf16> to vector<1x12x64xbf16>
      tpu.vector_store %arg18[%c0_105, %c0_106, %c0_107], %278 {strides = array<i32>} : memref<1x12x64xbf16, #tpu.memory_space<vmem>>, vector<1x12x64xbf16>,
    } else {
    }
    return
  }
  func.func @transform_0(%arg0: i32, %arg1: i32) -> (i32, i32, i32) {
    %c0_i32 = arith.constant 0 : i32
    %c0_i32_0 = arith.constant 0 : i32
    %c0_i32_1 = arith.constant 0 : i32
    return %arg0, %c0_i32, %c0_i32_0 : i32, i32, i32
  }
  func.func @transform_1(%arg0: i32, %arg1: i32) -> (i32, i32, i32) {
    %c0_i32 = arith.constant 0 : i32
    %c0_i32_0 = arith.constant 0 : i32
    %c0_i32_1 = arith.constant 0 : i32
    return %arg0, %c0_i32, %c0_i32_0 : i32, i32, i32
  }
  func.func @transform_2(%arg0: i32, %arg1: i32) -> (i32, i32, i32) {
    %c0_i32 = arith.constant 0 : i32
    %c0_i32_0 = arith.constant 0 : i32
    %c0_i32_1 = arith.constant 0 : i32
    return %arg1, %c0_i32, %c0_i32_0 : i32, i32, i32
  }
  func.func @transform_3(%arg0: i32, %arg1: i32) -> (i32, i32, i32) {
    %c0_i32 = arith.constant 0 : i32
    %c0_i32_0 = arith.constant 0 : i32
    %c0_i32_1 = arith.constant 0 : i32
    return %arg1, %c0_i32, %c0_i32_0 : i32, i32, i32
  }
  func.func @transform_4(%arg0: i32, %arg1: i32) -> (i32, i32, i32) {
    %c0_i32 = arith.constant 0 : i32
    %c0_i32_0 = arith.constant 0 : i32
    %c0_i32_1 = arith.constant 0 : i32
    return %arg1, %c0_i32, %c0_i32_0 : i32, i32, i32
  }
  func.func @transform_5(%arg0: i32, %arg1: i32) -> (i32, i32, i32) {
    %c0_i32 = arith.constant 0 : i32
    %c0_i32_0 = arith.constant 0 : i32
    %c0_i32_1 = arith.constant 0 : i32
    return %arg1, %c0_i32, %c0_i32_0 : i32, i32, i32
  }
  func.func @transform_6(%arg0: i32, %arg1: i32) -> (i32, i32, i32) {
    %c0_i32 = arith.constant 0 : i32
    %c0_i32_0 = arith.constant 0 : i32
    %c0_i32_1 = arith.constant 0 : i32
    return %arg1, %c0_i32, %c0_i32_0 : i32, i32, i32
  }
  func.func @transform_7(%arg0: i32, %arg1: i32) -> (i32, i32, i32) {
    %c0_i32 = arith.constant 0 : i32
    %c0_i32_0 = arith.constant 0 : i32
    %c0_i32_1 = arith.constant 0 : i32
    return %arg1, %c0_i32, %c0_i32_0 : i32, i32, i32
  }
  func.func @transform_8(%arg0: i32, %arg1: i32) -> (i32, i32, i32) {
    %c0_i32 = arith.constant 0 : i32
    %c0_i32_0 = arith.constant 0 : i32
    %c0_i32_1 = arith.constant 0 : i32
    return %arg1, %c0_i32, %c0_i32_0 : i32, i32, i32
  }
  func.func @transform_9(%arg0: i32, %arg1: i32) -> (i32, i32, i32) {
    %c0_i32 = arith.constant 0 : i32
    %c0_i32_0 = arith.constant 0 : i32
    %c0_i32_1 = arith.constant 0 : i32
    return %arg1, %c0_i32, %c0_i32_0 : i32, i32, i32
  }
  func.func @transform_10(%arg0: i32, %arg1: i32) -> (i32, i32, i32) {
    %c0_i32 = arith.constant 0 : i32
    %c0_i32_0 = arith.constant 0 : i32
    %c0_i32_1 = arith.constant 0 : i32
    return %arg1, %c0_i32, %c0_i32_0 : i32, i32, i32
  }
  func.func @transform_11(%arg0: i32, %arg1: i32) -> (i32, i32, i32) {
    %c0_i32 = arith.constant 0 : i32
    %c0_i32_0 = arith.constant 0 : i32
    %c0_i32_1 = arith.constant 0 : i32
    return %arg1, %c0_i32, %c0_i32_0 : i32, i32, i32
  }
  func.func @transform_12(%arg0: i32, %arg1: i32) -> (i32, i32, i32) {
    %c0_i32 = arith.constant 0 : i32
    %c0_i32_0 = arith.constant 0 : i32
    %c0_i32_1 = arith.constant 0 : i32
    return %arg1, %c0_i32, %c0_i32_0 : i32, i32, i32
  }
  func.func @transform_13(%arg0: i32, %arg1: i32) -> (i32, i32, i32) {
    %c0_i32 = arith.constant 0 : i32
    %c0_i32_0 = arith.constant 0 : i32
    %c0_i32_1 = arith.constant 0 : i32
    return %arg1, %c0_i32, %c0_i32_0 : i32, i32, i32
  }
  func.func @transform_14(%arg0: i32, %arg1: i32) -> (i32, i32, i32) {
    %c0_i32 = arith.constant 0 : i32
    %c0_i32_0 = arith.constant 0 : i32
    %c0_i32_1 = arith.constant 0 : i32
    return %arg1, %c0_i32, %c0_i32_0 : i32, i32, i32
  }
  func.func @transform_15(%arg0: i32, %arg1: i32) -> (i32, i32, i32) {
    %c0_i32 = arith.constant 0 : i32
    %c0_i32_0 = arith.constant 0 : i32
    %c0_i32_1 = arith.constant 0 : i32
    return %arg1, %c0_i32, %c0_i32_0 : i32, i32, i32
  }
  func.func @transform_16(%arg0: i32, %arg1: i32) -> (i32, i32, i32) {
    %c0_i32 = arith.constant 0 : i32
    %c0_i32_0 = arith.constant 0 : i32
    %c0_i32_1 = arith.constant 0 : i32
    return %arg0, %c0_i32, %c0_i32_0 : i32, i32, i32
  }
}

module attributes {stable_mosaic.version = 11 : i64} {
  func.func @_decoder_kernel(%arg0: i32, %arg1: i32, %arg2: memref<1x10x64xbf16, #tpu.memory_space<vmem>>, %arg3: memref<1x12x64xbf16, #tpu.memory_space<vmem>>, %arg4: memref<1x10x10xf32, #tpu.memory_space<vmem>>, %arg5: memref<1x1x12xf32, #tpu.memory_space<vmem>>, %arg6: memref<1x64x64xbf16, #tpu.memory_space<vmem>>, %arg7: memref<1x1x64xf32, #tpu.memory_space<vmem>>, %arg8: memref<1x64x128xbf16, #tpu.memory_space<vmem>>, %arg9: memref<1x1x128xf32, #tpu.memory_space<vmem>>, %arg10: memref<1x64x64xbf16, #tpu.memory_space<vmem>>, %arg11: memref<1x1x64xf32, #tpu.memory_space<vmem>>, %arg12: memref<1x1x64xf32, #tpu.memory_space<vmem>>, %arg13: memref<1x1x64xf32, #tpu.memory_space<vmem>>, %arg14: memref<1x64x64xbf16, #tpu.memory_space<vmem>>, %arg15: memref<1x1x64xf32, #tpu.memory_space<vmem>>, %arg16: memref<1x64x128xbf16, #tpu.memory_space<vmem>>, %arg17: memref<1x1x128xf32, #tpu.memory_space<vmem>>, %arg18: memref<1x64x64xbf16, #tpu.memory_space<vmem>>, %arg19: memref<1x1x64xf32, #tpu.memory_space<vmem>>, %arg20: memref<1x1x64xf32, #tpu.memory_space<vmem>>, %arg21: memref<1x1x64xf32, #tpu.memory_space<vmem>>, %arg22: memref<1x64x128xbf16, #tpu.memory_space<vmem>>, %arg23: memref<1x1x128xf32, #tpu.memory_space<vmem>>, %arg24: memref<1x128x64xbf16, #tpu.memory_space<vmem>>, %arg25: memref<1x1x64xf32, #tpu.memory_space<vmem>>, %arg26: memref<1x1x64xf32, #tpu.memory_space<vmem>>, %arg27: memref<1x1x64xf32, #tpu.memory_space<vmem>>, %arg28: memref<64x128xbf16, #tpu.memory_space<vmem>>, %arg29: memref<1x128xf32, #tpu.memory_space<vmem>>, %arg30: memref<1x10x128xf32, #tpu.memory_space<vmem>>, %arg31: memref<10x64xf32, #tpu.memory_space<vmem>>) attributes {dimension_semantics = [#tpu.dimension_semantics<parallel>, #tpu.dimension_semantics<arbitrary>], iteration_bounds = array<i64: 2, 2>, scalar_prefetch = 0 : i64, scratch_operands = 1 : i64, tpu.core_type = #tpu.core_type<tc>, window_params = [{transform_indices = @transform_0, window_bounds = array<i64: 1, 10, 64>}, {transform_indices = @transform_1, window_bounds = array<i64: 1, 12, 64>}, {transform_indices = @transform_2, window_bounds = array<i64: 1, 10, 10>}, {transform_indices = @transform_3, window_bounds = array<i64: 1, 1, 12>}, {transform_indices = @transform_4, window_bounds = array<i64: 1, 64, 64>}, {transform_indices = @transform_5, window_bounds = array<i64: 1, 1, 64>}, {transform_indices = @transform_6, window_bounds = array<i64: 1, 64, 128>}, {transform_indices = @transform_7, window_bounds = array<i64: 1, 1, 128>}, {transform_indices = @transform_8, window_bounds = array<i64: 1, 64, 64>}, {transform_indices = @transform_9, window_bounds = array<i64: 1, 1, 64>}, {transform_indices = @transform_10, window_bounds = array<i64: 1, 1, 64>}, {transform_indices = @transform_11, window_bounds = array<i64: 1, 1, 64>}, {transform_indices = @transform_12, window_bounds = array<i64: 1, 64, 64>}, {transform_indices = @transform_13, window_bounds = array<i64: 1, 1, 64>}, {transform_indices = @transform_14, window_bounds = array<i64: 1, 64, 128>}, {transform_indices = @transform_15, window_bounds = array<i64: 1, 1, 128>}, {transform_indices = @transform_16, window_bounds = array<i64: 1, 64, 64>}, {transform_indices = @transform_17, window_bounds = array<i64: 1, 1, 64>}, {transform_indices = @transform_18, window_bounds = array<i64: 1, 1, 64>}, {transform_indices = @transform_19, window_bounds = array<i64: 1, 1, 64>}, {transform_indices = @transform_20, window_bounds = array<i64: 1, 64, 128>}, {transform_indices = @transform_21, window_bounds = array<i64: 1, 1, 128>}, {transform_indices = @transform_22, window_bounds = array<i64: 1, 128, 64>}, {transform_indices = @transform_23, window_bounds = array<i64: 1, 1, 64>}, {transform_indices = @transform_24, window_bounds = array<i64: 1, 1, 64>}, {transform_indices = @transform_25, window_bounds = array<i64: 1, 1, 64>}, {pipeline_mode = #tpu.pipeline_mode<synchronous>, transform_indices = @transform_26, window_bounds = array<i64: 64, 128>}, {pipeline_mode = #tpu.pipeline_mode<synchronous>, transform_indices = @transform_27, window_bounds = array<i64: 1, 128>}, {transform_indices = @transform_28, window_bounds = array<i64: 1, 10, 128>}]} {
    %c0_i32 = arith.constant 0 : i32
    %0 = arith.cmpi eq, %arg1, %c0_i32 : i32
    %1 = arith.extui %0 : i1 to i32
    %c0_i32_0 = arith.constant 0 : i32
    %2 = arith.cmpi ne, %1, %c0_i32_0 : i32
    scf.if %2 {
      %c0_183 = arith.constant 0 : index
      %c0_184 = arith.constant 0 : index
      %c0_185 = arith.constant 0 : index
      %508 = vector.load %arg2[%c0_183, %c0_184, %c0_185] : memref<1x10x64xbf16, #tpu.memory_space<vmem>>, vector<1x10x64xbf16>
      %509 = vector.shape_cast %508 : vector<1x10x64xbf16> to vector<10x64xbf16>
      %510 = arith.extf %509 : vector<10x64xbf16> to vector<10x64xf32>
      %c0_186 = arith.constant 0 : index
      %c0_187 = arith.constant 0 : index
      %511 = vector.load %arg31[%c0_186, %c0_187] : memref<10x64xf32, #tpu.memory_space<vmem>>, vector<10x64xf32>
      tpu.vector_store %arg31[%c0_186, %c0_187], %510 {strides = array<i32>} : memref<10x64xf32, #tpu.memory_space<vmem>>, vector<10x64xf32>,
    } else {
    }
    %c0 = arith.constant 0 : index
    %c0_1 = arith.constant 0 : index
    %3 = vector.load %arg31[%c0, %c0_1] : memref<10x64xf32, #tpu.memory_space<vmem>>, vector<10x64xf32>
    %c0_2 = arith.constant 0 : index
    %c0_3 = arith.constant 0 : index
    %c0_4 = arith.constant 0 : index
    %4 = vector.load %arg3[%c0_2, %c0_3, %c0_4] : memref<1x12x64xbf16, #tpu.memory_space<vmem>>, vector<1x12x64xbf16>
    %5 = vector.shape_cast %4 : vector<1x12x64xbf16> to vector<12x64xbf16>
    %c0_5 = arith.constant 0 : index
    %c0_6 = arith.constant 0 : index
    %c0_7 = arith.constant 0 : index
    %6 = vector.load %arg4[%c0_5, %c0_6, %c0_7] : memref<1x10x10xf32, #tpu.memory_space<vmem>>, vector<1x10x10xf32>
    %7 = vector.shape_cast %6 : vector<1x10x10xf32> to vector<10x10xf32>
    %c0_8 = arith.constant 0 : index
    %c0_9 = arith.constant 0 : index
    %c0_10 = arith.constant 0 : index
    %8 = vector.load %arg6[%c0_8, %c0_9, %c0_10] : memref<1x64x64xbf16, #tpu.memory_space<vmem>>, vector<1x64x64xbf16>
    %9 = vector.shape_cast %8 : vector<1x64x64xbf16> to vector<64x64xbf16>
    %c0_11 = arith.constant 0 : index
    %c0_12 = arith.constant 0 : index
    %c0_13 = arith.constant 0 : index
    %10 = vector.load %arg7[%c0_11, %c0_12, %c0_13] : memref<1x1x64xf32, #tpu.memory_space<vmem>>, vector<1x1x64xf32>
    %11 = vector.shape_cast %10 : vector<1x1x64xf32> to vector<1x64xf32>
    %c0_14 = arith.constant 0 : index
    %c0_15 = arith.constant 0 : index
    %c0_16 = arith.constant 0 : index
    %12 = vector.load %arg8[%c0_14, %c0_15, %c0_16] : memref<1x64x128xbf16, #tpu.memory_space<vmem>>, vector<1x64x128xbf16>
    %13 = vector.shape_cast %12 : vector<1x64x128xbf16> to vector<64x128xbf16>
    %c0_17 = arith.constant 0 : index
    %c0_18 = arith.constant 0 : index
    %c0_19 = arith.constant 0 : index
    %14 = vector.load %arg9[%c0_17, %c0_18, %c0_19] : memref<1x1x128xf32, #tpu.memory_space<vmem>>, vector<1x1x128xf32>
    %15 = vector.shape_cast %14 : vector<1x1x128xf32> to vector<1x128xf32>
    %c0_20 = arith.constant 0 : index
    %c0_21 = arith.constant 0 : index
    %c0_22 = arith.constant 0 : index
    %16 = vector.load %arg10[%c0_20, %c0_21, %c0_22] : memref<1x64x64xbf16, #tpu.memory_space<vmem>>, vector<1x64x64xbf16>
    %17 = vector.shape_cast %16 : vector<1x64x64xbf16> to vector<64x64xbf16>
    %c0_23 = arith.constant 0 : index
    %c0_24 = arith.constant 0 : index
    %c0_25 = arith.constant 0 : index
    %18 = vector.load %arg11[%c0_23, %c0_24, %c0_25] : memref<1x1x64xf32, #tpu.memory_space<vmem>>, vector<1x1x64xf32>
    %19 = vector.shape_cast %18 : vector<1x1x64xf32> to vector<1x64xf32>
    %20 = arith.truncf %3 : vector<10x64xf32> to vector<10x64xbf16>
    %cst = arith.constant dense<0.000000e+00> : vector<10x64xf32>
    %21 = tpu.matmul %20, %9, %cst {dimension_numbers = #tpu.dot_dimension_numbers<[1], [0], [0], [1], [0, 0, 1, 1], [], []>} : vector<10x64xbf16>, vector<64x64xbf16>, vector<10x64xf32> -> vector<10x64xf32>
    %22 = vector.broadcast %11 : vector<1x64xf32> to vector<10x64xf32>
    %23 = arith.addf %21, %22 : vector<10x64xf32>
    %24 = arith.truncf %3 : vector<10x64xf32> to vector<10x64xbf16>
    %cst_26 = arith.constant dense<0.000000e+00> : vector<10x128xf32>
    %25 = tpu.matmul %24, %13, %cst_26 {dimension_numbers = #tpu.dot_dimension_numbers<[1], [0], [0], [1], [0, 0, 1, 1], [], []>} : vector<10x64xbf16>, vector<64x128xbf16>, vector<10x128xf32> -> vector<10x128xf32>
    %26 = vector.broadcast %15 : vector<1x128xf32> to vector<10x128xf32>
    %27 = arith.addf %25, %26 : vector<10x128xf32>
    %28 = arith.truncf %23 : vector<10x64xf32> to vector<10x64xbf16>
    %29 = vector.extract_strided_slice %27 {offsets = [0, 0], sizes = [10, 64], strides = [1, 1]} : vector<10x128xf32> to vector<10x64xf32>
    %30 = tpu.transpose %29, [1, 0] : vector<10x64xf32> -> vector<64x10xf32>
    %31 = arith.truncf %30 : vector<64x10xf32> to vector<64x10xbf16>
    %32 = vector.extract_strided_slice %27 {offsets = [0, 64], sizes = [10, 64], strides = [1, 1]} : vector<10x128xf32> to vector<10x64xf32>
    %33 = arith.truncf %32 : vector<10x64xf32> to vector<10x64xbf16>
    %cst_27 = arith.constant 0.000000e+00 : f32
    %34 = vector.broadcast %cst_27 : f32 to vector<10x64xf32>
    %35 = vector.extract_strided_slice %28 {offsets = [0, 0], sizes = [10, 8], strides = [1, 1]} : vector<10x64xbf16> to vector<10x8xbf16>
    %36 = vector.extract_strided_slice %31 {offsets = [0, 0], sizes = [8, 10], strides = [1, 1]} : vector<64x10xbf16> to vector<8x10xbf16>
    %cst_28 = arith.constant dense<0.000000e+00> : vector<10x10xf32>
    %37 = tpu.matmul %35, %36, %cst_28 {dimension_numbers = #tpu.dot_dimension_numbers<[1], [0], [0], [1], [0, 0, 1, 1], [], []>} : vector<10x8xbf16>, vector<8x10xbf16>, vector<10x10xf32> -> vector<10x10xf32>
    %38 = arith.addf %37, %7 : vector<10x10xf32>
    %cst_29 = arith.constant dense<0xFF800000> : vector<10xf32>
    %39 = vector.multi_reduction <maximumf>, %38, %cst_29 [1] : vector<10x10xf32> to vector<10xf32>
    %40 = vector.shape_cast %39 : vector<10xf32> to vector<10x1xf32>
    %41 = vector.broadcast %40 : vector<10x1xf32> to vector<10x10xf32>
    %42 = arith.subf %38, %41 : vector<10x10xf32>
    %43 = math.exp %42 : vector<10x10xf32>
    %cst_30 = arith.constant dense<0.000000e+00> : vector<10xf32>
    %44 = vector.multi_reduction <add>, %43, %cst_30 [1] : vector<10x10xf32> to vector<10xf32>
    %45 = vector.shape_cast %44 : vector<10xf32> to vector<10x1xf32>
    %46 = tpu.reciprocal %45 {approx = true} : vector<10x1xf32> -> vector<10x1xf32>
    %47 = vector.broadcast %46 : vector<10x1xf32> to vector<10x10xf32>
    %48 = arith.mulf %43, %47 : vector<10x10xf32>
    %49 = arith.truncf %48 : vector<10x10xf32> to vector<10x10xbf16>
    %50 = vector.extract_strided_slice %33 {offsets = [0, 0], sizes = [10, 8], strides = [1, 1]} : vector<10x64xbf16> to vector<10x8xbf16>
    %cst_31 = arith.constant dense<0.000000e+00> : vector<10x8xf32>
    %51 = tpu.matmul %49, %50, %cst_31 {dimension_numbers = #tpu.dot_dimension_numbers<[1], [0], [0], [1], [0, 0, 1, 1], [], []>} : vector<10x10xbf16>, vector<10x8xbf16>, vector<10x8xf32> -> vector<10x8xf32>
    %52 = arith.truncf %51 : vector<10x8xf32> to vector<10x8xbf16>
    %53 = vector.extract_strided_slice %17 {offsets = [0, 0], sizes = [8, 64], strides = [1, 1]} : vector<64x64xbf16> to vector<8x64xbf16>
    %cst_32 = arith.constant dense<0.000000e+00> : vector<10x64xf32>
    %54 = tpu.matmul %52, %53, %cst_32 {dimension_numbers = #tpu.dot_dimension_numbers<[1], [0], [0], [1], [0, 0, 1, 1], [], []>} : vector<10x8xbf16>, vector<8x64xbf16>, vector<10x64xf32> -> vector<10x64xf32>
    %55 = arith.addf %34, %54 : vector<10x64xf32>
    %56 = vector.extract_strided_slice %28 {offsets = [0, 8], sizes = [10, 8], strides = [1, 1]} : vector<10x64xbf16> to vector<10x8xbf16>
    %57 = vector.extract_strided_slice %31 {offsets = [8, 0], sizes = [8, 10], strides = [1, 1]} : vector<64x10xbf16> to vector<8x10xbf16>
    %cst_33 = arith.constant dense<0.000000e+00> : vector<10x10xf32>
    %58 = tpu.matmul %56, %57, %cst_33 {dimension_numbers = #tpu.dot_dimension_numbers<[1], [0], [0], [1], [0, 0, 1, 1], [], []>} : vector<10x8xbf16>, vector<8x10xbf16>, vector<10x10xf32> -> vector<10x10xf32>
    %59 = arith.addf %58, %7 : vector<10x10xf32>
    %cst_34 = arith.constant dense<0xFF800000> : vector<10xf32>
    %60 = vector.multi_reduction <maximumf>, %59, %cst_34 [1] : vector<10x10xf32> to vector<10xf32>
    %61 = vector.shape_cast %60 : vector<10xf32> to vector<10x1xf32>
    %62 = vector.broadcast %61 : vector<10x1xf32> to vector<10x10xf32>
    %63 = arith.subf %59, %62 : vector<10x10xf32>
    %64 = math.exp %63 : vector<10x10xf32>
    %cst_35 = arith.constant dense<0.000000e+00> : vector<10xf32>
    %65 = vector.multi_reduction <add>, %64, %cst_35 [1] : vector<10x10xf32> to vector<10xf32>
    %66 = vector.shape_cast %65 : vector<10xf32> to vector<10x1xf32>
    %67 = tpu.reciprocal %66 {approx = true} : vector<10x1xf32> -> vector<10x1xf32>
    %68 = vector.broadcast %67 : vector<10x1xf32> to vector<10x10xf32>
    %69 = arith.mulf %64, %68 : vector<10x10xf32>
    %70 = arith.truncf %69 : vector<10x10xf32> to vector<10x10xbf16>
    %71 = vector.extract_strided_slice %33 {offsets = [0, 8], sizes = [10, 8], strides = [1, 1]} : vector<10x64xbf16> to vector<10x8xbf16>
    %cst_36 = arith.constant dense<0.000000e+00> : vector<10x8xf32>
    %72 = tpu.matmul %70, %71, %cst_36 {dimension_numbers = #tpu.dot_dimension_numbers<[1], [0], [0], [1], [0, 0, 1, 1], [], []>} : vector<10x10xbf16>, vector<10x8xbf16>, vector<10x8xf32> -> vector<10x8xf32>
    %73 = arith.truncf %72 : vector<10x8xf32> to vector<10x8xbf16>
    %74 = vector.extract_strided_slice %17 {offsets = [8, 0], sizes = [8, 64], strides = [1, 1]} : vector<64x64xbf16> to vector<8x64xbf16>
    %cst_37 = arith.constant dense<0.000000e+00> : vector<10x64xf32>
    %75 = tpu.matmul %73, %74, %cst_37 {dimension_numbers = #tpu.dot_dimension_numbers<[1], [0], [0], [1], [0, 0, 1, 1], [], []>} : vector<10x8xbf16>, vector<8x64xbf16>, vector<10x64xf32> -> vector<10x64xf32>
    %76 = arith.addf %55, %75 : vector<10x64xf32>
    %77 = vector.extract_strided_slice %28 {offsets = [0, 16], sizes = [10, 8], strides = [1, 1]} : vector<10x64xbf16> to vector<10x8xbf16>
    %78 = vector.extract_strided_slice %31 {offsets = [16, 0], sizes = [8, 10], strides = [1, 1]} : vector<64x10xbf16> to vector<8x10xbf16>
    %cst_38 = arith.constant dense<0.000000e+00> : vector<10x10xf32>
    %79 = tpu.matmul %77, %78, %cst_38 {dimension_numbers = #tpu.dot_dimension_numbers<[1], [0], [0], [1], [0, 0, 1, 1], [], []>} : vector<10x8xbf16>, vector<8x10xbf16>, vector<10x10xf32> -> vector<10x10xf32>
    %80 = arith.addf %79, %7 : vector<10x10xf32>
    %cst_39 = arith.constant dense<0xFF800000> : vector<10xf32>
    %81 = vector.multi_reduction <maximumf>, %80, %cst_39 [1] : vector<10x10xf32> to vector<10xf32>
    %82 = vector.shape_cast %81 : vector<10xf32> to vector<10x1xf32>
    %83 = vector.broadcast %82 : vector<10x1xf32> to vector<10x10xf32>
    %84 = arith.subf %80, %83 : vector<10x10xf32>
    %85 = math.exp %84 : vector<10x10xf32>
    %cst_40 = arith.constant dense<0.000000e+00> : vector<10xf32>
    %86 = vector.multi_reduction <add>, %85, %cst_40 [1] : vector<10x10xf32> to vector<10xf32>
    %87 = vector.shape_cast %86 : vector<10xf32> to vector<10x1xf32>
    %88 = tpu.reciprocal %87 {approx = true} : vector<10x1xf32> -> vector<10x1xf32>
    %89 = vector.broadcast %88 : vector<10x1xf32> to vector<10x10xf32>
    %90 = arith.mulf %85, %89 : vector<10x10xf32>
    %91 = arith.truncf %90 : vector<10x10xf32> to vector<10x10xbf16>
    %92 = vector.extract_strided_slice %33 {offsets = [0, 16], sizes = [10, 8], strides = [1, 1]} : vector<10x64xbf16> to vector<10x8xbf16>
    %cst_41 = arith.constant dense<0.000000e+00> : vector<10x8xf32>
    %93 = tpu.matmul %91, %92, %cst_41 {dimension_numbers = #tpu.dot_dimension_numbers<[1], [0], [0], [1], [0, 0, 1, 1], [], []>} : vector<10x10xbf16>, vector<10x8xbf16>, vector<10x8xf32> -> vector<10x8xf32>
    %94 = arith.truncf %93 : vector<10x8xf32> to vector<10x8xbf16>
    %95 = vector.extract_strided_slice %17 {offsets = [16, 0], sizes = [8, 64], strides = [1, 1]} : vector<64x64xbf16> to vector<8x64xbf16>
    %cst_42 = arith.constant dense<0.000000e+00> : vector<10x64xf32>
    %96 = tpu.matmul %94, %95, %cst_42 {dimension_numbers = #tpu.dot_dimension_numbers<[1], [0], [0], [1], [0, 0, 1, 1], [], []>} : vector<10x8xbf16>, vector<8x64xbf16>, vector<10x64xf32> -> vector<10x64xf32>
    %97 = arith.addf %76, %96 : vector<10x64xf32>
    %98 = vector.extract_strided_slice %28 {offsets = [0, 24], sizes = [10, 8], strides = [1, 1]} : vector<10x64xbf16> to vector<10x8xbf16>
    %99 = vector.extract_strided_slice %31 {offsets = [24, 0], sizes = [8, 10], strides = [1, 1]} : vector<64x10xbf16> to vector<8x10xbf16>
    %cst_43 = arith.constant dense<0.000000e+00> : vector<10x10xf32>
    %100 = tpu.matmul %98, %99, %cst_43 {dimension_numbers = #tpu.dot_dimension_numbers<[1], [0], [0], [1], [0, 0, 1, 1], [], []>} : vector<10x8xbf16>, vector<8x10xbf16>, vector<10x10xf32> -> vector<10x10xf32>
    %101 = arith.addf %100, %7 : vector<10x10xf32>
    %cst_44 = arith.constant dense<0xFF800000> : vector<10xf32>
    %102 = vector.multi_reduction <maximumf>, %101, %cst_44 [1] : vector<10x10xf32> to vector<10xf32>
    %103 = vector.shape_cast %102 : vector<10xf32> to vector<10x1xf32>
    %104 = vector.broadcast %103 : vector<10x1xf32> to vector<10x10xf32>
    %105 = arith.subf %101, %104 : vector<10x10xf32>
    %106 = math.exp %105 : vector<10x10xf32>
    %cst_45 = arith.constant dense<0.000000e+00> : vector<10xf32>
    %107 = vector.multi_reduction <add>, %106, %cst_45 [1] : vector<10x10xf32> to vector<10xf32>
    %108 = vector.shape_cast %107 : vector<10xf32> to vector<10x1xf32>
    %109 = tpu.reciprocal %108 {approx = true} : vector<10x1xf32> -> vector<10x1xf32>
    %110 = vector.broadcast %109 : vector<10x1xf32> to vector<10x10xf32>
    %111 = arith.mulf %106, %110 : vector<10x10xf32>
    %112 = arith.truncf %111 : vector<10x10xf32> to vector<10x10xbf16>
    %113 = vector.extract_strided_slice %33 {offsets = [0, 24], sizes = [10, 8], strides = [1, 1]} : vector<10x64xbf16> to vector<10x8xbf16>
    %cst_46 = arith.constant dense<0.000000e+00> : vector<10x8xf32>
    %114 = tpu.matmul %112, %113, %cst_46 {dimension_numbers = #tpu.dot_dimension_numbers<[1], [0], [0], [1], [0, 0, 1, 1], [], []>} : vector<10x10xbf16>, vector<10x8xbf16>, vector<10x8xf32> -> vector<10x8xf32>
    %115 = arith.truncf %114 : vector<10x8xf32> to vector<10x8xbf16>
    %116 = vector.extract_strided_slice %17 {offsets = [24, 0], sizes = [8, 64], strides = [1, 1]} : vector<64x64xbf16> to vector<8x64xbf16>
    %cst_47 = arith.constant dense<0.000000e+00> : vector<10x64xf32>
    %117 = tpu.matmul %115, %116, %cst_47 {dimension_numbers = #tpu.dot_dimension_numbers<[1], [0], [0], [1], [0, 0, 1, 1], [], []>} : vector<10x8xbf16>, vector<8x64xbf16>, vector<10x64xf32> -> vector<10x64xf32>
    %118 = arith.addf %97, %117 : vector<10x64xf32>
    %119 = vector.extract_strided_slice %28 {offsets = [0, 32], sizes = [10, 8], strides = [1, 1]} : vector<10x64xbf16> to vector<10x8xbf16>
    %120 = vector.extract_strided_slice %31 {offsets = [32, 0], sizes = [8, 10], strides = [1, 1]} : vector<64x10xbf16> to vector<8x10xbf16>
    %cst_48 = arith.constant dense<0.000000e+00> : vector<10x10xf32>
    %121 = tpu.matmul %119, %120, %cst_48 {dimension_numbers = #tpu.dot_dimension_numbers<[1], [0], [0], [1], [0, 0, 1, 1], [], []>} : vector<10x8xbf16>, vector<8x10xbf16>, vector<10x10xf32> -> vector<10x10xf32>
    %122 = arith.addf %121, %7 : vector<10x10xf32>
    %cst_49 = arith.constant dense<0xFF800000> : vector<10xf32>
    %123 = vector.multi_reduction <maximumf>, %122, %cst_49 [1] : vector<10x10xf32> to vector<10xf32>
    %124 = vector.shape_cast %123 : vector<10xf32> to vector<10x1xf32>
    %125 = vector.broadcast %124 : vector<10x1xf32> to vector<10x10xf32>
    %126 = arith.subf %122, %125 : vector<10x10xf32>
    %127 = math.exp %126 : vector<10x10xf32>
    %cst_50 = arith.constant dense<0.000000e+00> : vector<10xf32>
    %128 = vector.multi_reduction <add>, %127, %cst_50 [1] : vector<10x10xf32> to vector<10xf32>
    %129 = vector.shape_cast %128 : vector<10xf32> to vector<10x1xf32>
    %130 = tpu.reciprocal %129 {approx = true} : vector<10x1xf32> -> vector<10x1xf32>
    %131 = vector.broadcast %130 : vector<10x1xf32> to vector<10x10xf32>
    %132 = arith.mulf %127, %131 : vector<10x10xf32>
    %133 = arith.truncf %132 : vector<10x10xf32> to vector<10x10xbf16>
    %134 = vector.extract_strided_slice %33 {offsets = [0, 32], sizes = [10, 8], strides = [1, 1]} : vector<10x64xbf16> to vector<10x8xbf16>
    %cst_51 = arith.constant dense<0.000000e+00> : vector<10x8xf32>
    %135 = tpu.matmul %133, %134, %cst_51 {dimension_numbers = #tpu.dot_dimension_numbers<[1], [0], [0], [1], [0, 0, 1, 1], [], []>} : vector<10x10xbf16>, vector<10x8xbf16>, vector<10x8xf32> -> vector<10x8xf32>
    %136 = arith.truncf %135 : vector<10x8xf32> to vector<10x8xbf16>
    %137 = vector.extract_strided_slice %17 {offsets = [32, 0], sizes = [8, 64], strides = [1, 1]} : vector<64x64xbf16> to vector<8x64xbf16>
    %cst_52 = arith.constant dense<0.000000e+00> : vector<10x64xf32>
    %138 = tpu.matmul %136, %137, %cst_52 {dimension_numbers = #tpu.dot_dimension_numbers<[1], [0], [0], [1], [0, 0, 1, 1], [], []>} : vector<10x8xbf16>, vector<8x64xbf16>, vector<10x64xf32> -> vector<10x64xf32>
    %139 = arith.addf %118, %138 : vector<10x64xf32>
    %140 = vector.extract_strided_slice %28 {offsets = [0, 40], sizes = [10, 8], strides = [1, 1]} : vector<10x64xbf16> to vector<10x8xbf16>
    %141 = vector.extract_strided_slice %31 {offsets = [40, 0], sizes = [8, 10], strides = [1, 1]} : vector<64x10xbf16> to vector<8x10xbf16>
    %cst_53 = arith.constant dense<0.000000e+00> : vector<10x10xf32>
    %142 = tpu.matmul %140, %141, %cst_53 {dimension_numbers = #tpu.dot_dimension_numbers<[1], [0], [0], [1], [0, 0, 1, 1], [], []>} : vector<10x8xbf16>, vector<8x10xbf16>, vector<10x10xf32> -> vector<10x10xf32>
    %143 = arith.addf %142, %7 : vector<10x10xf32>
    %cst_54 = arith.constant dense<0xFF800000> : vector<10xf32>
    %144 = vector.multi_reduction <maximumf>, %143, %cst_54 [1] : vector<10x10xf32> to vector<10xf32>
    %145 = vector.shape_cast %144 : vector<10xf32> to vector<10x1xf32>
    %146 = vector.broadcast %145 : vector<10x1xf32> to vector<10x10xf32>
    %147 = arith.subf %143, %146 : vector<10x10xf32>
    %148 = math.exp %147 : vector<10x10xf32>
    %cst_55 = arith.constant dense<0.000000e+00> : vector<10xf32>
    %149 = vector.multi_reduction <add>, %148, %cst_55 [1] : vector<10x10xf32> to vector<10xf32>
    %150 = vector.shape_cast %149 : vector<10xf32> to vector<10x1xf32>
    %151 = tpu.reciprocal %150 {approx = true} : vector<10x1xf32> -> vector<10x1xf32>
    %152 = vector.broadcast %151 : vector<10x1xf32> to vector<10x10xf32>
    %153 = arith.mulf %148, %152 : vector<10x10xf32>
    %154 = arith.truncf %153 : vector<10x10xf32> to vector<10x10xbf16>
    %155 = vector.extract_strided_slice %33 {offsets = [0, 40], sizes = [10, 8], strides = [1, 1]} : vector<10x64xbf16> to vector<10x8xbf16>
    %cst_56 = arith.constant dense<0.000000e+00> : vector<10x8xf32>
    %156 = tpu.matmul %154, %155, %cst_56 {dimension_numbers = #tpu.dot_dimension_numbers<[1], [0], [0], [1], [0, 0, 1, 1], [], []>} : vector<10x10xbf16>, vector<10x8xbf16>, vector<10x8xf32> -> vector<10x8xf32>
    %157 = arith.truncf %156 : vector<10x8xf32> to vector<10x8xbf16>
    %158 = vector.extract_strided_slice %17 {offsets = [40, 0], sizes = [8, 64], strides = [1, 1]} : vector<64x64xbf16> to vector<8x64xbf16>
    %cst_57 = arith.constant dense<0.000000e+00> : vector<10x64xf32>
    %159 = tpu.matmul %157, %158, %cst_57 {dimension_numbers = #tpu.dot_dimension_numbers<[1], [0], [0], [1], [0, 0, 1, 1], [], []>} : vector<10x8xbf16>, vector<8x64xbf16>, vector<10x64xf32> -> vector<10x64xf32>
    %160 = arith.addf %139, %159 : vector<10x64xf32>
    %161 = vector.extract_strided_slice %28 {offsets = [0, 48], sizes = [10, 8], strides = [1, 1]} : vector<10x64xbf16> to vector<10x8xbf16>
    %162 = vector.extract_strided_slice %31 {offsets = [48, 0], sizes = [8, 10], strides = [1, 1]} : vector<64x10xbf16> to vector<8x10xbf16>
    %cst_58 = arith.constant dense<0.000000e+00> : vector<10x10xf32>
    %163 = tpu.matmul %161, %162, %cst_58 {dimension_numbers = #tpu.dot_dimension_numbers<[1], [0], [0], [1], [0, 0, 1, 1], [], []>} : vector<10x8xbf16>, vector<8x10xbf16>, vector<10x10xf32> -> vector<10x10xf32>
    %164 = arith.addf %163, %7 : vector<10x10xf32>
    %cst_59 = arith.constant dense<0xFF800000> : vector<10xf32>
    %165 = vector.multi_reduction <maximumf>, %164, %cst_59 [1] : vector<10x10xf32> to vector<10xf32>
    %166 = vector.shape_cast %165 : vector<10xf32> to vector<10x1xf32>
    %167 = vector.broadcast %166 : vector<10x1xf32> to vector<10x10xf32>
    %168 = arith.subf %164, %167 : vector<10x10xf32>
    %169 = math.exp %168 : vector<10x10xf32>
    %cst_60 = arith.constant dense<0.000000e+00> : vector<10xf32>
    %170 = vector.multi_reduction <add>, %169, %cst_60 [1] : vector<10x10xf32> to vector<10xf32>
    %171 = vector.shape_cast %170 : vector<10xf32> to vector<10x1xf32>
    %172 = tpu.reciprocal %171 {approx = true} : vector<10x1xf32> -> vector<10x1xf32>
    %173 = vector.broadcast %172 : vector<10x1xf32> to vector<10x10xf32>
    %174 = arith.mulf %169, %173 : vector<10x10xf32>
    %175 = arith.truncf %174 : vector<10x10xf32> to vector<10x10xbf16>
    %176 = vector.extract_strided_slice %33 {offsets = [0, 48], sizes = [10, 8], strides = [1, 1]} : vector<10x64xbf16> to vector<10x8xbf16>
    %cst_61 = arith.constant dense<0.000000e+00> : vector<10x8xf32>
    %177 = tpu.matmul %175, %176, %cst_61 {dimension_numbers = #tpu.dot_dimension_numbers<[1], [0], [0], [1], [0, 0, 1, 1], [], []>} : vector<10x10xbf16>, vector<10x8xbf16>, vector<10x8xf32> -> vector<10x8xf32>
    %178 = arith.truncf %177 : vector<10x8xf32> to vector<10x8xbf16>
    %179 = vector.extract_strided_slice %17 {offsets = [48, 0], sizes = [8, 64], strides = [1, 1]} : vector<64x64xbf16> to vector<8x64xbf16>
    %cst_62 = arith.constant dense<0.000000e+00> : vector<10x64xf32>
    %180 = tpu.matmul %178, %179, %cst_62 {dimension_numbers = #tpu.dot_dimension_numbers<[1], [0], [0], [1], [0, 0, 1, 1], [], []>} : vector<10x8xbf16>, vector<8x64xbf16>, vector<10x64xf32> -> vector<10x64xf32>
    %181 = arith.addf %160, %180 : vector<10x64xf32>
    %182 = vector.extract_strided_slice %28 {offsets = [0, 56], sizes = [10, 8], strides = [1, 1]} : vector<10x64xbf16> to vector<10x8xbf16>
    %183 = vector.extract_strided_slice %31 {offsets = [56, 0], sizes = [8, 10], strides = [1, 1]} : vector<64x10xbf16> to vector<8x10xbf16>
    %cst_63 = arith.constant dense<0.000000e+00> : vector<10x10xf32>
    %184 = tpu.matmul %182, %183, %cst_63 {dimension_numbers = #tpu.dot_dimension_numbers<[1], [0], [0], [1], [0, 0, 1, 1], [], []>} : vector<10x8xbf16>, vector<8x10xbf16>, vector<10x10xf32> -> vector<10x10xf32>
    %185 = arith.addf %184, %7 : vector<10x10xf32>
    %cst_64 = arith.constant dense<0xFF800000> : vector<10xf32>
    %186 = vector.multi_reduction <maximumf>, %185, %cst_64 [1] : vector<10x10xf32> to vector<10xf32>
    %187 = vector.shape_cast %186 : vector<10xf32> to vector<10x1xf32>
    %188 = vector.broadcast %187 : vector<10x1xf32> to vector<10x10xf32>
    %189 = arith.subf %185, %188 : vector<10x10xf32>
    %190 = math.exp %189 : vector<10x10xf32>
    %cst_65 = arith.constant dense<0.000000e+00> : vector<10xf32>
    %191 = vector.multi_reduction <add>, %190, %cst_65 [1] : vector<10x10xf32> to vector<10xf32>
    %192 = vector.shape_cast %191 : vector<10xf32> to vector<10x1xf32>
    %193 = tpu.reciprocal %192 {approx = true} : vector<10x1xf32> -> vector<10x1xf32>
    %194 = vector.broadcast %193 : vector<10x1xf32> to vector<10x10xf32>
    %195 = arith.mulf %190, %194 : vector<10x10xf32>
    %196 = arith.truncf %195 : vector<10x10xf32> to vector<10x10xbf16>
    %197 = vector.extract_strided_slice %33 {offsets = [0, 56], sizes = [10, 8], strides = [1, 1]} : vector<10x64xbf16> to vector<10x8xbf16>
    %cst_66 = arith.constant dense<0.000000e+00> : vector<10x8xf32>
    %198 = tpu.matmul %196, %197, %cst_66 {dimension_numbers = #tpu.dot_dimension_numbers<[1], [0], [0], [1], [0, 0, 1, 1], [], []>} : vector<10x10xbf16>, vector<10x8xbf16>, vector<10x8xf32> -> vector<10x8xf32>
    %199 = arith.truncf %198 : vector<10x8xf32> to vector<10x8xbf16>
    %200 = vector.extract_strided_slice %17 {offsets = [56, 0], sizes = [8, 64], strides = [1, 1]} : vector<64x64xbf16> to vector<8x64xbf16>
    %cst_67 = arith.constant dense<0.000000e+00> : vector<10x64xf32>
    %201 = tpu.matmul %199, %200, %cst_67 {dimension_numbers = #tpu.dot_dimension_numbers<[1], [0], [0], [1], [0, 0, 1, 1], [], []>} : vector<10x8xbf16>, vector<8x64xbf16>, vector<10x64xf32> -> vector<10x64xf32>
    %202 = arith.addf %181, %201 : vector<10x64xf32>
    %203 = vector.broadcast %19 : vector<1x64xf32> to vector<10x64xf32>
    %204 = arith.addf %202, %203 : vector<10x64xf32>
    %205 = arith.addf %3, %204 : vector<10x64xf32>
    %c0_68 = arith.constant 0 : index
    %c0_69 = arith.constant 0 : index
    %c0_70 = arith.constant 0 : index
    %206 = vector.load %arg12[%c0_68, %c0_69, %c0_70] : memref<1x1x64xf32, #tpu.memory_space<vmem>>, vector<1x1x64xf32>
    %207 = vector.shape_cast %206 : vector<1x1x64xf32> to vector<1x64xf32>
    %c0_71 = arith.constant 0 : index
    %c0_72 = arith.constant 0 : index
    %c0_73 = arith.constant 0 : index
    %208 = vector.load %arg13[%c0_71, %c0_72, %c0_73] : memref<1x1x64xf32, #tpu.memory_space<vmem>>, vector<1x1x64xf32>
    %209 = vector.shape_cast %208 : vector<1x1x64xf32> to vector<1x64xf32>
    %cst_74 = arith.constant dense<0.000000e+00> : vector<10xf32>
    %210 = vector.multi_reduction <add>, %205, %cst_74 [1] : vector<10x64xf32> to vector<10xf32>
    %211 = vector.shape_cast %210 : vector<10xf32> to vector<10x1xf32>
    %cst_75 = arith.constant 6.400000e+01 : f32
    %212 = vector.broadcast %cst_75 : f32 to vector<10x1xf32>
    %213 = arith.divf %211, %212 : vector<10x1xf32>
    %214 = vector.broadcast %213 : vector<10x1xf32> to vector<10x64xf32>
    %215 = arith.subf %205, %214 : vector<10x64xf32>
    %216 = arith.mulf %215, %215 : vector<10x64xf32>
    %cst_76 = arith.constant dense<0.000000e+00> : vector<10xf32>
    %217 = vector.multi_reduction <add>, %216, %cst_76 [1] : vector<10x64xf32> to vector<10xf32>
    %218 = vector.shape_cast %217 : vector<10xf32> to vector<10x1xf32>
    %cst_77 = arith.constant 6.400000e+01 : f32
    %219 = vector.broadcast %cst_77 : f32 to vector<10x1xf32>
    %220 = arith.divf %218, %219 : vector<10x1xf32>
    %cst_78 = arith.constant 9.99999974E-6 : f32
    %221 = vector.broadcast %cst_78 : f32 to vector<10x1xf32>
    %222 = arith.addf %220, %221 : vector<10x1xf32>
    %223 = math.rsqrt %222 : vector<10x1xf32>
    %224 = vector.broadcast %223 : vector<10x1xf32> to vector<10x64xf32>
    %225 = arith.mulf %215, %224 : vector<10x64xf32>
    %226 = vector.broadcast %207 : vector<1x64xf32> to vector<10x64xf32>
    %227 = arith.mulf %225, %226 : vector<10x64xf32>
    %228 = vector.broadcast %209 : vector<1x64xf32> to vector<10x64xf32>
    %229 = arith.addf %227, %228 : vector<10x64xf32>
    %c0_79 = arith.constant 0 : index
    %c0_80 = arith.constant 0 : index
    %c0_81 = arith.constant 0 : index
    %230 = vector.load %arg5[%c0_79, %c0_80, %c0_81] : memref<1x1x12xf32, #tpu.memory_space<vmem>>, vector<1x1x12xf32>
    %231 = vector.shape_cast %230 : vector<1x1x12xf32> to vector<1x12xf32>
    %c0_82 = arith.constant 0 : index
    %c0_83 = arith.constant 0 : index
    %c0_84 = arith.constant 0 : index
    %232 = vector.load %arg14[%c0_82, %c0_83, %c0_84] : memref<1x64x64xbf16, #tpu.memory_space<vmem>>, vector<1x64x64xbf16>
    %233 = vector.shape_cast %232 : vector<1x64x64xbf16> to vector<64x64xbf16>
    %c0_85 = arith.constant 0 : index
    %c0_86 = arith.constant 0 : index
    %c0_87 = arith.constant 0 : index
    %234 = vector.load %arg15[%c0_85, %c0_86, %c0_87] : memref<1x1x64xf32, #tpu.memory_space<vmem>>, vector<1x1x64xf32>
    %235 = vector.shape_cast %234 : vector<1x1x64xf32> to vector<1x64xf32>
    %c0_88 = arith.constant 0 : index
    %c0_89 = arith.constant 0 : index
    %c0_90 = arith.constant 0 : index
    %236 = vector.load %arg16[%c0_88, %c0_89, %c0_90] : memref<1x64x128xbf16, #tpu.memory_space<vmem>>, vector<1x64x128xbf16>
    %237 = vector.shape_cast %236 : vector<1x64x128xbf16> to vector<64x128xbf16>
    %c0_91 = arith.constant 0 : index
    %c0_92 = arith.constant 0 : index
    %c0_93 = arith.constant 0 : index
    %238 = vector.load %arg17[%c0_91, %c0_92, %c0_93] : memref<1x1x128xf32, #tpu.memory_space<vmem>>, vector<1x1x128xf32>
    %239 = vector.shape_cast %238 : vector<1x1x128xf32> to vector<1x128xf32>
    %c0_94 = arith.constant 0 : index
    %c0_95 = arith.constant 0 : index
    %c0_96 = arith.constant 0 : index
    %240 = vector.load %arg18[%c0_94, %c0_95, %c0_96] : memref<1x64x64xbf16, #tpu.memory_space<vmem>>, vector<1x64x64xbf16>
    %241 = vector.shape_cast %240 : vector<1x64x64xbf16> to vector<64x64xbf16>
    %c0_97 = arith.constant 0 : index
    %c0_98 = arith.constant 0 : index
    %c0_99 = arith.constant 0 : index
    %242 = vector.load %arg19[%c0_97, %c0_98, %c0_99] : memref<1x1x64xf32, #tpu.memory_space<vmem>>, vector<1x1x64xf32>
    %243 = vector.shape_cast %242 : vector<1x1x64xf32> to vector<1x64xf32>
    %244 = arith.truncf %229 : vector<10x64xf32> to vector<10x64xbf16>
    %cst_100 = arith.constant dense<0.000000e+00> : vector<10x64xf32>
    %245 = tpu.matmul %244, %233, %cst_100 {dimension_numbers = #tpu.dot_dimension_numbers<[1], [0], [0], [1], [0, 0, 1, 1], [], []>} : vector<10x64xbf16>, vector<64x64xbf16>, vector<10x64xf32> -> vector<10x64xf32>
    %246 = vector.broadcast %235 : vector<1x64xf32> to vector<10x64xf32>
    %247 = arith.addf %245, %246 : vector<10x64xf32>
    %cst_101 = arith.constant dense<0.000000e+00> : vector<12x128xf32>
    %248 = tpu.matmul %5, %237, %cst_101 {dimension_numbers = #tpu.dot_dimension_numbers<[1], [0], [0], [1], [0, 0, 1, 1], [], []>} : vector<12x64xbf16>, vector<64x128xbf16>, vector<12x128xf32> -> vector<12x128xf32>
    %249 = vector.broadcast %239 : vector<1x128xf32> to vector<12x128xf32>
    %250 = arith.addf %248, %249 : vector<12x128xf32>
    %251 = arith.truncf %247 : vector<10x64xf32> to vector<10x64xbf16>
    %252 = vector.extract_strided_slice %250 {offsets = [0, 0], sizes = [12, 64], strides = [1, 1]} : vector<12x128xf32> to vector<12x64xf32>
    %253 = tpu.transpose %252, [1, 0] : vector<12x64xf32> -> vector<64x12xf32>
    %254 = arith.truncf %253 : vector<64x12xf32> to vector<64x12xbf16>
    %255 = vector.extract_strided_slice %250 {offsets = [0, 64], sizes = [12, 64], strides = [1, 1]} : vector<12x128xf32> to vector<12x64xf32>
    %256 = arith.truncf %255 : vector<12x64xf32> to vector<12x64xbf16>
    %cst_102 = arith.constant 0.000000e+00 : f32
    %257 = vector.broadcast %cst_102 : f32 to vector<10x64xf32>
    %258 = vector.extract_strided_slice %251 {offsets = [0, 0], sizes = [10, 8], strides = [1, 1]} : vector<10x64xbf16> to vector<10x8xbf16>
    %259 = vector.extract_strided_slice %254 {offsets = [0, 0], sizes = [8, 12], strides = [1, 1]} : vector<64x12xbf16> to vector<8x12xbf16>
    %cst_103 = arith.constant dense<0.000000e+00> : vector<10x12xf32>
    %260 = tpu.matmul %258, %259, %cst_103 {dimension_numbers = #tpu.dot_dimension_numbers<[1], [0], [0], [1], [0, 0, 1, 1], [], []>} : vector<10x8xbf16>, vector<8x12xbf16>, vector<10x12xf32> -> vector<10x12xf32>
    %261 = vector.broadcast %231 : vector<1x12xf32> to vector<10x12xf32>
    %262 = arith.addf %260, %261 : vector<10x12xf32>
    %cst_104 = arith.constant dense<0xFF800000> : vector<10xf32>
    %263 = vector.multi_reduction <maximumf>, %262, %cst_104 [1] : vector<10x12xf32> to vector<10xf32>
    %264 = vector.shape_cast %263 : vector<10xf32> to vector<10x1xf32>
    %265 = vector.broadcast %264 : vector<10x1xf32> to vector<10x12xf32>
    %266 = arith.subf %262, %265 : vector<10x12xf32>
    %267 = math.exp %266 : vector<10x12xf32>
    %cst_105 = arith.constant dense<0.000000e+00> : vector<10xf32>
    %268 = vector.multi_reduction <add>, %267, %cst_105 [1] : vector<10x12xf32> to vector<10xf32>
    %269 = vector.shape_cast %268 : vector<10xf32> to vector<10x1xf32>
    %270 = tpu.reciprocal %269 {approx = true} : vector<10x1xf32> -> vector<10x1xf32>
    %271 = vector.broadcast %270 : vector<10x1xf32> to vector<10x12xf32>
    %272 = arith.mulf %267, %271 : vector<10x12xf32>
    %273 = arith.truncf %272 : vector<10x12xf32> to vector<10x12xbf16>
    %274 = vector.extract_strided_slice %256 {offsets = [0, 0], sizes = [12, 8], strides = [1, 1]} : vector<12x64xbf16> to vector<12x8xbf16>
    %cst_106 = arith.constant dense<0.000000e+00> : vector<10x8xf32>
    %275 = tpu.matmul %273, %274, %cst_106 {dimension_numbers = #tpu.dot_dimension_numbers<[1], [0], [0], [1], [0, 0, 1, 1], [], []>} : vector<10x12xbf16>, vector<12x8xbf16>, vector<10x8xf32> -> vector<10x8xf32>
    %276 = arith.truncf %275 : vector<10x8xf32> to vector<10x8xbf16>
    %277 = vector.extract_strided_slice %241 {offsets = [0, 0], sizes = [8, 64], strides = [1, 1]} : vector<64x64xbf16> to vector<8x64xbf16>
    %cst_107 = arith.constant dense<0.000000e+00> : vector<10x64xf32>
    %278 = tpu.matmul %276, %277, %cst_107 {dimension_numbers = #tpu.dot_dimension_numbers<[1], [0], [0], [1], [0, 0, 1, 1], [], []>} : vector<10x8xbf16>, vector<8x64xbf16>, vector<10x64xf32> -> vector<10x64xf32>
    %279 = arith.addf %257, %278 : vector<10x64xf32>
    %280 = vector.extract_strided_slice %251 {offsets = [0, 8], sizes = [10, 8], strides = [1, 1]} : vector<10x64xbf16> to vector<10x8xbf16>
    %281 = vector.extract_strided_slice %254 {offsets = [8, 0], sizes = [8, 12], strides = [1, 1]} : vector<64x12xbf16> to vector<8x12xbf16>
    %cst_108 = arith.constant dense<0.000000e+00> : vector<10x12xf32>
    %282 = tpu.matmul %280, %281, %cst_108 {dimension_numbers = #tpu.dot_dimension_numbers<[1], [0], [0], [1], [0, 0, 1, 1], [], []>} : vector<10x8xbf16>, vector<8x12xbf16>, vector<10x12xf32> -> vector<10x12xf32>
    %283 = vector.broadcast %231 : vector<1x12xf32> to vector<10x12xf32>
    %284 = arith.addf %282, %283 : vector<10x12xf32>
    %cst_109 = arith.constant dense<0xFF800000> : vector<10xf32>
    %285 = vector.multi_reduction <maximumf>, %284, %cst_109 [1] : vector<10x12xf32> to vector<10xf32>
    %286 = vector.shape_cast %285 : vector<10xf32> to vector<10x1xf32>
    %287 = vector.broadcast %286 : vector<10x1xf32> to vector<10x12xf32>
    %288 = arith.subf %284, %287 : vector<10x12xf32>
    %289 = math.exp %288 : vector<10x12xf32>
    %cst_110 = arith.constant dense<0.000000e+00> : vector<10xf32>
    %290 = vector.multi_reduction <add>, %289, %cst_110 [1] : vector<10x12xf32> to vector<10xf32>
    %291 = vector.shape_cast %290 : vector<10xf32> to vector<10x1xf32>
    %292 = tpu.reciprocal %291 {approx = true} : vector<10x1xf32> -> vector<10x1xf32>
    %293 = vector.broadcast %292 : vector<10x1xf32> to vector<10x12xf32>
    %294 = arith.mulf %289, %293 : vector<10x12xf32>
    %295 = arith.truncf %294 : vector<10x12xf32> to vector<10x12xbf16>
    %296 = vector.extract_strided_slice %256 {offsets = [0, 8], sizes = [12, 8], strides = [1, 1]} : vector<12x64xbf16> to vector<12x8xbf16>
    %cst_111 = arith.constant dense<0.000000e+00> : vector<10x8xf32>
    %297 = tpu.matmul %295, %296, %cst_111 {dimension_numbers = #tpu.dot_dimension_numbers<[1], [0], [0], [1], [0, 0, 1, 1], [], []>} : vector<10x12xbf16>, vector<12x8xbf16>, vector<10x8xf32> -> vector<10x8xf32>
    %298 = arith.truncf %297 : vector<10x8xf32> to vector<10x8xbf16>
    %299 = vector.extract_strided_slice %241 {offsets = [8, 0], sizes = [8, 64], strides = [1, 1]} : vector<64x64xbf16> to vector<8x64xbf16>
    %cst_112 = arith.constant dense<0.000000e+00> : vector<10x64xf32>
    %300 = tpu.matmul %298, %299, %cst_112 {dimension_numbers = #tpu.dot_dimension_numbers<[1], [0], [0], [1], [0, 0, 1, 1], [], []>} : vector<10x8xbf16>, vector<8x64xbf16>, vector<10x64xf32> -> vector<10x64xf32>
    %301 = arith.addf %279, %300 : vector<10x64xf32>
    %302 = vector.extract_strided_slice %251 {offsets = [0, 16], sizes = [10, 8], strides = [1, 1]} : vector<10x64xbf16> to vector<10x8xbf16>
    %303 = vector.extract_strided_slice %254 {offsets = [16, 0], sizes = [8, 12], strides = [1, 1]} : vector<64x12xbf16> to vector<8x12xbf16>
    %cst_113 = arith.constant dense<0.000000e+00> : vector<10x12xf32>
    %304 = tpu.matmul %302, %303, %cst_113 {dimension_numbers = #tpu.dot_dimension_numbers<[1], [0], [0], [1], [0, 0, 1, 1], [], []>} : vector<10x8xbf16>, vector<8x12xbf16>, vector<10x12xf32> -> vector<10x12xf32>
    %305 = vector.broadcast %231 : vector<1x12xf32> to vector<10x12xf32>
    %306 = arith.addf %304, %305 : vector<10x12xf32>
    %cst_114 = arith.constant dense<0xFF800000> : vector<10xf32>
    %307 = vector.multi_reduction <maximumf>, %306, %cst_114 [1] : vector<10x12xf32> to vector<10xf32>
    %308 = vector.shape_cast %307 : vector<10xf32> to vector<10x1xf32>
    %309 = vector.broadcast %308 : vector<10x1xf32> to vector<10x12xf32>
    %310 = arith.subf %306, %309 : vector<10x12xf32>
    %311 = math.exp %310 : vector<10x12xf32>
    %cst_115 = arith.constant dense<0.000000e+00> : vector<10xf32>
    %312 = vector.multi_reduction <add>, %311, %cst_115 [1] : vector<10x12xf32> to vector<10xf32>
    %313 = vector.shape_cast %312 : vector<10xf32> to vector<10x1xf32>
    %314 = tpu.reciprocal %313 {approx = true} : vector<10x1xf32> -> vector<10x1xf32>
    %315 = vector.broadcast %314 : vector<10x1xf32> to vector<10x12xf32>
    %316 = arith.mulf %311, %315 : vector<10x12xf32>
    %317 = arith.truncf %316 : vector<10x12xf32> to vector<10x12xbf16>
    %318 = vector.extract_strided_slice %256 {offsets = [0, 16], sizes = [12, 8], strides = [1, 1]} : vector<12x64xbf16> to vector<12x8xbf16>
    %cst_116 = arith.constant dense<0.000000e+00> : vector<10x8xf32>
    %319 = tpu.matmul %317, %318, %cst_116 {dimension_numbers = #tpu.dot_dimension_numbers<[1], [0], [0], [1], [0, 0, 1, 1], [], []>} : vector<10x12xbf16>, vector<12x8xbf16>, vector<10x8xf32> -> vector<10x8xf32>
    %320 = arith.truncf %319 : vector<10x8xf32> to vector<10x8xbf16>
    %321 = vector.extract_strided_slice %241 {offsets = [16, 0], sizes = [8, 64], strides = [1, 1]} : vector<64x64xbf16> to vector<8x64xbf16>
    %cst_117 = arith.constant dense<0.000000e+00> : vector<10x64xf32>
    %322 = tpu.matmul %320, %321, %cst_117 {dimension_numbers = #tpu.dot_dimension_numbers<[1], [0], [0], [1], [0, 0, 1, 1], [], []>} : vector<10x8xbf16>, vector<8x64xbf16>, vector<10x64xf32> -> vector<10x64xf32>
    %323 = arith.addf %301, %322 : vector<10x64xf32>
    %324 = vector.extract_strided_slice %251 {offsets = [0, 24], sizes = [10, 8], strides = [1, 1]} : vector<10x64xbf16> to vector<10x8xbf16>
    %325 = vector.extract_strided_slice %254 {offsets = [24, 0], sizes = [8, 12], strides = [1, 1]} : vector<64x12xbf16> to vector<8x12xbf16>
    %cst_118 = arith.constant dense<0.000000e+00> : vector<10x12xf32>
    %326 = tpu.matmul %324, %325, %cst_118 {dimension_numbers = #tpu.dot_dimension_numbers<[1], [0], [0], [1], [0, 0, 1, 1], [], []>} : vector<10x8xbf16>, vector<8x12xbf16>, vector<10x12xf32> -> vector<10x12xf32>
    %327 = vector.broadcast %231 : vector<1x12xf32> to vector<10x12xf32>
    %328 = arith.addf %326, %327 : vector<10x12xf32>
    %cst_119 = arith.constant dense<0xFF800000> : vector<10xf32>
    %329 = vector.multi_reduction <maximumf>, %328, %cst_119 [1] : vector<10x12xf32> to vector<10xf32>
    %330 = vector.shape_cast %329 : vector<10xf32> to vector<10x1xf32>
    %331 = vector.broadcast %330 : vector<10x1xf32> to vector<10x12xf32>
    %332 = arith.subf %328, %331 : vector<10x12xf32>
    %333 = math.exp %332 : vector<10x12xf32>
    %cst_120 = arith.constant dense<0.000000e+00> : vector<10xf32>
    %334 = vector.multi_reduction <add>, %333, %cst_120 [1] : vector<10x12xf32> to vector<10xf32>
    %335 = vector.shape_cast %334 : vector<10xf32> to vector<10x1xf32>
    %336 = tpu.reciprocal %335 {approx = true} : vector<10x1xf32> -> vector<10x1xf32>
    %337 = vector.broadcast %336 : vector<10x1xf32> to vector<10x12xf32>
    %338 = arith.mulf %333, %337 : vector<10x12xf32>
    %339 = arith.truncf %338 : vector<10x12xf32> to vector<10x12xbf16>
    %340 = vector.extract_strided_slice %256 {offsets = [0, 24], sizes = [12, 8], strides = [1, 1]} : vector<12x64xbf16> to vector<12x8xbf16>
    %cst_121 = arith.constant dense<0.000000e+00> : vector<10x8xf32>
    %341 = tpu.matmul %339, %340, %cst_121 {dimension_numbers = #tpu.dot_dimension_numbers<[1], [0], [0], [1], [0, 0, 1, 1], [], []>} : vector<10x12xbf16>, vector<12x8xbf16>, vector<10x8xf32> -> vector<10x8xf32>
    %342 = arith.truncf %341 : vector<10x8xf32> to vector<10x8xbf16>
    %343 = vector.extract_strided_slice %241 {offsets = [24, 0], sizes = [8, 64], strides = [1, 1]} : vector<64x64xbf16> to vector<8x64xbf16>
    %cst_122 = arith.constant dense<0.000000e+00> : vector<10x64xf32>
    %344 = tpu.matmul %342, %343, %cst_122 {dimension_numbers = #tpu.dot_dimension_numbers<[1], [0], [0], [1], [0, 0, 1, 1], [], []>} : vector<10x8xbf16>, vector<8x64xbf16>, vector<10x64xf32> -> vector<10x64xf32>
    %345 = arith.addf %323, %344 : vector<10x64xf32>
    %346 = vector.extract_strided_slice %251 {offsets = [0, 32], sizes = [10, 8], strides = [1, 1]} : vector<10x64xbf16> to vector<10x8xbf16>
    %347 = vector.extract_strided_slice %254 {offsets = [32, 0], sizes = [8, 12], strides = [1, 1]} : vector<64x12xbf16> to vector<8x12xbf16>
    %cst_123 = arith.constant dense<0.000000e+00> : vector<10x12xf32>
    %348 = tpu.matmul %346, %347, %cst_123 {dimension_numbers = #tpu.dot_dimension_numbers<[1], [0], [0], [1], [0, 0, 1, 1], [], []>} : vector<10x8xbf16>, vector<8x12xbf16>, vector<10x12xf32> -> vector<10x12xf32>
    %349 = vector.broadcast %231 : vector<1x12xf32> to vector<10x12xf32>
    %350 = arith.addf %348, %349 : vector<10x12xf32>
    %cst_124 = arith.constant dense<0xFF800000> : vector<10xf32>
    %351 = vector.multi_reduction <maximumf>, %350, %cst_124 [1] : vector<10x12xf32> to vector<10xf32>
    %352 = vector.shape_cast %351 : vector<10xf32> to vector<10x1xf32>
    %353 = vector.broadcast %352 : vector<10x1xf32> to vector<10x12xf32>
    %354 = arith.subf %350, %353 : vector<10x12xf32>
    %355 = math.exp %354 : vector<10x12xf32>
    %cst_125 = arith.constant dense<0.000000e+00> : vector<10xf32>
    %356 = vector.multi_reduction <add>, %355, %cst_125 [1] : vector<10x12xf32> to vector<10xf32>
    %357 = vector.shape_cast %356 : vector<10xf32> to vector<10x1xf32>
    %358 = tpu.reciprocal %357 {approx = true} : vector<10x1xf32> -> vector<10x1xf32>
    %359 = vector.broadcast %358 : vector<10x1xf32> to vector<10x12xf32>
    %360 = arith.mulf %355, %359 : vector<10x12xf32>
    %361 = arith.truncf %360 : vector<10x12xf32> to vector<10x12xbf16>
    %362 = vector.extract_strided_slice %256 {offsets = [0, 32], sizes = [12, 8], strides = [1, 1]} : vector<12x64xbf16> to vector<12x8xbf16>
    %cst_126 = arith.constant dense<0.000000e+00> : vector<10x8xf32>
    %363 = tpu.matmul %361, %362, %cst_126 {dimension_numbers = #tpu.dot_dimension_numbers<[1], [0], [0], [1], [0, 0, 1, 1], [], []>} : vector<10x12xbf16>, vector<12x8xbf16>, vector<10x8xf32> -> vector<10x8xf32>
    %364 = arith.truncf %363 : vector<10x8xf32> to vector<10x8xbf16>
    %365 = vector.extract_strided_slice %241 {offsets = [32, 0], sizes = [8, 64], strides = [1, 1]} : vector<64x64xbf16> to vector<8x64xbf16>
    %cst_127 = arith.constant dense<0.000000e+00> : vector<10x64xf32>
    %366 = tpu.matmul %364, %365, %cst_127 {dimension_numbers = #tpu.dot_dimension_numbers<[1], [0], [0], [1], [0, 0, 1, 1], [], []>} : vector<10x8xbf16>, vector<8x64xbf16>, vector<10x64xf32> -> vector<10x64xf32>
    %367 = arith.addf %345, %366 : vector<10x64xf32>
    %368 = vector.extract_strided_slice %251 {offsets = [0, 40], sizes = [10, 8], strides = [1, 1]} : vector<10x64xbf16> to vector<10x8xbf16>
    %369 = vector.extract_strided_slice %254 {offsets = [40, 0], sizes = [8, 12], strides = [1, 1]} : vector<64x12xbf16> to vector<8x12xbf16>
    %cst_128 = arith.constant dense<0.000000e+00> : vector<10x12xf32>
    %370 = tpu.matmul %368, %369, %cst_128 {dimension_numbers = #tpu.dot_dimension_numbers<[1], [0], [0], [1], [0, 0, 1, 1], [], []>} : vector<10x8xbf16>, vector<8x12xbf16>, vector<10x12xf32> -> vector<10x12xf32>
    %371 = vector.broadcast %231 : vector<1x12xf32> to vector<10x12xf32>
    %372 = arith.addf %370, %371 : vector<10x12xf32>
    %cst_129 = arith.constant dense<0xFF800000> : vector<10xf32>
    %373 = vector.multi_reduction <maximumf>, %372, %cst_129 [1] : vector<10x12xf32> to vector<10xf32>
    %374 = vector.shape_cast %373 : vector<10xf32> to vector<10x1xf32>
    %375 = vector.broadcast %374 : vector<10x1xf32> to vector<10x12xf32>
    %376 = arith.subf %372, %375 : vector<10x12xf32>
    %377 = math.exp %376 : vector<10x12xf32>
    %cst_130 = arith.constant dense<0.000000e+00> : vector<10xf32>
    %378 = vector.multi_reduction <add>, %377, %cst_130 [1] : vector<10x12xf32> to vector<10xf32>
    %379 = vector.shape_cast %378 : vector<10xf32> to vector<10x1xf32>
    %380 = tpu.reciprocal %379 {approx = true} : vector<10x1xf32> -> vector<10x1xf32>
    %381 = vector.broadcast %380 : vector<10x1xf32> to vector<10x12xf32>
    %382 = arith.mulf %377, %381 : vector<10x12xf32>
    %383 = arith.truncf %382 : vector<10x12xf32> to vector<10x12xbf16>
    %384 = vector.extract_strided_slice %256 {offsets = [0, 40], sizes = [12, 8], strides = [1, 1]} : vector<12x64xbf16> to vector<12x8xbf16>
    %cst_131 = arith.constant dense<0.000000e+00> : vector<10x8xf32>
    %385 = tpu.matmul %383, %384, %cst_131 {dimension_numbers = #tpu.dot_dimension_numbers<[1], [0], [0], [1], [0, 0, 1, 1], [], []>} : vector<10x12xbf16>, vector<12x8xbf16>, vector<10x8xf32> -> vector<10x8xf32>
    %386 = arith.truncf %385 : vector<10x8xf32> to vector<10x8xbf16>
    %387 = vector.extract_strided_slice %241 {offsets = [40, 0], sizes = [8, 64], strides = [1, 1]} : vector<64x64xbf16> to vector<8x64xbf16>
    %cst_132 = arith.constant dense<0.000000e+00> : vector<10x64xf32>
    %388 = tpu.matmul %386, %387, %cst_132 {dimension_numbers = #tpu.dot_dimension_numbers<[1], [0], [0], [1], [0, 0, 1, 1], [], []>} : vector<10x8xbf16>, vector<8x64xbf16>, vector<10x64xf32> -> vector<10x64xf32>
    %389 = arith.addf %367, %388 : vector<10x64xf32>
    %390 = vector.extract_strided_slice %251 {offsets = [0, 48], sizes = [10, 8], strides = [1, 1]} : vector<10x64xbf16> to vector<10x8xbf16>
    %391 = vector.extract_strided_slice %254 {offsets = [48, 0], sizes = [8, 12], strides = [1, 1]} : vector<64x12xbf16> to vector<8x12xbf16>
    %cst_133 = arith.constant dense<0.000000e+00> : vector<10x12xf32>
    %392 = tpu.matmul %390, %391, %cst_133 {dimension_numbers = #tpu.dot_dimension_numbers<[1], [0], [0], [1], [0, 0, 1, 1], [], []>} : vector<10x8xbf16>, vector<8x12xbf16>, vector<10x12xf32> -> vector<10x12xf32>
    %393 = vector.broadcast %231 : vector<1x12xf32> to vector<10x12xf32>
    %394 = arith.addf %392, %393 : vector<10x12xf32>
    %cst_134 = arith.constant dense<0xFF800000> : vector<10xf32>
    %395 = vector.multi_reduction <maximumf>, %394, %cst_134 [1] : vector<10x12xf32> to vector<10xf32>
    %396 = vector.shape_cast %395 : vector<10xf32> to vector<10x1xf32>
    %397 = vector.broadcast %396 : vector<10x1xf32> to vector<10x12xf32>
    %398 = arith.subf %394, %397 : vector<10x12xf32>
    %399 = math.exp %398 : vector<10x12xf32>
    %cst_135 = arith.constant dense<0.000000e+00> : vector<10xf32>
    %400 = vector.multi_reduction <add>, %399, %cst_135 [1] : vector<10x12xf32> to vector<10xf32>
    %401 = vector.shape_cast %400 : vector<10xf32> to vector<10x1xf32>
    %402 = tpu.reciprocal %401 {approx = true} : vector<10x1xf32> -> vector<10x1xf32>
    %403 = vector.broadcast %402 : vector<10x1xf32> to vector<10x12xf32>
    %404 = arith.mulf %399, %403 : vector<10x12xf32>
    %405 = arith.truncf %404 : vector<10x12xf32> to vector<10x12xbf16>
    %406 = vector.extract_strided_slice %256 {offsets = [0, 48], sizes = [12, 8], strides = [1, 1]} : vector<12x64xbf16> to vector<12x8xbf16>
    %cst_136 = arith.constant dense<0.000000e+00> : vector<10x8xf32>
    %407 = tpu.matmul %405, %406, %cst_136 {dimension_numbers = #tpu.dot_dimension_numbers<[1], [0], [0], [1], [0, 0, 1, 1], [], []>} : vector<10x12xbf16>, vector<12x8xbf16>, vector<10x8xf32> -> vector<10x8xf32>
    %408 = arith.truncf %407 : vector<10x8xf32> to vector<10x8xbf16>
    %409 = vector.extract_strided_slice %241 {offsets = [48, 0], sizes = [8, 64], strides = [1, 1]} : vector<64x64xbf16> to vector<8x64xbf16>
    %cst_137 = arith.constant dense<0.000000e+00> : vector<10x64xf32>
    %410 = tpu.matmul %408, %409, %cst_137 {dimension_numbers = #tpu.dot_dimension_numbers<[1], [0], [0], [1], [0, 0, 1, 1], [], []>} : vector<10x8xbf16>, vector<8x64xbf16>, vector<10x64xf32> -> vector<10x64xf32>
    %411 = arith.addf %389, %410 : vector<10x64xf32>
    %412 = vector.extract_strided_slice %251 {offsets = [0, 56], sizes = [10, 8], strides = [1, 1]} : vector<10x64xbf16> to vector<10x8xbf16>
    %413 = vector.extract_strided_slice %254 {offsets = [56, 0], sizes = [8, 12], strides = [1, 1]} : vector<64x12xbf16> to vector<8x12xbf16>
    %cst_138 = arith.constant dense<0.000000e+00> : vector<10x12xf32>
    %414 = tpu.matmul %412, %413, %cst_138 {dimension_numbers = #tpu.dot_dimension_numbers<[1], [0], [0], [1], [0, 0, 1, 1], [], []>} : vector<10x8xbf16>, vector<8x12xbf16>, vector<10x12xf32> -> vector<10x12xf32>
    %415 = vector.broadcast %231 : vector<1x12xf32> to vector<10x12xf32>
    %416 = arith.addf %414, %415 : vector<10x12xf32>
    %cst_139 = arith.constant dense<0xFF800000> : vector<10xf32>
    %417 = vector.multi_reduction <maximumf>, %416, %cst_139 [1] : vector<10x12xf32> to vector<10xf32>
    %418 = vector.shape_cast %417 : vector<10xf32> to vector<10x1xf32>
    %419 = vector.broadcast %418 : vector<10x1xf32> to vector<10x12xf32>
    %420 = arith.subf %416, %419 : vector<10x12xf32>
    %421 = math.exp %420 : vector<10x12xf32>
    %cst_140 = arith.constant dense<0.000000e+00> : vector<10xf32>
    %422 = vector.multi_reduction <add>, %421, %cst_140 [1] : vector<10x12xf32> to vector<10xf32>
    %423 = vector.shape_cast %422 : vector<10xf32> to vector<10x1xf32>
    %424 = tpu.reciprocal %423 {approx = true} : vector<10x1xf32> -> vector<10x1xf32>
    %425 = vector.broadcast %424 : vector<10x1xf32> to vector<10x12xf32>
    %426 = arith.mulf %421, %425 : vector<10x12xf32>
    %427 = arith.truncf %426 : vector<10x12xf32> to vector<10x12xbf16>
    %428 = vector.extract_strided_slice %256 {offsets = [0, 56], sizes = [12, 8], strides = [1, 1]} : vector<12x64xbf16> to vector<12x8xbf16>
    %cst_141 = arith.constant dense<0.000000e+00> : vector<10x8xf32>
    %429 = tpu.matmul %427, %428, %cst_141 {dimension_numbers = #tpu.dot_dimension_numbers<[1], [0], [0], [1], [0, 0, 1, 1], [], []>} : vector<10x12xbf16>, vector<12x8xbf16>, vector<10x8xf32> -> vector<10x8xf32>
    %430 = arith.truncf %429 : vector<10x8xf32> to vector<10x8xbf16>
    %431 = vector.extract_strided_slice %241 {offsets = [56, 0], sizes = [8, 64], strides = [1, 1]} : vector<64x64xbf16> to vector<8x64xbf16>
    %cst_142 = arith.constant dense<0.000000e+00> : vector<10x64xf32>
    %432 = tpu.matmul %430, %431, %cst_142 {dimension_numbers = #tpu.dot_dimension_numbers<[1], [0], [0], [1], [0, 0, 1, 1], [], []>} : vector<10x8xbf16>, vector<8x64xbf16>, vector<10x64xf32> -> vector<10x64xf32>
    %433 = arith.addf %411, %432 : vector<10x64xf32>
    %434 = vector.broadcast %243 : vector<1x64xf32> to vector<10x64xf32>
    %435 = arith.addf %433, %434 : vector<10x64xf32>
    %436 = arith.addf %229, %435 : vector<10x64xf32>
    %c0_143 = arith.constant 0 : index
    %c0_144 = arith.constant 0 : index
    %c0_145 = arith.constant 0 : index
    %437 = vector.load %arg20[%c0_143, %c0_144, %c0_145] : memref<1x1x64xf32, #tpu.memory_space<vmem>>, vector<1x1x64xf32>
    %438 = vector.shape_cast %437 : vector<1x1x64xf32> to vector<1x64xf32>
    %c0_146 = arith.constant 0 : index
    %c0_147 = arith.constant 0 : index
    %c0_148 = arith.constant 0 : index
    %439 = vector.load %arg21[%c0_146, %c0_147, %c0_148] : memref<1x1x64xf32, #tpu.memory_space<vmem>>, vector<1x1x64xf32>
    %440 = vector.shape_cast %439 : vector<1x1x64xf32> to vector<1x64xf32>
    %cst_149 = arith.constant dense<0.000000e+00> : vector<10xf32>
    %441 = vector.multi_reduction <add>, %436, %cst_149 [1] : vector<10x64xf32> to vector<10xf32>
    %442 = vector.shape_cast %441 : vector<10xf32> to vector<10x1xf32>
    %cst_150 = arith.constant 6.400000e+01 : f32
    %443 = vector.broadcast %cst_150 : f32 to vector<10x1xf32>
    %444 = arith.divf %442, %443 : vector<10x1xf32>
    %445 = vector.broadcast %444 : vector<10x1xf32> to vector<10x64xf32>
    %446 = arith.subf %436, %445 : vector<10x64xf32>
    %447 = arith.mulf %446, %446 : vector<10x64xf32>
    %cst_151 = arith.constant dense<0.000000e+00> : vector<10xf32>
    %448 = vector.multi_reduction <add>, %447, %cst_151 [1] : vector<10x64xf32> to vector<10xf32>
    %449 = vector.shape_cast %448 : vector<10xf32> to vector<10x1xf32>
    %cst_152 = arith.constant 6.400000e+01 : f32
    %450 = vector.broadcast %cst_152 : f32 to vector<10x1xf32>
    %451 = arith.divf %449, %450 : vector<10x1xf32>
    %cst_153 = arith.constant 9.99999974E-6 : f32
    %452 = vector.broadcast %cst_153 : f32 to vector<10x1xf32>
    %453 = arith.addf %451, %452 : vector<10x1xf32>
    %454 = math.rsqrt %453 : vector<10x1xf32>
    %455 = vector.broadcast %454 : vector<10x1xf32> to vector<10x64xf32>
    %456 = arith.mulf %446, %455 : vector<10x64xf32>
    %457 = vector.broadcast %438 : vector<1x64xf32> to vector<10x64xf32>
    %458 = arith.mulf %456, %457 : vector<10x64xf32>
    %459 = vector.broadcast %440 : vector<1x64xf32> to vector<10x64xf32>
    %460 = arith.addf %458, %459 : vector<10x64xf32>
    %c0_154 = arith.constant 0 : index
    %c0_155 = arith.constant 0 : index
    %c0_156 = arith.constant 0 : index
    %461 = vector.load %arg22[%c0_154, %c0_155, %c0_156] : memref<1x64x128xbf16, #tpu.memory_space<vmem>>, vector<1x64x128xbf16>
    %462 = vector.shape_cast %461 : vector<1x64x128xbf16> to vector<64x128xbf16>
    %c0_157 = arith.constant 0 : index
    %c0_158 = arith.constant 0 : index
    %c0_159 = arith.constant 0 : index
    %463 = vector.load %arg23[%c0_157, %c0_158, %c0_159] : memref<1x1x128xf32, #tpu.memory_space<vmem>>, vector<1x1x128xf32>
    %464 = vector.shape_cast %463 : vector<1x1x128xf32> to vector<1x128xf32>
    %c0_160 = arith.constant 0 : index
    %c0_161 = arith.constant 0 : index
    %c0_162 = arith.constant 0 : index
    %465 = vector.load %arg24[%c0_160, %c0_161, %c0_162] : memref<1x128x64xbf16, #tpu.memory_space<vmem>>, vector<1x128x64xbf16>
    %466 = vector.shape_cast %465 : vector<1x128x64xbf16> to vector<128x64xbf16>
    %c0_163 = arith.constant 0 : index
    %c0_164 = arith.constant 0 : index
    %c0_165 = arith.constant 0 : index
    %467 = vector.load %arg25[%c0_163, %c0_164, %c0_165] : memref<1x1x64xf32, #tpu.memory_space<vmem>>, vector<1x1x64xf32>
    %468 = vector.shape_cast %467 : vector<1x1x64xf32> to vector<1x64xf32>
    %469 = arith.truncf %460 : vector<10x64xf32> to vector<10x64xbf16>
    %cst_166 = arith.constant dense<0.000000e+00> : vector<10x128xf32>
    %470 = tpu.matmul %469, %462, %cst_166 {dimension_numbers = #tpu.dot_dimension_numbers<[1], [0], [0], [1], [0, 0, 1, 1], [], []>} : vector<10x64xbf16>, vector<64x128xbf16>, vector<10x128xf32> -> vector<10x128xf32>
    %471 = vector.broadcast %464 : vector<1x128xf32> to vector<10x128xf32>
    %472 = arith.addf %470, %471 : vector<10x128xf32>
    %cst_167 = arith.constant 0.000000e+00 : f32
    %473 = vector.broadcast %cst_167 : f32 to vector<10x128xf32>
    %474 = arith.maximumf %472, %473 : vector<10x128xf32>
    %475 = arith.truncf %474 : vector<10x128xf32> to vector<10x128xbf16>
    %cst_168 = arith.constant dense<0.000000e+00> : vector<10x64xf32>
    %476 = tpu.matmul %475, %466, %cst_168 {dimension_numbers = #tpu.dot_dimension_numbers<[1], [0], [0], [1], [0, 0, 1, 1], [], []>} : vector<10x128xbf16>, vector<128x64xbf16>, vector<10x64xf32> -> vector<10x64xf32>
    %477 = vector.broadcast %468 : vector<1x64xf32> to vector<10x64xf32>
    %478 = arith.addf %476, %477 : vector<10x64xf32>
    %479 = arith.addf %460, %478 : vector<10x64xf32>
    %c0_169 = arith.constant 0 : index
    %c0_170 = arith.constant 0 : index
    %c0_171 = arith.constant 0 : index
    %480 = vector.load %arg26[%c0_169, %c0_170, %c0_171] : memref<1x1x64xf32, #tpu.memory_space<vmem>>, vector<1x1x64xf32>
    %481 = vector.shape_cast %480 : vector<1x1x64xf32> to vector<1x64xf32>
    %c0_172 = arith.constant 0 : index
    %c0_173 = arith.constant 0 : index
    %c0_174 = arith.constant 0 : index
    %482 = vector.load %arg27[%c0_172, %c0_173, %c0_174] : memref<1x1x64xf32, #tpu.memory_space<vmem>>, vector<1x1x64xf32>
    %483 = vector.shape_cast %482 : vector<1x1x64xf32> to vector<1x64xf32>
    %cst_175 = arith.constant dense<0.000000e+00> : vector<10xf32>
    %484 = vector.multi_reduction <add>, %479, %cst_175 [1] : vector<10x64xf32> to vector<10xf32>
    %485 = vector.shape_cast %484 : vector<10xf32> to vector<10x1xf32>
    %cst_176 = arith.constant 6.400000e+01 : f32
    %486 = vector.broadcast %cst_176 : f32 to vector<10x1xf32>
    %487 = arith.divf %485, %486 : vector<10x1xf32>
    %488 = vector.broadcast %487 : vector<10x1xf32> to vector<10x64xf32>
    %489 = arith.subf %479, %488 : vector<10x64xf32>
    %490 = arith.mulf %489, %489 : vector<10x64xf32>
    %cst_177 = arith.constant dense<0.000000e+00> : vector<10xf32>
    %491 = vector.multi_reduction <add>, %490, %cst_177 [1] : vector<10x64xf32> to vector<10xf32>
    %492 = vector.shape_cast %491 : vector<10xf32> to vector<10x1xf32>
    %cst_178 = arith.constant 6.400000e+01 : f32
    %493 = vector.broadcast %cst_178 : f32 to vector<10x1xf32>
    %494 = arith.divf %492, %493 : vector<10x1xf32>
    %cst_179 = arith.constant 9.99999974E-6 : f32
    %495 = vector.broadcast %cst_179 : f32 to vector<10x1xf32>
    %496 = arith.addf %494, %495 : vector<10x1xf32>
    %497 = math.rsqrt %496 : vector<10x1xf32>
    %498 = vector.broadcast %497 : vector<10x1xf32> to vector<10x64xf32>
    %499 = arith.mulf %489, %498 : vector<10x64xf32>
    %500 = vector.broadcast %481 : vector<1x64xf32> to vector<10x64xf32>
    %501 = arith.mulf %499, %500 : vector<10x64xf32>
    %502 = vector.broadcast %483 : vector<1x64xf32> to vector<10x64xf32>
    %503 = arith.addf %501, %502 : vector<10x64xf32>
    %c0_180 = arith.constant 0 : index
    %c0_181 = arith.constant 0 : index
    %504 = vector.load %arg31[%c0_180, %c0_181] : memref<10x64xf32, #tpu.memory_space<vmem>>, vector<10x64xf32>
    tpu.vector_store %arg31[%c0_180, %c0_181], %503 {strides = array<i32>} : memref<10x64xf32, #tpu.memory_space<vmem>>, vector<10x64xf32>,
    %c1_i32 = arith.constant 1 : i32
    %505 = arith.cmpi eq, %arg1, %c1_i32 : i32
    %506 = arith.extui %505 : i1 to i32
    %c0_i32_182 = arith.constant 0 : i32
    %507 = arith.cmpi ne, %506, %c0_i32_182 : i32
    scf.if %507 {
      %508 = arith.truncf %503 : vector<10x64xf32> to vector<10x64xbf16>
      %c0_183 = arith.constant 0 : index
      %c0_184 = arith.constant 0 : index
      %509 = vector.load %arg28[%c0_183, %c0_184] : memref<64x128xbf16, #tpu.memory_space<vmem>>, vector<64x128xbf16>
      %cst_185 = arith.constant dense<0.000000e+00> : vector<10x128xf32>
      %510 = tpu.matmul %508, %509, %cst_185 {dimension_numbers = #tpu.dot_dimension_numbers<[1], [0], [0], [1], [0, 0, 1, 1], [], []>} : vector<10x64xbf16>, vector<64x128xbf16>, vector<10x128xf32> -> vector<10x128xf32>
      %c0_186 = arith.constant 0 : index
      %c0_187 = arith.constant 0 : index
      %511 = vector.load %arg29[%c0_186, %c0_187] : memref<1x128xf32, #tpu.memory_space<vmem>>, vector<1x128xf32>
      %512 = vector.broadcast %511 : vector<1x128xf32> to vector<10x128xf32>
      %513 = arith.addf %510, %512 : vector<10x128xf32>
      %c0_188 = arith.constant 0 : index
      %c0_189 = arith.constant 0 : index
      %c0_190 = arith.constant 0 : index
      %514 = vector.load %arg30[%c0_188, %c0_189, %c0_190] : memref<1x10x128xf32, #tpu.memory_space<vmem>>, vector<1x10x128xf32>
      %515 = vector.shape_cast %514 : vector<1x10x128xf32> to vector<10x128xf32>
      %516 = vector.shape_cast %513 : vector<10x128xf32> to vector<1x10x128xf32>
      tpu.vector_store %arg30[%c0_188, %c0_189, %c0_190], %516 {strides = array<i32>} : memref<1x10x128xf32, #tpu.memory_space<vmem>>, vector<1x10x128xf32>,
    } else {
    }
    return
  }
  func.func @transform_0(%arg0: i32, %arg1: i32) -> (i32, i32, i32) {
    %c0_i32 = arith.constant 0 : i32
    %c0_i32_0 = arith.constant 0 : i32
    %c0_i32_1 = arith.constant 0 : i32
    return %arg0, %c0_i32, %c0_i32_0 : i32, i32, i32
  }
  func.func @transform_1(%arg0: i32, %arg1: i32) -> (i32, i32, i32) {
    %c0_i32 = arith.constant 0 : i32
    %c0_i32_0 = arith.constant 0 : i32
    %c0_i32_1 = arith.constant 0 : i32
    return %arg0, %c0_i32, %c0_i32_0 : i32, i32, i32
  }
  func.func @transform_2(%arg0: i32, %arg1: i32) -> (i32, i32, i32) {
    %c0_i32 = arith.constant 0 : i32
    %c0_i32_0 = arith.constant 0 : i32
    %c0_i32_1 = arith.constant 0 : i32
    return %arg0, %c0_i32, %c0_i32_0 : i32, i32, i32
  }
  func.func @transform_3(%arg0: i32, %arg1: i32) -> (i32, i32, i32) {
    %c0_i32 = arith.constant 0 : i32
    %c0_i32_0 = arith.constant 0 : i32
    %c0_i32_1 = arith.constant 0 : i32
    return %arg0, %c0_i32, %c0_i32_0 : i32, i32, i32
  }
  func.func @transform_4(%arg0: i32, %arg1: i32) -> (i32, i32, i32) {
    %c0_i32 = arith.constant 0 : i32
    %c0_i32_0 = arith.constant 0 : i32
    %c0_i32_1 = arith.constant 0 : i32
    return %arg1, %c0_i32, %c0_i32_0 : i32, i32, i32
  }
  func.func @transform_5(%arg0: i32, %arg1: i32) -> (i32, i32, i32) {
    %c0_i32 = arith.constant 0 : i32
    %c0_i32_0 = arith.constant 0 : i32
    %c0_i32_1 = arith.constant 0 : i32
    return %arg1, %c0_i32, %c0_i32_0 : i32, i32, i32
  }
  func.func @transform_6(%arg0: i32, %arg1: i32) -> (i32, i32, i32) {
    %c0_i32 = arith.constant 0 : i32
    %c0_i32_0 = arith.constant 0 : i32
    %c0_i32_1 = arith.constant 0 : i32
    return %arg1, %c0_i32, %c0_i32_0 : i32, i32, i32
  }
  func.func @transform_7(%arg0: i32, %arg1: i32) -> (i32, i32, i32) {
    %c0_i32 = arith.constant 0 : i32
    %c0_i32_0 = arith.constant 0 : i32
    %c0_i32_1 = arith.constant 0 : i32
    return %arg1, %c0_i32, %c0_i32_0 : i32, i32, i32
  }
  func.func @transform_8(%arg0: i32, %arg1: i32) -> (i32, i32, i32) {
    %c0_i32 = arith.constant 0 : i32
    %c0_i32_0 = arith.constant 0 : i32
    %c0_i32_1 = arith.constant 0 : i32
    return %arg1, %c0_i32, %c0_i32_0 : i32, i32, i32
  }
  func.func @transform_9(%arg0: i32, %arg1: i32) -> (i32, i32, i32) {
    %c0_i32 = arith.constant 0 : i32
    %c0_i32_0 = arith.constant 0 : i32
    %c0_i32_1 = arith.constant 0 : i32
    return %arg1, %c0_i32, %c0_i32_0 : i32, i32, i32
  }
  func.func @transform_10(%arg0: i32, %arg1: i32) -> (i32, i32, i32) {
    %c0_i32 = arith.constant 0 : i32
    %c0_i32_0 = arith.constant 0 : i32
    %c0_i32_1 = arith.constant 0 : i32
    return %arg1, %c0_i32, %c0_i32_0 : i32, i32, i32
  }
  func.func @transform_11(%arg0: i32, %arg1: i32) -> (i32, i32, i32) {
    %c0_i32 = arith.constant 0 : i32
    %c0_i32_0 = arith.constant 0 : i32
    %c0_i32_1 = arith.constant 0 : i32
    return %arg1, %c0_i32, %c0_i32_0 : i32, i32, i32
  }
  func.func @transform_12(%arg0: i32, %arg1: i32) -> (i32, i32, i32) {
    %c0_i32 = arith.constant 0 : i32
    %c0_i32_0 = arith.constant 0 : i32
    %c0_i32_1 = arith.constant 0 : i32
    return %arg1, %c0_i32, %c0_i32_0 : i32, i32, i32
  }
  func.func @transform_13(%arg0: i32, %arg1: i32) -> (i32, i32, i32) {
    %c0_i32 = arith.constant 0 : i32
    %c0_i32_0 = arith.constant 0 : i32
    %c0_i32_1 = arith.constant 0 : i32
    return %arg1, %c0_i32, %c0_i32_0 : i32, i32, i32
  }
  func.func @transform_14(%arg0: i32, %arg1: i32) -> (i32, i32, i32) {
    %c0_i32 = arith.constant 0 : i32
    %c0_i32_0 = arith.constant 0 : i32
    %c0_i32_1 = arith.constant 0 : i32
    return %arg1, %c0_i32, %c0_i32_0 : i32, i32, i32
  }
  func.func @transform_15(%arg0: i32, %arg1: i32) -> (i32, i32, i32) {
    %c0_i32 = arith.constant 0 : i32
    %c0_i32_0 = arith.constant 0 : i32
    %c0_i32_1 = arith.constant 0 : i32
    return %arg1, %c0_i32, %c0_i32_0 : i32, i32, i32
  }
  func.func @transform_16(%arg0: i32, %arg1: i32) -> (i32, i32, i32) {
    %c0_i32 = arith.constant 0 : i32
    %c0_i32_0 = arith.constant 0 : i32
    %c0_i32_1 = arith.constant 0 : i32
    return %arg1, %c0_i32, %c0_i32_0 : i32, i32, i32
  }
  func.func @transform_17(%arg0: i32, %arg1: i32) -> (i32, i32, i32) {
    %c0_i32 = arith.constant 0 : i32
    %c0_i32_0 = arith.constant 0 : i32
    %c0_i32_1 = arith.constant 0 : i32
    return %arg1, %c0_i32, %c0_i32_0 : i32, i32, i32
  }
  func.func @transform_18(%arg0: i32, %arg1: i32) -> (i32, i32, i32) {
    %c0_i32 = arith.constant 0 : i32
    %c0_i32_0 = arith.constant 0 : i32
    %c0_i32_1 = arith.constant 0 : i32
    return %arg1, %c0_i32, %c0_i32_0 : i32, i32, i32
  }
  func.func @transform_19(%arg0: i32, %arg1: i32) -> (i32, i32, i32) {
    %c0_i32 = arith.constant 0 : i32
    %c0_i32_0 = arith.constant 0 : i32
    %c0_i32_1 = arith.constant 0 : i32
    return %arg1, %c0_i32, %c0_i32_0 : i32, i32, i32
  }
  func.func @transform_20(%arg0: i32, %arg1: i32) -> (i32, i32, i32) {
    %c0_i32 = arith.constant 0 : i32
    %c0_i32_0 = arith.constant 0 : i32
    %c0_i32_1 = arith.constant 0 : i32
    return %arg1, %c0_i32, %c0_i32_0 : i32, i32, i32
  }
  func.func @transform_21(%arg0: i32, %arg1: i32) -> (i32, i32, i32) {
    %c0_i32 = arith.constant 0 : i32
    %c0_i32_0 = arith.constant 0 : i32
    %c0_i32_1 = arith.constant 0 : i32
    return %arg1, %c0_i32, %c0_i32_0 : i32, i32, i32
  }
  func.func @transform_22(%arg0: i32, %arg1: i32) -> (i32, i32, i32) {
    %c0_i32 = arith.constant 0 : i32
    %c0_i32_0 = arith.constant 0 : i32
    %c0_i32_1 = arith.constant 0 : i32
    return %arg1, %c0_i32, %c0_i32_0 : i32, i32, i32
  }
  func.func @transform_23(%arg0: i32, %arg1: i32) -> (i32, i32, i32) {
    %c0_i32 = arith.constant 0 : i32
    %c0_i32_0 = arith.constant 0 : i32
    %c0_i32_1 = arith.constant 0 : i32
    return %arg1, %c0_i32, %c0_i32_0 : i32, i32, i32
  }
  func.func @transform_24(%arg0: i32, %arg1: i32) -> (i32, i32, i32) {
    %c0_i32 = arith.constant 0 : i32
    %c0_i32_0 = arith.constant 0 : i32
    %c0_i32_1 = arith.constant 0 : i32
    return %arg1, %c0_i32, %c0_i32_0 : i32, i32, i32
  }
  func.func @transform_25(%arg0: i32, %arg1: i32) -> (i32, i32, i32) {
    %c0_i32 = arith.constant 0 : i32
    %c0_i32_0 = arith.constant 0 : i32
    %c0_i32_1 = arith.constant 0 : i32
    return %arg1, %c0_i32, %c0_i32_0 : i32, i32, i32
  }
  func.func @transform_26(%arg0: i32, %arg1: i32) -> (i32, i32) {
    %c0_i32 = arith.constant 0 : i32
    %c0_i32_0 = arith.constant 0 : i32
    %c0_i32_1 = arith.constant 0 : i32
    return %c0_i32, %c0_i32_0 : i32, i32
  }
  func.func @transform_27(%arg0: i32, %arg1: i32) -> (i32, i32) {
    %c0_i32 = arith.constant 0 : i32
    %c0_i32_0 = arith.constant 0 : i32
    %c0_i32_1 = arith.constant 0 : i32
    return %c0_i32, %c0_i32_0 : i32, i32
  }
  func.func @transform_28(%arg0: i32, %arg1: i32) -> (i32, i32, i32) {
    %c0_i32 = arith.constant 0 : i32
    %c0_i32_0 = arith.constant 0 : i32
    %c0_i32_1 = arith.constant 0 : i32
    return %arg0, %c0_i32, %c0_i32_0 : i32, i32, i32
  }
}

</mosaic_0001>

<bundles_post_ra>
// kernel: forward.2
= control target key start
LH: loop header
LB: loop body
LE: loop exit
PB: predicated region body
PF: predicated region fallthrough
CT: control target
= control target key end

     0   :  { %s2623_s21 = smov 0   ;;  %s2625_s22 = smov 0   ;;  %s3019_s0 = inlined_call_operand.vmem [shape: bf16[2,12,64], index: 0, kind: input, shape index: {}]   ;;  %s3020_s1 = inlined_call_operand.vmem [shape: f32[2,12,12], index: 1, kind: input, shape index: {}]   ;;  %s3021_s2 = inlined_call_operand.vmem [shape: bf16[2,64,64], index: 2, kind: input, shape index: {}]   ;;  %s3022_s3 = inlined_call_operand.vmem [shape: f32[2,1,64], index: 3, kind: input, shape index: {}]   ;;  %s3023_s4 = inlined_call_operand.vmem [shape: bf16[2,64,128], index: 4, kind: input, shape index: {}]   ;;  %s3024_s5 = inlined_call_operand.vmem [shape: f32[2,1,128], index: 5, kind: input, shape index: {}]   ;;  %s3025_s6 = inlined_call_operand.vmem [shape: bf16[2,64,64], index: 6, kind: input, shape index: {}]   ;;  %s3026_s7 = inlined_call_operand.vmem [shape: f32[2,1,64], index: 7, kind: input, shape index: {}]   ;;  %s3027_s8 = inlined_call_operand.vmem [shape: f32[2,1,64], index: 8, kind: input, shape index: {}]   ;;  %s3028_s9 = inlined_call_operand.vmem [shape: f32[2,1,64], index: 9, kind: input, shape index: {}]   ;;  %s3029_s10 = inlined_call_operand.vmem [shape: bf16[2,64,128], index: 10, kind: input, shape index: {}]   ;;  %s3030_s11 = inlined_call_operand.vmem [shape: f32[2,1,128], index: 11, kind: input, shape index: {}]   ;;  %s3031_s12 = inlined_call_operand.vmem [shape: bf16[2,128,64], index: 12, kind: input, shape index: {}]   ;;  %s3032_s13 = inlined_call_operand.vmem [shape: f32[2,1,64], index: 13, kind: input, shape index: {}]   ;;  %s3033_s14 = inlined_call_operand.vmem [shape: f32[2,1,64], index: 14, kind: input, shape index: {}]   ;;  %s3034_s15 = inlined_call_operand.vmem [shape: f32[2,1,64], index: 15, kind: input, shape index: {}]   ;;  %s3035_s16 = inlined_call_operand.vmem [shape: bf16[2,12,64], index: 16, kind: output, shape index: {}]  }
   0x1   :  { %3041 = sst [smem:[#allocation10_spill]] %s3019_s0  ;;  %s2627_s23 = smov 0  }
   0x2   :  { %3042 = sst [smem:[#allocation11_spill]] %s3020_s1  ;;  %s2629_s24 = smov 0  }
   0x3   :  { %3043 = sst [smem:[#allocation12_spill]] %s3021_s2  ;;  %s2631_s25 = smov 0  }
   0x4   :  { %3044 = sst [smem:[#allocation13_spill]] %s3022_s3 }
   0x5   :  { %3045 = sst [smem:[#allocation14_spill]] %s3023_s4 }
   0x6   :  { %3046 = sst [smem:[#allocation15_spill]] %s3025_s6 }
   0x7   :  { %3047 = sst [smem:[#allocation16_spill]] %s3028_s9 }
   0x8   :  { %3048 = sst [smem:[#allocation17_spill]] %s3029_s10 }
   0x9   :  { %3049 = sst [smem:[#allocation18_spill]] %s3030_s11 }
   0xa   :  { %3050 = sst [smem:[#allocation19_spill]] %s3033_s14 }
   0xb   :  { %3051 = sst [smem:[#allocation20_spill]] %s3034_s15 }
   0xc   :  { %3052 = sst [smem:[#allocation21_spill]] %s3035_s16 }
   0xd LB: > { %3053 = sst [smem:[#allocation3_spill]] %s2504_s21  ;;  %s35_s26 = sadd.s32 1, %s2512_s23  ;;  %s2520_s25 = sphi %s2631_s25, %s26_s25   ;;  %s2516_s24 = sphi %s2629_s24, %s3090_s24   ;;  %s2512_s23 = sphi %s2627_s23, %s3089_s23   ;;  %s2508_s22 = sphi %s2625_s22, %s3088_s22   ;;  %s2504_s21 = sphi %s2623_s21, %s3087_s21  }
   0xe   : > { %3054 = sst [smem:[#allocation4_spill]] %s2512_s23  ;;  %s38_s27 = sadd.s32 1, %s2516_s24 }
   0xf   : > { %3055 = sst [smem:[#allocation5_spill]] %s2516_s24  ;;  %p36_p0 = scmp.ge.s32.totalorder %s35_s26, 2 }
  0x10   : > { %3056 = sst [smem:[#allocation6_spill]] %s2520_s25  ;;  %p2186_p1 = scmp.ge.s32.totalorder %s2520_s25, 1 }
  0x11   : > { %p606_p2 = scmp.lt.s32.totalorder %s2520_s25, 5  ;;  %s3092_s26 = smov (%p36_p0, %s35_s26), 0 }
  0x12   : > { %3057 = sst [smem:[#allocation7_spill]] %s3092_s26  ;;  %s3094_s27 = smov (!%p36_p0, %s38_s27), %s2516_s24 }
  0x13   : > { %p607_p3 = pnand %p2186_p1, %p606_p2  ;;  %p40_p4 = scmp.ge.s32.totalorder %s3094_s27, 2 }
  0x15   : > { %s3096_s27 = smov (%p40_p4, %s3094_s27), 0  ;;  %610 = sbr.rel (%p607_p3) target bundleno = 3563 (0xdeb), region = 84 }
  0x16   : > { %3058 = sst [smem:[#allocation8_spill]] %s3096_s27 }
  0x1a   : > { %p713_p5 = scmp.lt.s32.totalorder %s2508_s22, 1  ;;  %p723_p6 = scmp.lt.s32.totalorder %s2504_s21, 1 }
  0x1b   : > { %s3059_s18 = sld [smem:[#allocation10_spill]] }
  0x1c   : > { %s3098_s22 = smov (!%p713_p5, %s2508_s22), 1  ;;  %s3060_s1 = sld [smem:[#allocation11_spill]] }
  0x1d   : > { %s2657_s28 = scalar_select %p723_p6, %s2504_s21, 1 }
  0x1e   : > { %s2314_s29 = sshll.u32 %s3098_s22, 3  ;;  %s2315_s30 = sshll.u32 %s3098_s22, 4 }
  0x1f   : > { %s2316_s24 = sshll.u32 %s2657_s28, 5  ;;  %s3063_s2 = sld [smem:[#allocation12_spill]] }
  0x20   : > { %s3064_s4 = sld [smem:[#allocation14_spill]]  ;;  %s768_s0 = scalar_lea.vmem %s3032_s13, %s2657_s28 }
  0x21   : > { %s717_s19 = scalar_lea.vmem %s3059_s18, %s2314_s29  ;;  %s3065_s6 = sld [smem:[#allocation15_spill]] }
  0x22   : > { %s2665_s26 = scalar_lea.vmem %s3060_s1, %s2315_s30  ;;  %s3067_s10 = sld [smem:[#allocation17_spill]] }
  0x23   : > { %3061 = sst [smem:[#allocation9_spill]] %s2665_s26 }
  0x24   : > { %s3071_s30 = sld [smem:[#allocation21_spill]] }
  0x25   : > { %s2675_s22 = scalar_lea.vmem %s3063_s2, %s2316_s24  ;;  %s3069_s2 = sld [smem:[#allocation19_spill]] }
  0x26   : > { %s2680_s18 = scalar_lea.vmem %s3064_s4, %s2316_s24  ;;  %s3072_s23 = sld [smem:[#allocation3_spill]] }
  0x27   : > { %s2689_s14 = scalar_lea.vmem %s3065_s6, %s2316_s24  ;;  %s2320_s6 = sshll.u32 %s2657_s28, 6 }
  0x28   : > { %s2706_s20 = scalar_lea.vmem %s3067_s10, %s2316_s24  ;;  %s2716_s15 = scalar_lea.vmem %s3031_s12, %s2320_s6 }
  0x29   : > { %s3070_s10 = sld [smem:[#allocation20_spill]] }
  0x2a   : > { %s2733_s11 = scalar_lea.vmem %s3071_s30, %s2314_s29 }
  0x2b   : > { %s771_s3 = scalar_lea.vmem %s3069_s2, %s2657_s28 }
  0x2c   : > { %p2203_p7 = scmp.ne.s32.totalorder %s3072_s23, 0 }
  0x2e   : > { %784 = sbr.rel (%p2203_p7) target bundleno = 56 (0x38), region = 88 }
  0x2f   : > { %s774_s9 = scalar_lea.vmem %s3070_s10, %s2657_s28 }
  0x33   : > { %v785_v0 = vld [vmem:[%s717_s19] sm:$0xf]  ;;  %vm789_vm0 = vcmask 523264   ;;  %v786_v1 = vld [vmem:[%s717_s19 + $0x4] sm:$0x3]  ;;  %vm791_vm1 = vcmask 519168  }
  0x34   : > { %v787_v2 = vunpack.c.l.bf16 %v785_v0  ;;  %v788_v3 = vunpack.c.l.bf16 %v786_v1 }
  0x36   : > { %790 = vst.msk [vmem:[#allocation2] sm:$0xff] %vm789_vm0, %v787_v2 }
  0x37   : > { %792 = vst.msk [vmem:[#allocation2 + $0x8] sm:$0xf] %vm791_vm1, %v788_v3 }
  0x38 PF: > { %v2329_v4 = vld [vmem:[%s2680_s18 + $0x18] sm:$0xff]  ;;  %v2328_v5 = vld [vmem:[%s2680_s18 + $0x10] sm:$0xff]  ;;  %v2327_v6 = vld [vmem:[%s2680_s18 + $0x8] sm:$0xff]  ;;  %vm852_vm2 = vcmask 523264   ;;  %s3073_s6 = scalar_lea.vmem %s3024_s5, %s2657_s28  ;;  %s3074_s19 = sld [smem:[#allocation13_spill]]  ;;  %vm964_vm3 = vcmask 1043456  }
  0x39   : > { %901 = vmatpush.bf16.msra.mxu1 %v2329_v4  ;;  %v2326_v7 = vld [vmem:[%s2680_s18] sm:$0xff]  ;;  %v2325_v11 = vld [vmem:[%s2675_s22 + $0x18] sm:$0xff]  ;;  %v2324_v12 = vld [vmem:[%s2675_s22 + $0x10] sm:$0xff]  ;;  %s2522_s18 = smov 64   ;;  %vm960_vm4 = vcmask 64512   ;;  %s3076_s30 = sld [smem:[#allocation9_spill]] }
  0x3a   : > { %860 = vmatpush.bf16.msra.mxu0 %v2325_v11  ;;  %v2323_v13 = vld [vmem:[%s2675_s22 + $0x8] sm:$0xff]  ;;  %v2322_v14 = vld [vmem:[%s2675_s22] sm:$0xff]  ;;  %s2523_s25 = smov 96   ;;  %vm1017_vm5 = vcmask 1045504   ;;  %vm982_vm6 = vcmask 97280   ;;  %vm986_vm7 = vcmask 93184  }
  0x3b   : > { %v2399_v15 = vld [vmem:[%s3073_s6] ss:$0 sm:$0xff]  ;;  %s2524_s21 = smov 120   ;;  %s2525_s16 = smov 112   ;;  %vm1696_vm8 = vcmask 519168  }
  0x3c   : > { %v815_v4 = vld [vmem:[%s2689_s14] sm:$0xf]  ;;  %s2526_s17 = smov 104   ;;  %s2527_s24 = smov 56  }
  0x3d   : > { %902 = vmatpush.bf16.msra.mxu1 %v2328_v5  ;;  %v2740_v8 = vld [vmem:[#allocation2] sm:$0xff]  ;;  %s2528_s27 = smov 40   ;;  %s2529_s1 = smov 48  }
  0x3e   : > { %v2742_v9 = vld [vmem:[#allocation2 + $0x8] sm:$0xf]  ;;  %861 = vmatpush.bf16.msra.mxu0 %v2324_v12  ;;  %s3075_s22 = scalar_lea.vmem %s3074_s19, %s2657_s28  ;;  %s2530_s26 = smov 88  }
  0x3f   : > { %v824_v10 = vpack.c.bf16 %v2742_v9, %v2740_v8  ;;  %v2400_v26 = vld [vmem:[%s3075_s22] ss:$0 sm:$0xff]  ;;  %v2786_v51 = vld [vmem:[%s3076_s30 + $0x8] sm:$0xf]  ;;  %s2531_s23 = smov 80   ;;  %s2532_s2 = smov 32  }
  0x40   : > { %v2781_v47 = vld [vmem:[%s3076_s30] sm:$0xff]  ;;  %s2533_s4 = smov 72   ;;  %s2534_s6 = smov 24  }
  0x41   : > { %903 = vmatpush.bf16.msra.mxu1 %v2327_v6  ;;  %v1128_v6 = vsel %vm964_vm3, %v815_v4, 0  ;;  %s2535_s10 = smov 16   ;;  %s2536_s29 = smov 8  }
  0x42   : > { %862 = vmatpush.bf16.msra.mxu0 %v2323_v13  ;;  %s3078_s30 = scalar_lea.vmem %s3027_s8, %s2657_s28 }
  0x45   : > { %904 = vmatpush.bf16.msra.mxu1 %v2326_v7 }
  0x46   : > { %863 = vmatpush.bf16.msra.mxu0 %v2322_v14 }
  0x48   : > { %2237 = vmatmul.msk.bf16.vlgmr.msra.gmra.mxu1 %vm852_vm2, %v824_v10 }
  0x49   : > { %2220 = vmatmul.msk.bf16.vlgmr.msra.gmra.mxu0 %vm852_vm2, %v824_v10 }
  0xc5   : > { %v906_v16 = vpop.f32.mrf.mxu1 }
  0xc6   : > { %v907_v17 = vadd.f32 %v2399_v15, %v906_v16  ;;  %v865_v25 = vpop.f32.mrf.mxu0 }
  0xc7   : > { %v866_v28 = vadd.f32 %v2400_v26, %v865_v25 }
  0xc8   : > { %913 = vxpose.xlu0.b32.start [1/2] (short) (narrow) %v907_v17, 64  ;;  %v953_v19 = vpack.c.bf16 %v907_v17, %v907_v17 }
  0xc9   : > { %v911_v30 = vpack.c.bf16 %v866_v28, %v866_v28 }
  0xca   : > { %v1009_v22 = vunpack.c.l.b16 %v953_v19 }
  0xcb   : > { %v957_v33 = vunpack.c.l.b16 %v911_v30 }
  0xcd   : > { %v908_v18 = vpop.f32.mrf.mxu1 }
  0xce   : > { %v909_v20 = vadd.f32 %v2399_v15, %v908_v18  ;;  %v867_v27 = vpop.f32.mrf.mxu0 }
  0xcf   : > { %v868_v29 = vadd.f32 %v2400_v26, %v867_v27 }
  0xd0   : > { %v954_v21 = vpack.c.bf16 %v909_v20, %v909_v20  ;;  %914 = vxpose.xlu0.b32.end [2/2] (short) (narrow) %v909_v20, 64 }
  0xd1   : > { %v912_v31 = vpack.c.bf16 %v868_v29, %v868_v29 }
  0xd2   : > { %v1010_v23 = vunpack.c.l.b16 %v954_v21 }
  0xd3   : > { %v958_v34 = vunpack.c.l.b16 %v912_v31 }
  0xd4   : > { %v2757_v24 = vpack.c.b16 %v1010_v23, %v1009_v22 }
  0xd5   : > { %v2766_v37 = vpack.c.b16 %v958_v34, %v957_v33 }
 0x16c   : > { %v929_v32 = vpop.trf.xlu0 }
 0x16d   : > { %v945_v35 = vpack.c.bf16 %v929_v32, %v929_v32 }
 0x16e   : > { %1012 = vrot.lane.b32.xlu0 %v2757_v24, %s2522_s18 }
 0x16f   : > { %v966_v36 = vsel %vm964_vm3, %v945_v35, 0 }
 0x170   : > { %975 = vmatpush.bf16.msra.mxu2 %v966_v36 }
 0x173   : > { %2238 = vmatmul.msk.bf16.vlgmr.msra.gmra.mxu2 %vm960_vm4, %v2766_v37 }
 0x174   : > { %v930_v38 = vpop.trf.xlu0 }
 0x175   : > { %v946_v55 = vpack.c.bf16 %v930_v38, %v930_v38 }
 0x176   : > { %1324 = vrot.lane.b32.xlu0 %v2766_v37, %s2523_s25 }
 0x177   : > { %v1042_v56 = vsel %vm964_vm3, %v946_v55, 0 }
 0x178   : > { %1051 = vmatpush.bf16.msrb.mxu2 %v1042_v56 }
 0x17c   : > { %v931_v39 = vpop.trf.xlu0  ;;  %1137 = vmatpush.bf16.msra.mxu2 %v1128_v6 }
 0x17d   : > { %v947_v7 = vpack.c.bf16 %v931_v39, %v931_v39 }
 0x17f   : > { %v1150_v10 = vsel %vm964_vm3, %v947_v7, 0 }
 0x184   : > { %v932_v40 = vpop.trf.xlu0 }
 0x185   : > { %v948_v1 = vpack.c.bf16 %v932_v40, %v932_v40 }
 0x187   : > { %v1240_v5 = vsel %vm964_vm3, %v948_v1, 0 }
 0x188   : > { %1249 = vmatpush.bf16.msrb.mxu1 %v1240_v5 }
 0x18c   : > { %v2771_v41 = vpop.trf.xlu0 }
 0x194   : > { %v2773_v42 = vpop.trf.xlu0 }
 0x19c   : > { %v2775_v43 = vpop.trf.xlu0 }
 0x1a4   : > { %v2777_v44 = vpop.trf.xlu0 }
 0x1e0   : > { %v1013_v45 = vpop.permute.xlu0 %1012 }
 0x1e1   : > { %v1019_v46 = vsel %vm1017_vm5, %v1013_v45, 0 }
 0x1e2   : > { %1028 = vmatpush.bf16.msra.mxu3 %v1019_v46 }
 0x1f6   : > { %v977_v48 = vpop.f32.mrf.mxu2 }
 0x1f7   : > { %v978_v49 = vadd.f32 %v977_v48, %v2781_v47 }
 0x1f9   : > { %v983_v50 = vsel %vm982_vm6, %v978_v49, -inf }
 0x1fa   : > { %984 = vmax.xlane.f32.xlu1 %v983_v50 }
 0x1fe   : > { %v979_v52 = vpop.f32.mrf.mxu2 }
 0x1ff   : > { %v980_v53 = vadd.f32 %v979_v52, %v2786_v51 }
 0x201   : > { %v987_v54 = vsel %vm986_vm7, %v980_v53, -inf }
 0x202   : > { %988 = vmax.xlane.f32.xlu1 %v987_v54 }
 0x21b   : > { %1036 = vrot.lane.b32.xlu1 %v2766_v37, %s2524_s21 }
 0x26d   : > { %v985_v57 = vpop.xlane.xlu1 %984 }
 0x26e   : > { %v990_v58 = vsub.f32 %v978_v49, %v985_v57 }
 0x270   : > { %v992_v59 = vmul.f32 1.442695, %v990_v58 }
 0x272   : > { %2408 = vpow2.f32 %v992_v59 }
 0x275   : > { %v989_v60 = vpop.xlane.xlu1 %988 }
 0x276   : > { %v991_v61 = vsub.f32 %v980_v53, %v989_v60 }
 0x278   : > { %v2409_v62 = vpop.eup %2408  ;;  %v994_v63 = vmul.f32 1.442695, %v991_v61 }
 0x279   : > { %v996_v0 = vsel %vm982_vm6, %v2409_v62, 0.0 }
 0x27a   : > { %2410 = vpow2.f32 %v994_v63  ;;  %997 = vadd.xlane.f32.xlu2 %v996_v0 }
 0x280   : > { %v2411_v2 = vpop.eup %2410 }
 0x281   : > { %v999_v3 = vsel %vm986_vm7, %v2411_v2, 0.0 }
 0x282   : > { %1000 = vadd.xlane.f32.xlu2 %v999_v3 }
 0x28d   : > { %v1037_v11 = vpop.permute.xlu1 %1036 }
 0x28e   : > { %2240 = vmatmul.msk.bf16.vlgmr.msrb.gmra.mxu2 %vm960_vm4, %v1037_v11 }
 0x28f   : > { %1159 = vmatpush.bf16.msrb.mxu2 %v1150_v10 }
 0x29a   : > { %1144 = vrot.lane.b32.xlu2 %v2766_v37, %s2525_s16  ;;  %s3079_s16 = sld [smem:[#allocation16_spill]] }
 0x2a2   : > { %1234 = vrot.lane.b32.xlu2 %v2766_v37, %s2526_s17  ;;  %s3080_s17 = scalar_lea.vmem %s3079_s16, %s2657_s28 }
 0x2ed   : > { %v998_v12 = vpop.xlane.xlu2 %997 }
 0x2ee   : > { %2412 = vrcp.f32 %v998_v12 }
 0x2f4   : > { %v2413_v14 = vpop.eup %2412 }
 0x2f5   : > { %v1001_v13 = vpop.xlane.xlu2 %1000  ;;  %v1004_v17 = vmul.f32 %v2413_v14, %v2409_v62 }
 0x2f6   : > { %2414 = vrcp.f32 %v1001_v13 }
 0x2fc   : > { %v2415_v15 = vpop.eup %2414 }
 0x2fd   : > { %v1145_v16 = vpop.permute.xlu2 %1144  ;;  %v1005_v18 = vmul.f32 %v2415_v15, %v2411_v2 }
 0x2ff   : > { %v1006_v19 = vpack.c.bf16 %v1005_v18, %v1004_v17 }
 0x301   : > { %2239 = vmatmul.msk.bf16.vlgmr.msra.gmra.mxu3 %vm982_vm6, %v1006_v19 }
 0x305   : > { %v1235_v20 = vpop.permute.xlu2 %1234 }
 0x306   : > { %2247 = vmatmul.msk.bf16.vlgmr.msrb.gmra.mxu1 %vm960_vm4, %v1235_v20 }
 0x311   : > { %v1053_v21 = vpop.f32.mrf.mxu2 }
 0x312   : > { %v1054_v22 = vadd.f32 %v1053_v21, %v2781_v47 }
 0x314   : > { %v1058_v23 = vsel %vm982_vm6, %v1054_v22, -inf }
 0x315   : > { %1059 = vmax.xlane.f32.xlu1 %v1058_v23 }
 0x319   : > { %v1055_v25 = vpop.f32.mrf.mxu2 }
 0x31a   : > { %v1056_v26 = vadd.f32 %v1055_v25, %v2786_v51 }
 0x31c   : > { %v1061_v27 = vsel %vm986_vm7, %v1056_v26, -inf }
 0x31d   : > { %1062 = vmax.xlane.f32.xlu2 %v1061_v27 }
 0x383   : > { %v1251_v28 = vpop.f32.mrf.mxu1 }
 0x384   : > { %v1252_v29 = vadd.f32 %v1251_v28, %v2781_v47  ;;  %v1030_v30 = vpop.f32.mrf.mxu3 }
 0x386   : > { %v1256_v31 = vsel %vm982_vm6, %v1252_v29, -inf }
 0x387   : > { %1257 = vmax.xlane.f32.xlu1 %v1256_v31 }
 0x388   : > { %v1060_v32 = vpop.xlane.xlu1 %1059 }
 0x389   : > { %v1064_v33 = vsub.f32 %v1054_v22, %v1060_v32 }
 0x38b   : > { %v1066_v34 = vmul.f32 1.442695, %v1064_v33  ;;  %v1253_v35 = vpop.f32.mrf.mxu1  ;;  %v816_v33 = vld [vmem:[%s2689_s14 + $0x4] sm:$0xf] }
 0x38c   : > { %v1254_v36 = vadd.f32 %v1253_v35, %v2786_v51  ;;  %v1032_v38 = vpop.f32.mrf.mxu3 }
 0x38d   : > { %2416 = vpow2.f32 %v1066_v34  ;;  %v1035_v39 = vpack.c.bf16 %v1032_v38, %v1030_v30  ;;  %v1108_v34 = vsel %vm964_vm3, %v816_v33, 0 }
 0x38e   : > { %v1259_v40 = vsel %vm986_vm7, %v1254_v36, -inf  ;;  %1117 = vmatpush.bf16.msrb.mxu0 %v1108_v34 }
 0x38f   : > { %2243 = vmatmul.msk.bf16.vlgmr.msra.gmra.mxu2 %vm960_vm4, %v1035_v39  ;;  %1260 = vmax.xlane.f32.xlu2 %v1259_v40  ;;  %v951_v40 = vpack.c.bf16 %v2775_v43, %v2775_v43 }
 0x390   : > { %v1063_v45 = vpop.xlane.xlu2 %1062 }
 0x391   : > { %v1065_v46 = vsub.f32 %v1056_v26, %v1063_v45  ;;  %v1510_v43 = vsel %vm964_vm3, %v951_v40, 0 }
 0x393   : > { %v2417_v48 = vpop.eup %2416  ;;  %v1068_v49 = vmul.f32 1.442695, %v1065_v46 }
 0x394   : > { %v1070_v50 = vsel %vm982_vm6, %v2417_v48, 0.0 }
 0x395   : > { %2418 = vpow2.f32 %v1068_v49  ;;  %1071 = vadd.xlane.f32.xlu1 %v1070_v50  ;;  %v817_v49 = vld [vmem:[%s2689_s14 + $0x8] sm:$0xf] }
 0x39b   : > { %v2419_v52 = vpop.eup %2418 }
 0x39c   : > { %v1073_v53 = vsel %vm986_vm7, %v2419_v52, 0.0 }
 0x39d   : > { %1074 = vadd.xlane.f32.xlu2 %v1073_v53  ;;  %v1216_v53 = vsel %vm964_vm3, %v817_v49, 0 }
 0x39e   : > { %1225 = vmatpush.bf16.msra.mxu0 %v1216_v53 }
 0x39f   : > { %2244 = vmatmul.msk.bf16.vlgmr.msrb.gmra.mxu2 %vm960_vm4, %v1145_v16 }
 0x3fa   : > { %v1258_v54 = vpop.xlane.xlu1 %1257 }
 0x3fb   : > { %v1262_v55 = vsub.f32 %v1252_v29, %v1258_v54 }
 0x3fd   : > { %v1264_v56 = vmul.f32 1.442695, %v1262_v55 }
 0x3ff   : > { %2420 = vpow2.f32 %v1264_v56  ;;  %v818_v56 = vld [vmem:[%s2689_s14 + $0xc] sm:$0xf] }
 0x402   : > { %v1261_v61 = vpop.xlane.xlu2 %1260 }
 0x403   : > { %v1263_v0 = vsub.f32 %v1254_v36, %v1261_v61  ;;  %v819_v36 = vld [vmem:[%s2689_s14 + $0x10] sm:$0xf] }
 0x405   : > { %v2815_v57 = vpop.eup %2420  ;;  %v1266_v2 = vmul.f32 1.442695, %v1263_v0  ;;  %v950_v0 = vpack.c.bf16 %v2773_v42, %v2773_v42 }
 0x406   : > { %v1268_v58 = vsel %vm982_vm6, %v2815_v57, 0.0 }
 0x407   : > { %1269 = vadd.xlane.f32.xlu2 %v1268_v58  ;;  %2422 = vpow2.f32 %v1266_v2 }
 0x408   : > { %v1072_v10 = vpop.xlane.xlu1 %1071 }
 0x40d   : > { %v2423_v6 = vpop.eup %2422 }
 0x40e   : > { %v1271_v7 = vsel %vm986_vm7, %v2423_v6, 0.0 }
 0x410   : > { %v1075_v11 = vpop.xlane.xlu2 %1074 }
 0x412   : > { %v2819_v59 = vpop.f32.mrf.mxu2 }
 0x41a   : > { %v2821_v60 = vpop.f32.mrf.mxu2 }
 0x422   : > { %v1161_v62 = vpop.f32.mrf.mxu2 }
 0x423   : > { %v1162_v63 = vadd.f32 %v1161_v62, %v2781_v47 }
 0x425   : > { %v1166_v1 = vsel %vm982_vm6, %v1162_v63, -inf }
 0x426   : > { %1167 = vmax.xlane.f32.xlu1 %v1166_v1 }
 0x42a   : > { %v1163_v3 = vpop.f32.mrf.mxu2 }
 0x42b   : > { %v1164_v4 = vadd.f32 %v1163_v3, %v2786_v51  ;;  %v1420_v3 = vsel %vm964_vm3, %v950_v0, 0 }
 0x42d   : > { %v1169_v5 = vsel %vm986_vm7, %v1164_v4, -inf }
 0x42e   : > { %1170 = vmax.xlane.f32.xlu2 %v1169_v5  ;;  %v949_v5 = vpack.c.bf16 %v2771_v41, %v2771_v41  ;;  %v1325_v41 = vpop.permute.xlu0 %1324 }
 0x436   : > { %1272 = vadd.xlane.f32.xlu2 %v1271_v7 }
 0x43f   : > { %1081 = vrot.lane.b32.xlu1 %v2757_v24, %s2527_s24 }
 0x47a   : > { %v1270_v12 = vpop.xlane.xlu2 %1269 }
 0x499   : > { %v1168_v13 = vpop.xlane.xlu1 %1167 }
 0x49a   : > { %v1172_v14 = vsub.f32 %v1162_v63, %v1168_v13  ;;  %v1306_v63 = vsel %vm964_vm3, %v818_v56, 0 }
 0x49c   : > { %v1174_v15 = vmul.f32 1.442695, %v1172_v14 }
 0x49e   : > { %2424 = vpow2.f32 %v1174_v15 }
 0x4a1   : > { %v1171_v16 = vpop.xlane.xlu2 %1170 }
 0x4a2   : > { %v1173_v17 = vsub.f32 %v1164_v4, %v1171_v16 }
 0x4a4   : > { %v2425_v18 = vpop.eup %2424  ;;  %v1176_v19 = vmul.f32 1.442695, %v1173_v17 }
 0x4a5   : > { %v1178_v20 = vsel %vm982_vm6, %v2425_v18, 0.0 }
 0x4a6   : > { %2426 = vpow2.f32 %v1176_v19  ;;  %1179 = vadd.xlane.f32.xlu2 %v1178_v20 }
 0x4a7   : > { %2428 = vrcp.f32 %v1075_v11 }
 0x4a8   : > { %2430 = vrcp.f32 %v1072_v10  ;;  %v1330_v10 = vsel %vm964_vm3, %v949_v5, 0 }
 0x4a9   : > { %v1273_v31 = vpop.xlane.xlu2 %1272 }
 0x4aa   : > { %2432 = vrcp.f32 %v1273_v31 }
 0x4ab   : > { %2434 = vrcp.f32 %v1270_v12 }
 0x4ac   : > { %v2427_v21 = vpop.eup %2426 }
 0x4ad   : > { %v2429_v22 = vpop.eup %2428  ;;  %v1181_v23 = vsel %vm986_vm7, %v2427_v21, 0.0 }
 0x4ae   : > { %1182 = vadd.xlane.f32.xlu1 %v1181_v23  ;;  %v2431_v25 = vpop.eup %2430  ;;  %v1079_v26 = vmul.f32 %v2429_v22, %v2419_v52 }
 0x4af   : > { %v1078_v28 = vmul.f32 %v2431_v25, %v2417_v48  ;;  %v1396_v48 = vsel %vm964_vm3, %v819_v36, 0 }
 0x4b0   : > { %v2433_v35 = vpop.eup %2432 }
 0x4b1   : > { %v1082_v27 = vpop.permute.xlu1 %1081  ;;  %v1080_v30 = vpack.c.bf16 %v1079_v26, %v1078_v28  ;;  %v2435_v38 = vpop.eup %2434  ;;  %v1277_v39 = vmul.f32 %v2433_v35, %v2423_v6 }
 0x4b2   : > { %v1087_v29 = vsel %vm1017_vm5, %v1082_v27, 0  ;;  %v1276_v50 = vmul.f32 %v2435_v38, %v2815_v57 }
 0x4b3   : > { %1096 = vmatpush.bf16.msrb.mxu3 %v1087_v29 }
 0x4b4   : > { %v1278_v54 = vpack.c.bf16 %v1277_v39, %v1276_v50 }
 0x4b6   : > { %2241 = vmatmul.msk.bf16.vlgmr.msrb.gmra.mxu3 %vm982_vm6, %v1080_v30 }
 0x4be   : > { %1279 = vrot.lane.b32.xlu2 %v2757_v24, %s2528_s27 }
 0x4c6   : > { %1189 = vrot.lane.b32.xlu2 %v2757_v24, %s2529_s1  ;;  %s3081_s1 = sld [smem:[#allocation18_spill]] }
 0x4ce   : > { %1414 = vrot.lane.b32.xlu2 %v2766_v37, %s2530_s26  ;;  %s3082_s26 = scalar_lea.vmem %s3081_s1, %s2657_s28 }
 0x519   : > { %v1180_v32 = vpop.xlane.xlu2 %1179 }
 0x51a   : > { %2436 = vrcp.f32 %v1180_v32 }
 0x520   : > { %v2437_v55 = vpop.eup %2436 }
 0x521   : > { %v1280_v45 = vpop.permute.xlu2 %1279  ;;  %v1183_v46 = vpop.xlane.xlu1 %1182  ;;  %v1186_v61 = vmul.f32 %v2437_v55, %v2425_v18 }
 0x522   : > { %v1285_v52 = vsel %vm1017_vm5, %v1280_v45, 0  ;;  %2438 = vrcp.f32 %v1183_v46 }
 0x523   : > { %1294 = vmatpush.bf16.msra.mxu2 %v1285_v52 }
 0x526   : > { %2248 = vmatmul.msk.bf16.vlgmr.msra.gmra.mxu2 %vm982_vm6, %v1278_v54 }
 0x527   : > { %1405 = vmatpush.bf16.msrb.mxu2 %v1396_v48 }
 0x528   : > { %v2439_v58 = vpop.eup %2438 }
 0x529   : > { %v1187_v62 = vmul.f32 %v2439_v58, %v2427_v21  ;;  %v1190_v57 = vpop.permute.xlu2 %1189 }
 0x52a   : > { %v1195_v1 = vsel %vm1017_vm5, %v1190_v57, 0 }
 0x52b   : > { %1519 = vmatpush.bf16.msra.mxu2 %v1510_v43  ;;  %v1188_v2 = vpack.c.bf16 %v1187_v62, %v1186_v61  ;;  %1204 = vmatpush.bf16.msra.mxu3 %v1195_v1 }
 0x52e   : > { %2245 = vmatmul.msk.bf16.vlgmr.msra.gmra.mxu3 %vm982_vm6, %v1188_v2 }
 0x52f   : > { %1315 = vmatpush.bf16.msrb.mxu3 %v1306_v63 }
 0x531   : > { %v1415_v16 = vpop.permute.xlu2 %1414 }
 0x533   : > { %1429 = vmatpush.bf16.msra.mxu3 %v1420_v3 }
 0x539   : > { %v1098_v4 = vpop.f32.mrf.mxu3 }
 0x541   : > { %v1100_v6 = vpop.f32.mrf.mxu3 }
 0x542   : > { %v1103_v7 = vpack.c.bf16 %v1100_v6, %v1098_v4  ;;  %v820_v6 = vld [vmem:[%s2689_s14 + $0x14] sm:$0xf] }
 0x544   : > { %2242 = vmatmul.msk.bf16.vlgmr.msrb.gmra.mxu0 %vm960_vm4, %v1103_v7  ;;  %v1486_v7 = vsel %vm964_vm3, %v820_v6, 0 }
 0x545   : > { %1339 = vmatpush.bf16.msrb.mxu0 %v1330_v10 }
 0x5a9   : > { %v1296_v42 = vpop.f32.mrf.mxu2 }
 0x5b1   : > { %v1206_v11 = vpop.f32.mrf.mxu3  ;;  %v1298_v12 = vpop.f32.mrf.mxu2 }
 0x5b2   : > { %v1301_v13 = vpack.c.bf16 %v1298_v12, %v1296_v42 }
 0x5b4   : > { %2249 = vmatmul.msk.bf16.vlgmr.msrb.gmra.mxu3 %vm960_vm4, %v1301_v13 }
 0x5b9   : > { %v1208_v14 = vpop.f32.mrf.mxu3 }
 0x5ba   : > { %v1211_v15 = vpack.c.bf16 %v1208_v14, %v1206_v11  ;;  %v952_v14 = vpack.c.bf16 %v2777_v44, %v2777_v44 }
 0x5bc   : > { %2246 = vmatmul.msk.bf16.vlgmr.msra.gmra.mxu0 %vm960_vm4, %v1211_v15 }
 0x5c1   : > { %v1119_v17 = vpop.f32.mrf.mxu0 }
 0x5c2   : > { %v1140_v20 = vadd.f32 %v2819_v59, %v1119_v17  ;;  %v1600_v17 = vsel %vm964_vm3, %v952_v14, 0 }
 0x5c4   : > { %2253 = vmatmul.msk.bf16.vlgmr.msra.gmra.mxu3 %vm960_vm4, %v1415_v16 }
 0x5c9   : > { %v1121_v18 = vpop.f32.mrf.mxu0 }
 0x5ca   : > { %v1142_v26 = vadd.f32 %v2821_v60, %v1121_v18 }
 0x5cc   : > { %2250 = vmatmul.msk.bf16.vlgmr.msrb.gmra.mxu0 %vm960_vm4, %v1325_v41 }
 0x637   : > { %v1317_v19 = vpop.f32.mrf.mxu3 }
 0x639   : > { %v1227_v21 = vpop.f32.mrf.mxu0 }
 0x63a   : > { %v1232_v22 = vadd.f32 %v1227_v21, %v1140_v20 }
 0x63c   : > { %v2864_v23 = vadd.f32 %v1317_v19, %v1232_v22 }
 0x63f   : > { %v1319_v25 = vpop.f32.mrf.mxu3 }
 0x641   : > { %v1229_v27 = vpop.f32.mrf.mxu0 }
 0x642   : > { %v1233_v28 = vadd.f32 %v1229_v27, %v1142_v26 }
 0x644   : > { %v2867_v29 = vadd.f32 %v1319_v25, %v1233_v28 }
 0x647   : > { %v1431_v30 = vpop.f32.mrf.mxu3 }
 0x648   : > { %v1432_v31 = vadd.f32 %v1431_v30, %v2781_v47 }
 0x649   : > { %v1341_v32 = vpop.f32.mrf.mxu0 }
 0x64a   : > { %v1342_v33 = vadd.f32 %v1341_v32, %v2781_v47  ;;  %v1436_v34 = vsel %vm982_vm6, %v1432_v31, -inf }
 0x64b   : > { %1437 = vmax.xlane.f32.xlu0 %v1436_v34 }
 0x64c   : > { %v1346_v59 = vsel %vm982_vm6, %v1342_v33, -inf }
 0x64d   : > { %1347 = vmax.xlane.f32.xlu1 %v1346_v59 }
 0x64f   : > { %v1433_v35 = vpop.f32.mrf.mxu3 }
 0x650   : > { %v1434_v36 = vadd.f32 %v1433_v35, %v2786_v51 }
 0x651   : > { %v1343_v60 = vpop.f32.mrf.mxu0 }
 0x652   : > { %v1344_v38 = vadd.f32 %v1343_v60, %v2786_v51  ;;  %v1439_v40 = vsel %vm986_vm7, %v1434_v36, -inf }
 0x654   : > { %v1349_v39 = vsel %vm986_vm7, %v1344_v38, -inf }
 0x655   : > { %1350 = vmax.xlane.f32.xlu2 %v1349_v39  ;;  %1440 = vmax.xlane.f32.xlu1 %v1439_v40 }
 0x65f   : > { %1504 = vrot.lane.b32.xlu0 %v2766_v37, %s2531_s23 }
 0x66d   : > { %1369 = vrot.lane.b32.xlu2 %v2757_v24, %s2532_s2 }
 0x675   : > { %1594 = vrot.lane.b32.xlu2 %v2766_v37, %s2533_s4 }
 0x6be   : > { %v1438_v45 = vpop.xlane.xlu0 %1437 }
 0x6bf   : > { %v1442_v46 = vsub.f32 %v1432_v31, %v1438_v45 }
 0x6c0   : > { %v1348_v48 = vpop.xlane.xlu1 %1347 }
 0x6c1   : > { %v1444_v49 = vmul.f32 1.442695, %v1442_v46  ;;  %v1352_v56 = vsub.f32 %v1342_v33, %v1348_v48 }
 0x6c3   : > { %2440 = vpow2.f32 %v1444_v49  ;;  %v1354_v58 = vmul.f32 1.442695, %v1352_v56 }
 0x6c8   : > { %v1351_v50 = vpop.xlane.xlu2 %1350  ;;  %v1441_v52 = vpop.xlane.xlu1 %1440 }
 0x6c9   : > { %v2441_v53 = vpop.eup %2440  ;;  %v1443_v54 = vsub.f32 %v1434_v36, %v1441_v52  ;;  %v1353_v57 = vsub.f32 %v1344_v38, %v1351_v50 }
 0x6ca   : > { %v1448_v55 = vsel %vm982_vm6, %v2441_v53, 0.0 }
 0x6cb   : > { %v1446_v43 = vmul.f32 1.442695, %v1443_v54  ;;  %1449 = vadd.xlane.f32.xlu1 %v1448_v55  ;;  %v1356_v0 = vmul.f32 1.442695, %v1353_v57 }
 0x6cd   : > { %2442 = vpow2.f32 %v1446_v43 }
 0x6ce   : > { %2444 = vpow2.f32 %v1354_v58 }
 0x6cf   : > { %2446 = vpow2.f32 %v1356_v0 }
 0x6d0   : > { %v1370_v61 = vpop.permute.xlu2 %1369 }
 0x6d1   : > { %v1375_v62 = vsel %vm1017_vm5, %v1370_v61, 0  ;;  %v1505_v32 = vpop.permute.xlu0 %1504 }
 0x6d2   : > { %1384 = vmatpush.bf16.msra.mxu1 %v1375_v62 }
 0x6d3   : > { %v2443_v37 = vpop.eup %2442 }
 0x6d4   : > { %v1451_v63 = vsel %vm986_vm7, %v2443_v37, 0.0  ;;  %v2445_v1 = vpop.eup %2444 }
 0x6d5   : > { %1452 = vadd.xlane.f32.xlu1 %v1451_v63  ;;  %v1358_v2 = vsel %vm982_vm6, %v2445_v1, 0.0  ;;  %v2447_v3 = vpop.eup %2446 }
 0x6d6   : > { %v1361_v4 = vsel %vm986_vm7, %v2447_v3, 0.0  ;;  %1495 = vmatpush.bf16.msrb.mxu1 %v1486_v7 }
 0x6d8   : > { %v1595_v34 = vpop.permute.xlu2 %1594 }
 0x6dd   : > { %1359 = vadd.xlane.f32.xlu1 %v1358_v2 }
 0x6e5   : > { %1362 = vadd.xlane.f32.xlu1 %v1361_v4 }
 0x6fe   : > { %1459 = vrot.lane.b32.xlu1 %v2757_v24, %s2534_s6 }
 0x73e   : > { %v1450_v5 = vpop.xlane.xlu1 %1449 }
 0x748   : > { %v1453_v10 = vpop.xlane.xlu1 %1452 }
 0x750   : > { %v1360_v42 = vpop.xlane.xlu1 %1359 }
 0x751   : > { %2448 = vrcp.f32 %v1360_v42 }
 0x757   : > { %v2449_v12 = vpop.eup %2448 }
 0x758   : > { %v1363_v11 = vpop.xlane.xlu1 %1362  ;;  %v1366_v15 = vmul.f32 %v2449_v12, %v2445_v1 }
 0x759   : > { %2450 = vrcp.f32 %v1363_v11 }
 0x75a   : > { %2452 = vrcp.f32 %v1453_v10 }
 0x75b   : > { %2454 = vrcp.f32 %v1450_v5 }
 0x75f   : > { %v2451_v13 = vpop.eup %2450 }
 0x760   : > { %v1367_v16 = vmul.f32 %v2451_v13, %v2447_v3  ;;  %v2453_v18 = vpop.eup %2452 }
 0x761   : > { %v2455_v19 = vpop.eup %2454  ;;  %v1457_v20 = vmul.f32 %v2453_v18, %v2443_v37 }
 0x762   : > { %v1368_v41 = vpack.c.bf16 %v1367_v16, %v1366_v15  ;;  %v1456_v22 = vmul.f32 %v2455_v19, %v2441_v53 }
 0x764   : > { %2251 = vmatmul.msk.bf16.vlgmr.msra.gmra.mxu1 %vm982_vm6, %v1368_v41  ;;  %v1458_v26 = vpack.c.bf16 %v1457_v20, %v1456_v22 }
 0x765   : > { %1609 = vmatpush.bf16.msra.mxu1 %v1600_v17 }
 0x770   : > { %v1460_v21 = vpop.permute.xlu1 %1459 }
 0x771   : > { %v1465_v25 = vsel %vm1017_vm5, %v1460_v21, 0 }
 0x772   : > { %1474 = vmatpush.bf16.msra.mxu0 %v1465_v25 }
 0x775   : > { %2254 = vmatmul.msk.bf16.vlgmr.msra.gmra.mxu0 %vm982_vm6, %v1458_v26 }
 0x7e1   : > { %v1386_v44 = vpop.f32.mrf.mxu1 }
 0x7e9   : > { %v1388_v27 = vpop.f32.mrf.mxu1 }
 0x7ea   : > { %v1391_v28 = vpack.c.bf16 %v1388_v27, %v1386_v44 }
 0x7ec   : > { %2252 = vmatmul.msk.bf16.vlgmr.msrb.gmra.mxu2 %vm960_vm4, %v1391_v28 }
 0x7f2   : > { %v1476_v30 = vpop.f32.mrf.mxu0 }
 0x7fa   : > { %v1478_v31 = vpop.f32.mrf.mxu0 }
 0x7fb   : > { %v1481_v33 = vpack.c.bf16 %v1478_v31, %v1476_v30  ;;  %v821_v31 = vld [vmem:[%s2689_s14 + $0x18] sm:$0xf] }
 0x7fc   : > { %2256 = vmatmul.msk.bf16.vlgmr.msra.gmra.mxu2 %vm960_vm4, %v1505_v32  ;;  %v1576_v32 = vsel %vm964_vm3, %v821_v31, 0 }
 0x7fd   : > { %2255 = vmatmul.msk.bf16.vlgmr.msrb.gmra.mxu1 %vm960_vm4, %v1481_v33  ;;  %v822_v33 = vld [vmem:[%s2689_s14 + $0x1c] sm:$0xf]  ;;  %1585 = vmatpush.bf16.msrb.mxu0 %v1576_v32  ;;  %s3077_s14 = scalar_lea.vmem %s3026_s7, %s2657_s28 }
 0x80d   : > { %2259 = vmatmul.msk.bf16.vlgmr.msra.gmra.mxu1 %vm960_vm4, %v1595_v34  ;;  %v1666_v34 = vsel %vm964_vm3, %v822_v33, 0 }
 0x86f   : > { %v1407_v59 = vpop.f32.mrf.mxu2 }
 0x870   : > { %v1412_v35 = vadd.f32 %v1407_v59, %v2864_v23 }
 0x877   : > { %v1409_v36 = vpop.f32.mrf.mxu2 }
 0x878   : > { %v1413_v60 = vadd.f32 %v1409_v36, %v2867_v29 }
 0x87a   : > { %v1497_v38 = vpop.f32.mrf.mxu1 }
 0x87b   : > { %v2900_v39 = vadd.f32 %v1497_v38, %v1412_v35 }
 0x87f   : > { %v1521_v40 = vpop.f32.mrf.mxu2 }
 0x880   : > { %v1522_v45 = vadd.f32 %v1521_v40, %v2781_v47 }
 0x882   : > { %v1499_v46 = vpop.f32.mrf.mxu1  ;;  %v1526_v48 = vsel %vm982_vm6, %v1522_v45, -inf }
 0x883   : > { %v2904_v49 = vadd.f32 %v1499_v46, %v1413_v60  ;;  %1527 = vmax.xlane.f32.xlu2 %v1526_v48  ;;  %v2401_v48 = vld [vmem:[%s3077_s14] ss:$0 sm:$0xff] }
 0x887   : > { %v1523_v53 = vpop.f32.mrf.mxu2 }
 0x888   : > { %v1524_v29 = vadd.f32 %v1523_v53, %v2786_v51 }
 0x88a   : > { %v1611_v50 = vpop.f32.mrf.mxu1  ;;  %v1529_v56 = vsel %vm986_vm7, %v1524_v29, -inf }
 0x88b   : > { %v1612_v52 = vadd.f32 %v1611_v50, %v2781_v47 }
 0x88d   : > { %v1616_v23 = vsel %vm982_vm6, %v1612_v52, -inf }
 0x88e   : > { %1617 = vmax.xlane.f32.xlu0 %v1616_v23 }
 0x892   : > { %v1613_v54 = vpop.f32.mrf.mxu1 }
 0x893   : > { %v1614_v55 = vadd.f32 %v1613_v54, %v2786_v51 }
 0x895   : > { %v1619_v43 = vsel %vm986_vm7, %v1614_v55, -inf }
 0x896   : > { %1620 = vmax.xlane.f32.xlu1 %v1619_v43  ;;  %1530 = vmax.xlane.f32.xlu0 %v1529_v56 }
 0x8f6   : > { %v1528_v58 = vpop.xlane.xlu2 %1527 }
 0x8f7   : > { %v1532_v61 = vsub.f32 %v1522_v45, %v1528_v58 }
 0x8f9   : > { %v1534_v62 = vmul.f32 1.442695, %v1532_v61 }
 0x8fb   : > { %2456 = vpow2.f32 %v1534_v62  ;;  %v2537_v62 = vmov 64.0  }
 0x901   : > { %v2457_v47 = vpop.eup %2456  ;;  %v1618_v37 = vpop.xlane.xlu0 %1617 }
 0x902   : > { %v1622_v57 = vsub.f32 %v1612_v52, %v1618_v37  ;;  %v1538_v63 = vsel %vm982_vm6, %v2457_v47, 0.0 }
 0x903   : > { %1539 = vadd.xlane.f32.xlu0 %v1538_v63 }
 0x904   : > { %v1624_v0 = vmul.f32 1.442695, %v1622_v57 }
 0x906   : > { %2458 = vpow2.f32 %v1624_v0 }
 0x909   : > { %v1621_v1 = vpop.xlane.xlu1 %1620  ;;  %v1531_v51 = vpop.xlane.xlu0 %1530 }
 0x90a   : > { %v1623_v2 = vsub.f32 %v1614_v55, %v1621_v1  ;;  %v1533_v3 = vsub.f32 %v1524_v29, %v1531_v51 }
 0x90c   : > { %v2459_v4 = vpop.eup %2458  ;;  %v1626_v5 = vmul.f32 1.442695, %v1623_v2  ;;  %v1536_v6 = vmul.f32 1.442695, %v1533_v3 }
 0x90d   : > { %v1628_v7 = vsel %vm982_vm6, %v2459_v4, 0.0 }
 0x90e   : > { %2460 = vpow2.f32 %v1626_v5  ;;  %1629 = vadd.xlane.f32.xlu1 %v1628_v7 }
 0x90f   : > { %2462 = vpow2.f32 %v1536_v6 }
 0x914   : > { %v2461_v10 = vpop.eup %2460 }
 0x915   : > { %v2463_v42 = vpop.eup %2462  ;;  %v1631_v11 = vsel %vm986_vm7, %v2461_v10, 0.0 }
 0x916   : > { %1632 = vadd.xlane.f32.xlu2 %v1631_v11  ;;  %v1541_v12 = vsel %vm986_vm7, %v2463_v42, 0.0  ;;  %v2331_v11 = vld [vmem:[%s2706_s20 + $0x8] sm:$0xff] }
 0x917   : > { %1542 = vadd.xlane.f32.xlu1 %v1541_v12  ;;  %1549 = vrot.lane.b32.xlu0 %v2757_v24, %s2535_s10 }
 0x92e   : > { %1639 = vrot.lane.b32.xlu2 %v2757_v24, %s2536_s29 }
 0x976   : > { %v1540_v13 = vpop.xlane.xlu0 %1539 }
 0x981   : > { %v1630_v14 = vpop.xlane.xlu1 %1629 }
 0x982   : > { %2464 = vrcp.f32 %v1630_v14 }
 0x983   : > { %2466 = vrcp.f32 %v1540_v13 }
 0x988   : > { %v2465_v18 = vpop.eup %2464 }
 0x989   : > { %v1633_v15 = vpop.xlane.xlu2 %1632  ;;  %v1550_v16 = vpop.permute.xlu0 %1549  ;;  %v1636_v22 = vmul.f32 %v2465_v18, %v2459_v4  ;;  %v2340_v18 = vld [vmem:[%s2716_s15 + $0x30] sm:$0xff] }
 0x98a   : > { %2468 = vrcp.f32 %v1633_v15  ;;  %v1543_v41 = vpop.xlane.xlu1 %1542  ;;  %v1555_v17 = vsel %vm1017_vm5, %v1550_v16, 0  ;;  %v2467_v19 = vpop.eup %2466  ;;  %v2330_v15 = vld [vmem:[%s2706_s20] sm:$0xff]  ;;  %v2341_v16 = vld [vmem:[%s2716_s15 + $0x38] sm:$0xff] }
 0x98b   : > { %2470 = vrcp.f32 %v1543_v41  ;;  %1564 = vmatpush.bf16.msrb.mxu3 %v1555_v17  ;;  %v1546_v26 = vmul.f32 %v2467_v19, %v2457_v47  ;;  %1880 = vmatpush.bf16.msrb.mxu1 %v2341_v16 }
 0x98c   : > { %2472 = vrcp.f32 %v2537_v62 }
 0x98f   : > { %1675 = vmatpush.bf16.msra.mxu3 %v1666_v34  ;;  %1881 = vmatpush.bf16.msrb.mxu1 %v2340_v18 }
 0x990   : > { %v2469_v20 = vpop.eup %2468 }
 0x991   : > { %v2471_v21 = vpop.eup %2470  ;;  %v1637_v24 = vmul.f32 %v2469_v20, %v2461_v10  ;;  %v1640_v25 = vpop.permute.xlu2 %1639  ;;  %v2333_v10 = vld [vmem:[%s2706_s20 + $0x18] sm:$0xff] }
 0x992   : > { %v1547_v44 = vmul.f32 %v2471_v21, %v2463_v42  ;;  %v1645_v27 = vsel %vm1017_vm5, %v1640_v25, 0  ;;  %v2473_v47 = vpop.eup %2472  ;;  %1816 = vmatpush.bf16.msra.mxu0 %v2333_v10  ;;  %v2332_v42 = vld [vmem:[%s2706_s20 + $0x10] sm:$0xff] }
 0x993   : > { %v1638_v28 = vpack.c.bf16 %v1637_v24, %v1636_v22  ;;  %1654 = vmatpush.bf16.msrb.mxu2 %v1645_v27  ;;  %v1701_v37 = vmul.f32 64.0, %v2473_v47  ;;  %vm1705_vm9 = vweird.f32 %v2473_v47  ;;  %v2339_v22 = vld [vmem:[%s2716_s15 + $0x28] sm:$0xff] }
 0x994   : > { %v1548_v30 = vpack.c.bf16 %v1547_v44, %v1546_v26  ;;  %1882 = vmatpush.bf16.msrb.mxu1 %v2339_v22  ;;  %v2338_v26 = vld [vmem:[%s2716_s15 + $0x20] sm:$0xff] }
 0x995   : > { %v1702_v57 = vsub.f32 1.0, %v1701_v37  ;;  %v2405_v37 = vld [vmem:[%s768_s0] ss:$0 sm:$0xff] }
 0x996   : > { %2257 = vmatmul.msk.bf16.vlgmr.msrb.gmra.mxu3 %vm982_vm6, %v1548_v30  ;;  %2260 = vmatmul.msk.bf16.vlgmr.msrb.gmra.mxu2 %vm982_vm6, %v1638_v28 }
 0x997   : > { %1817 = vmatpush.bf16.msra.mxu0 %v2332_v42 }
 0x998   : > { %1883 = vmatpush.bf16.msrb.mxu1 %v2338_v26 }
 0x99b   : > { %1818 = vmatpush.bf16.msra.mxu0 %v2331_v11 }
 0x99f   : > { %1819 = vmatpush.bf16.msra.mxu0 %v2330_v15 }
 0xa19   : > { %v1566_v59 = vpop.f32.mrf.mxu3  ;;  %v1656_v35 = vpop.f32.mrf.mxu2 }
 0xa21   : > { %v1568_v36 = vpop.f32.mrf.mxu3  ;;  %v1658_v60 = vpop.f32.mrf.mxu2 }
 0xa22   : > { %v1571_v38 = vpack.c.bf16 %v1568_v36, %v1566_v59  ;;  %v1661_v40 = vpack.c.bf16 %v1658_v60, %v1656_v35  ;;  %v2402_v59 = vld [vmem:[%s3078_s30] ss:$0 sm:$0xff] }
 0xa24   : > { %2258 = vmatmul.msk.bf16.vlgmr.msrb.gmra.mxu0 %vm960_vm4, %v1571_v38  ;;  %2261 = vmatmul.msk.bf16.vlgmr.msra.gmra.mxu3 %vm960_vm4, %v1661_v40  ;;  %v2403_v38 = vld [vmem:[%s3080_s17] ss:$0 sm:$0xff] }
 0xaa1   : > { %v1587_v45 = vpop.f32.mrf.mxu0 }
 0xaa2   : > { %v1592_v46 = vadd.f32 %v1587_v45, %v2900_v39 }
 0xaa7   : > { %v1677_v50 = vpop.f32.mrf.mxu3 }
 0xaa8   : > { %v1682_v52 = vadd.f32 %v1677_v50, %v1592_v46 }
 0xaa9   : > { %v1589_v53 = vpop.f32.mrf.mxu0 }
 0xaaa   : > { %v1687_v23 = vadd.f32 %v2401_v48, %v1682_v52  ;;  %v1593_v54 = vadd.f32 %v1589_v53, %v2904_v49  ;;  %v2336_v53 = vld [vmem:[%s2716_s15 + $0x10] sm:$0xff] }
 0xaac   : > { %v1689_v29 = vadd.f32 %v1687_v23, %v2740_v8  ;;  %v1703_v8 = vmul.f32 %v2473_v47, %v1702_v57  ;;  %v2337_v23 = vld [vmem:[%s2716_s15 + $0x18] sm:$0xff] }
 0xaad   : > { %1884 = vmatpush.bf16.msrb.mxu1 %v2337_v23 }
 0xaae   : > { %v1693_v55 = vsel %vm852_vm2, %v1689_v29, 0.0  ;;  %v1704_v49 = vadd.f32 %v2473_v47, %v1703_v8 }
 0xaaf   : > { %v1679_v43 = vpop.f32.mrf.mxu3  ;;  %1694 = vadd.xlane.f32.xlu1 %v1693_v55 }
 0xab0   : > { %v1683_v56 = vadd.f32 %v1679_v43, %v1593_v54  ;;  %v2939_v63 = vsel %vm1705_vm9, %v2473_v47, %v1704_v49  ;;  %v2334_v54 = vld [vmem:[%s2716_s15] sm:$0xff] }
 0xab1   : > { %1885 = vmatpush.bf16.msrb.mxu1 %v2336_v53  ;;  %v2404_v43 = vld [vmem:[%s3082_s26] ss:$0 sm:$0xff] }
 0xab2   : > { %v1688_v58 = vadd.f32 %v2401_v48, %v1683_v56 }
 0xab4   : > { %v1690_v39 = vadd.f32 %v1688_v58, %v2742_v9 }
 0xab6   : > { %v1697_v61 = vsel %vm1696_vm8, %v1690_v39, 0.0 }
 0xab7   : > { %1698 = vadd.xlane.f32.xlu1 %v1697_v61 }
 0xb22   : > { %v1695_v0 = vpop.xlane.xlu1 %1694 }
 0xb23   : > { %v1707_v1 = vmul.f32 %v2939_v63, %v1695_v0 }
 0xb25   : > { %v1709_v9 = vsub.f32 %v1689_v29, %v1707_v1  ;;  %v2335_v29 = vld [vmem:[%s2716_s15 + $0x8] sm:$0xff] }
 0xb26   : > { %1886 = vmatpush.bf16.msrb.mxu1 %v2335_v29 }
 0xb27   : > { %v1711_v51 = vmul.f32 %v1709_v9, %v1709_v9 }
 0xb29   : > { %v1713_v2 = vsel %vm852_vm2, %v1711_v51, 0.0 }
 0xb2a   : > { %1714 = vadd.xlane.f32.xlu1 %v1713_v2  ;;  %v1699_v3 = vpop.xlane.xlu1 %1698  ;;  %1887 = vmatpush.bf16.msrb.mxu1 %v2334_v54 }
 0xb2b   : > { %v1708_v4 = vmul.f32 %v2939_v63, %v1699_v3 }
 0xb2d   : > { %v1710_v5 = vsub.f32 %v1690_v39, %v1708_v4 }
 0xb2f   : > { %v1712_v6 = vmul.f32 %v1710_v5, %v1710_v5 }
 0xb31   : > { %v1716_v7 = vsel %vm1696_vm8, %v1712_v6, 0.0 }
 0xb32   : > { %1717 = vadd.xlane.f32.xlu0 %v1716_v7 }
 0xb9d   : > { %v1715_v12 = vpop.xlane.xlu1 %1714 }
 0xb9e   : > { %v1719_v13 = vmul.f32 %v1715_v12, %v2939_v63 }
 0xba0   : > { %v1721_v14 = vadd.f32 1e-05, %v1719_v13 }
 0xba2   : > { %2474 = vrsqrt.f32 %v1721_v14  ;;  %vm1729_vm11 = vweird.f32 %v1721_v14 }
 0xba5   : > { %v1718_v41 = vpop.xlane.xlu0 %1717 }
 0xba6   : > { %v1720_v17 = vmul.f32 %v1718_v41, %v2939_v63 }
 0xba8   : > { %v2475_v19 = vpop.eup %2474  ;;  %v1722_v20 = vadd.f32 1e-05, %v1720_v17 }
 0xba9   : > { %v1724_v21 = vmul.f32 %v2475_v19, %v1721_v14  ;;  %vm1730_vm10 = vweird.f32 %v2475_v19 }
 0xbaa   : > { %2476 = vrsqrt.f32 %v1722_v20  ;;  %vm1731_vm12 = vmor %vm1729_vm11, %vm1730_vm10  ;;  %vm1739_vm14 = vweird.f32 %v1722_v20 }
 0xbab   : > { %v1725_v24 = vmul.f32 %v2475_v19, %v1724_v21 }
 0xbad   : > { %v1726_v25 = vmul.f32 0.5, %v1725_v24 }
 0xbaf   : > { %v1727_v44 = vsub.f32 1.5, %v1726_v25 }
 0xbb0   : > { %v2477_v27 = vpop.eup %2476 }
 0xbb1   : > { %v1728_v28 = vmul.f32 %v2475_v19, %v1727_v44  ;;  %v1734_v30 = vmul.f32 %v2477_v27, %v1722_v20  ;;  %vm1740_vm13 = vweird.f32 %v2477_v27 }
 0xbb2   : > { %vm1741_vm15 = vmor %vm1739_vm14, %vm1740_vm13 }
 0xbb3   : > { %v1735_v31 = vmul.f32 %v2477_v27, %v1734_v30  ;;  %v1732_v32 = vsel %vm1731_vm12, %v2475_v19, %v1728_v28  ;;  %v2407_v30 = vld [vmem:[%s774_s9] ss:$0 sm:$0xff] }
 0xbb4   : > { %v1743_v35 = vmul.f32 %v1732_v32, %v1709_v9 }
 0xbb5   : > { %v1736_v33 = vmul.f32 0.5, %v1735_v31 }
 0xbb6   : > { %v1748_v40 = vmul.f32 %v2402_v59, %v1743_v35 }
 0xbb7   : > { %v1737_v34 = vsub.f32 1.5, %v1736_v33 }
 0xbb8   : > { %v1753_v48 = vadd.f32 %v2403_v38, %v1748_v40 }
 0xbb9   : > { %v1738_v36 = vmul.f32 %v2477_v27, %v1737_v34 }
 0xbbb   : > { %v1742_v60 = vsel %vm1741_vm15, %v2477_v27, %v1738_v36  ;;  %v2406_v27 = vld [vmem:[%s771_s3] ss:$0 sm:$0xff]  ;;  %s3085_s3 = sld [smem:[#allocation3_spill]] }
 0xbbc   : > { %v1744_v45 = vmul.f32 %v1742_v60, %v1710_v5 }
 0xbbe   : > { %v1749_v46 = vmul.f32 %v2402_v59, %v1744_v45 }
 0xbc0   : > { %v1754_v50 = vadd.f32 %v2403_v38, %v1749_v46 }
 0xbc1   : > { %p2311_p8 = scmp.ne.s32.totalorder %s3085_s3, 1 }
 0xbc2   : > { %v1781_v52 = vpack.c.bf16 %v1754_v50, %v1753_v48 }
 0xbc4   : > { %2278 = vmatmul.msk.bf16.vlgmr.msra.gmra.mxu0 %vm852_vm2, %v1781_v52 }
 0xc41   : > { %v1821_v55 = vpop.f32.mrf.mxu0 }
 0xc42   : > { %v1822_v56 = vadd.f32 %v2404_v43, %v1821_v55 }
 0xc44   : > { %v1826_v61 = vmax.f32 %v1822_v56, 0.0 }
 0xc49   : > { %v1823_v58 = vpop.f32.mrf.mxu0 }
 0xc4a   : > { %v1824_v39 = vadd.f32 %v2404_v43, %v1823_v58 }
 0xc4c   : > { %v1827_v62 = vmax.f32 %v1824_v39, 0.0 }
 0xc4e   : > { %v1828_v47 = vpack.c.bf16 %v1827_v62, %v1826_v61 }
 0xc50   : > { %1888 = vmatmul.bf16.vlgmr.msrb.gmra.mxu1 %v1828_v47 }
 0xccd   : > { %v1889_v57 = vpop.f32.mrf.mxu1 }
 0xcce   : > { %v1890_v8 = vadd.f32 %v2405_v37, %v1889_v57 }
 0xcd0   : > { %v1894_v49 = vadd.f32 %v1890_v8, %v1753_v48 }
 0xcd2   : > { %v1898_v0 = vsel %vm852_vm2, %v1894_v49, 0.0 }
 0xcd3   : > { %1899 = vadd.xlane.f32.xlu2 %v1898_v0 }
 0xcd5   : > { %v1891_v1 = vpop.f32.mrf.mxu1 }
 0xcd6   : > { %v1892_v9 = vadd.f32 %v2405_v37, %v1891_v1 }
 0xcd8   : > { %v1895_v51 = vadd.f32 %v1892_v9, %v1754_v50 }
 0xcda   : > { %v1901_v2 = vsel %vm1696_vm8, %v1895_v51, 0.0 }
 0xcdb   : > { %1902 = vadd.xlane.f32.xlu1 %v1901_v2 }
 0xd46   : > { %v1900_v3 = vpop.xlane.xlu2 %1899 }
 0xd47   : > { %v1904_v4 = vmul.f32 %v1900_v3, %v2939_v63 }
 0xd49   : > { %v1906_v5 = vsub.f32 %v1894_v49, %v1904_v4 }
 0xd4b   : > { %v1908_v6 = vmul.f32 %v1906_v5, %v1906_v5 }
 0xd4d   : > { %v1910_v7 = vsel %vm852_vm2, %v1908_v6, 0.0 }
 0xd4e   : > { %v1903_v10 = vpop.xlane.xlu1 %1902  ;;  %1911 = vadd.xlane.f32.xlu1 %v1910_v7 }
 0xd4f   : > { %v1905_v42 = vmul.f32 %v1903_v10, %v2939_v63 }
 0xd51   : > { %v1907_v11 = vsub.f32 %v1895_v51, %v1905_v42 }
 0xd53   : > { %v1909_v12 = vmul.f32 %v1907_v11, %v1907_v11 }
 0xd55   : > { %v1913_v13 = vsel %vm1696_vm8, %v1909_v12, 0.0 }
 0xd56   : > { %1914 = vadd.xlane.f32.xlu1 %v1913_v13 }
 0xdc1   : > { %v1912_v14 = vpop.xlane.xlu1 %1911 }
 0xdc2   : > { %v1916_v15 = vmul.f32 %v1912_v14, %v2939_v63 }
 0xdc4   : > { %v1918_v16 = vadd.f32 1e-05, %v1916_v15 }
 0xdc6   : > { %2478 = vrsqrt.f32 %v1918_v16  ;;  %vm1926_vm1 = vweird.f32 %v1918_v16 }
 0xdc9   : > { %v1915_v41 = vpop.xlane.xlu1 %1914 }
 0xdca   : > { %v1917_v17 = vmul.f32 %v1915_v41, %v2939_v63 }
 0xdcc   : > { %v2479_v18 = vpop.eup %2478  ;;  %v1919_v19 = vadd.f32 1e-05, %v1917_v17 }
 0xdcd   : > { %v1921_v20 = vmul.f32 %v2479_v18, %v1918_v16  ;;  %vm1927_vm0 = vweird.f32 %v2479_v18 }
 0xdce   : > { %2480 = vrsqrt.f32 %v1919_v19  ;;  %vm1928_vm3 = vmor %vm1926_vm1, %vm1927_vm0  ;;  %vm1936_vm5 = vweird.f32 %v1919_v19 }
 0xdcf   : > { %v1922_v21 = vmul.f32 %v2479_v18, %v1921_v20 }
 0xdd1   : > { %v1923_v22 = vmul.f32 0.5, %v1922_v21 }
 0xdd3   : > { %v1924_v24 = vsub.f32 1.5, %v1923_v22 }
 0xdd4   : > { %v2481_v25 = vpop.eup %2480 }
 0xdd5   : > { %v1925_v26 = vmul.f32 %v2479_v18, %v1924_v24  ;;  %v1931_v44 = vmul.f32 %v2481_v25, %v1919_v19  ;;  %vm1937_vm4 = vweird.f32 %v2481_v25 }
 0xdd6   : > { %vm1938_vm6 = vmor %vm1936_vm5, %vm1937_vm4 }
 0xdd7   : > { %v1929_v63 = vsel %vm1928_vm3, %v2479_v18, %v1925_v26  ;;  %v1932_v28 = vmul.f32 %v2481_v25, %v1931_v44 }
 0xdd8   : > { %v1940_v31 = vmul.f32 %v1929_v63, %v1906_v5 }
 0xdd9   : > { %v1933_v32 = vmul.f32 0.5, %v1932_v28 }
 0xdda   : > { %v1945_v33 = vmul.f32 %v2406_v27, %v1940_v31 }
 0xddb   : > { %v1934_v34 = vsub.f32 1.5, %v1933_v32 }
 0xddc   : > { %v1950_v59 = vadd.f32 %v2407_v30, %v1945_v33 }
 0xddd   : > { %v1935_v35 = vmul.f32 %v2481_v25, %v1934_v34 }
 0xdde   : > { %1952 = vst.msk [vmem:[#allocation2] sm:$0xff] %vm852_vm2, %v1950_v59 }
 0xddf   : > { %v1939_v36 = vsel %vm1938_vm6, %v2481_v25, %v1935_v35 }
 0xde0   : > { %v1941_v60 = vmul.f32 %v1939_v36, %v1907_v11 }
 0xde2   : > { %v1946_v38 = vmul.f32 %v2406_v27, %v1941_v60  ;;  %1957 = sbr.rel (%p2311_p8) target bundleno = 3563 (0xdeb), region = 92 }
 0xde4   : > { %v1951_v40 = vadd.f32 %v2407_v30, %v1946_v38 }
 0xde6   : > { %1953 = vst.msk [vmem:[#allocation2 + $0x8] sm:$0xf] %vm1696_vm8, %v1951_v40 }
 0xde7   : > { %v1958_v45 = vpack.c.bf16 %v1950_v59, %v1950_v59  ;;  %v1959_v46 = vpack.c.bf16 %v1951_v40, %v1951_v40  ;;  %vm1961_vm7 = vcmask 517120  }
 0xde9   : > { %1960 = vst.msk [vmem:[%s2733_s11] sm:$0xf] %vm1696_vm8, %v1958_v45 }
 0xdea   : > { %1962 = vst.msk [vmem:[%s2733_s11 + $0x4] sm:$0x3] %vm1961_vm7, %v1959_v46 }
 0xdeb PF: > { %s3086_s9 = sld [smem:[#allocation6_spill]] }
 0xdec   : > { %s3087_s21 = sld [smem:[#allocation4_spill]] }
 0xded   : > { %s3088_s22 = sld [smem:[#allocation5_spill]] }
 0xdee   : > { %s3089_s23 = sld [smem:[#allocation7_spill]] }
 0xdef   : > { %s3090_s24 = sld [smem:[#allocation8_spill]] }
 0xdf1   : > { %s26_s25 = sadd.s32 1, %s3086_s9  }
 0xdf2   : > { %p23_p9 = scmp.ge.s32.totalorder %s26_s25, 6  }
 0xdf4   :  { %25 = sbr.rel (!%p23_p9) target bundleno = 13 (0xd), region = 167 }

// kernel: forward.3
= control target key start
LH: loop header
LB: loop body
LE: loop exit
PB: predicated region body
PF: predicated region fallthrough
CT: control target
= control target key end

     0   :  { %s4470_s30 = smov 0   ;;  %s5195_s0 = inlined_call_operand.vmem [shape: bf16[2,10,64], index: 0, kind: input, shape index: {}]   ;;  %s5196_s1 = inlined_call_operand.vmem [shape: bf16[2,12,64], index: 1, kind: input, shape index: {}]   ;;  %s5197_s2 = inlined_call_operand.vmem [shape: f32[2,10,10], index: 2, kind: input, shape index: {}]   ;;  %s5198_s3 = inlined_call_operand.vmem [shape: f32[2,1,12], index: 3, kind: input, shape index: {}]   ;;  %s5199_s4 = inlined_call_operand.vmem [shape: bf16[2,64,64], index: 4, kind: input, shape index: {}]   ;;  %s5200_s5 = inlined_call_operand.vmem [shape: f32[2,1,64], index: 5, kind: input, shape index: {}]   ;;  %s5201_s6 = inlined_call_operand.vmem [shape: bf16[2,64,128], index: 6, kind: input, shape index: {}]   ;;  %s5202_s7 = inlined_call_operand.vmem [shape: f32[2,1,128], index: 7, kind: input, shape index: {}]   ;;  %s5203_s8 = inlined_call_operand.vmem [shape: bf16[2,64,64], index: 8, kind: input, shape index: {}]   ;;  %s5204_s9 = inlined_call_operand.vmem [shape: f32[2,1,64], index: 9, kind: input, shape index: {}]   ;;  %s5205_s10 = inlined_call_operand.vmem [shape: f32[2,1,64], index: 10, kind: input, shape index: {}]   ;;  %s5206_s11 = inlined_call_operand.vmem [shape: f32[2,1,64], index: 11, kind: input, shape index: {}]   ;;  %s5207_s12 = inlined_call_operand.vmem [shape: bf16[2,64,64], index: 12, kind: input, shape index: {}]   ;;  %s5208_s13 = inlined_call_operand.vmem [shape: f32[2,1,64], index: 13, kind: input, shape index: {}]   ;;  %s5209_s14 = inlined_call_operand.vmem [shape: bf16[2,64,128], index: 14, kind: input, shape index: {}]   ;;  %s5210_s15 = inlined_call_operand.vmem [shape: f32[2,1,128], index: 15, kind: input, shape index: {}]   ;;  %s5211_s16 = inlined_call_operand.vmem [shape: bf16[2,64,64], index: 16, kind: input, shape index: {}]   ;;  %s5212_s17 = inlined_call_operand.vmem [shape: f32[2,1,64], index: 17, kind: input, shape index: {}]   ;;  %s5213_s18 = inlined_call_operand.vmem [shape: f32[2,1,64], index: 18, kind: input, shape index: {}]   ;;  %s5214_s19 = inlined_call_operand.vmem [shape: f32[2,1,64], index: 19, kind: input, shape index: {}]   ;;  %s5215_s20 = inlined_call_operand.vmem [shape: bf16[2,64,128], index: 20, kind: input, shape index: {}]   ;;  %s5216_s21 = inlined_call_operand.vmem [shape: f32[2,1,128], index: 21, kind: input, shape index: {}]   ;;  %s5217_s22 = inlined_call_operand.vmem [shape: bf16[2,128,64], index: 22, kind: input, shape index: {}]   ;;  %s5218_s23 = inlined_call_operand.vmem [shape: f32[2,1,64], index: 23, kind: input, shape index: {}]   ;;  %s5219_s24 = inlined_call_operand.vmem [shape: f32[2,1,64], index: 24, kind: input, shape index: {}]   ;;  %s5220_s25 = inlined_call_operand.vmem [shape: f32[2,1,64], index: 25, kind: input, shape index: {}]   ;;  %s5221_s26 = inlined_call_operand.vmem [shape: bf16[64,128], index: 26, kind: input, shape index: {}]   ;;  %s5222_s27 = inlined_call_operand.vmem [shape: f32[1,128], index: 27, kind: input, shape index: {}]   ;;  %s5223_s28 = inlined_call_operand.vmem [shape: f32[2,10,128], index: 28, kind: output, shape index: {}]  }
   0x1   :  { %5237 = sst [smem:[#allocation15_spill]] %s5195_s0 }
   0x2   :  { %5238 = sst [smem:[#allocation16_spill]] %s5196_s1 }
   0x3   :  { %5239 = sst [smem:[#allocation17_spill]] %s5197_s2 }
   0x4   :  { %5240 = sst [smem:[#allocation18_spill]] %s5198_s3  ;;  %s4472_s3 = smov 0  }
   0x5   :  { %5241 = sst [smem:[#allocation19_spill]] %s5199_s4 }
   0x6   :  { %5242 = sst [smem:[#allocation20_spill]] %s5200_s5  ;;  %s4466_s5 = smov 0  }
   0x7   :  { %5243 = sst [smem:[#allocation21_spill]] %s5201_s6 }
   0x8   :  { %5244 = sst [smem:[#allocation22_spill]] %s5202_s7 }
   0x9   :  { %5245 = sst [smem:[#allocation23_spill]] %s5203_s8  ;;  %s4464_s8 = smov 0  }
   0xa   :  { %5246 = sst [smem:[#allocation24_spill]] %s5204_s9  ;;  %s4468_s9 = smov 0  }
   0xb   :  { %5247 = sst [smem:[#allocation25_spill]] %s5205_s10 }
   0xc   :  { %5248 = sst [smem:[#allocation26_spill]] %s5206_s11 }
   0xd   :  { %5249 = sst [smem:[#allocation27_spill]] %s5207_s12 }
   0xe   :  { %5250 = sst [smem:[#allocation28_spill]] %s5209_s14 }
   0xf   :  { %5251 = sst [smem:[#allocation29_spill]] %s5211_s16 }
  0x10   :  { %5252 = sst [smem:[#allocation30_spill]] %s5213_s18 }
  0x11   :  { %5253 = sst [smem:[#allocation31_spill]] %s5214_s19 }
  0x12   :  { %5254 = sst [smem:[#allocation32_spill]] %s5215_s20 }
  0x13   :  { %5255 = sst [smem:[#allocation33_spill]] %s5216_s21 }
  0x14   :  { %5256 = sst [smem:[#allocation34_spill]] %s5218_s23 }
  0x15   :  { %5257 = sst [smem:[#allocation35_spill]] %s5219_s24 }
  0x16   :  { %5258 = sst [smem:[#allocation36_spill]] %s5220_s25 }
  0x17   :  { %5259 = sst [smem:[#allocation37_spill]] %s5221_s26 }
  0x18   :  { %5260 = sst [smem:[#allocation38_spill]] %s5222_s27 }
  0x19   :  { %5261 = sst [smem:[#allocation39_spill]] %s5223_s28 }
  0x1a LB: > { %5262 = sst [smem:[#allocation3_spill]] %s4285_s8  ;;  %s47_s6 = sadd.s32 1, %s4293_s9  ;;  %s4301_s3 = sphi %s4472_s3, %s38_s3   ;;  %s4297_s30 = sphi %s4470_s30, %s5341_s30   ;;  %s4293_s9 = sphi %s4468_s9, %s5340_s9   ;;  %s4289_s5 = sphi %s4466_s5, %s5339_s5   ;;  %s4285_s8 = sphi %s4464_s8, %s5338_s8  }
  0x1b   : > { %5263 = sst [smem:[#allocation4_spill]] %s4293_s9  ;;  %s50_s10 = sadd.s32 1, %s4297_s30 }
  0x1c   : > { %5264 = sst [smem:[#allocation5_spill]] %s4297_s30  ;;  %p48_p0 = scmp.ge.s32.totalorder %s47_s6, 2 }
  0x1d   : > { %5265 = sst [smem:[#allocation6_spill]] %s4301_s3  ;;  %p3788_p1 = scmp.ge.s32.totalorder %s4301_s3, 1 }
  0x1e   : > { %p994_p2 = scmp.lt.s32.totalorder %s4301_s3, 5  ;;  %s5343_s6 = smov (%p48_p0, %s47_s6), 0 }
  0x1f   : > { %5266 = sst [smem:[#allocation7_spill]] %s5343_s6  ;;  %s5345_s10 = smov (!%p48_p0, %s50_s10), %s4297_s30 }
  0x20   : > { %p995_p3 = pnand %p3788_p1, %p994_p2  ;;  %p52_p4 = scmp.ge.s32.totalorder %s5345_s10, 2 }
  0x22   : > { %s5347_s10 = smov (%p52_p4, %s5345_s10), 0  ;;  %998 = sbr.rel (%p995_p3) target bundleno = 6637 (0x19ed), region = 132 }
  0x23   : > { %5267 = sst [smem:[#allocation8_spill]] %s5347_s10 }
  0x27   : > { %p1163_p5 = scmp.lt.s32.totalorder %s4289_s5, 1  ;;  %p1181_p6 = scmp.lt.s32.totalorder %s4285_s8, 1 }
  0x28   : > { %s5268_s12 = sld [smem:[#allocation15_spill]] }
  0x29   : > { %s5349_s5 = smov (!%p1163_p5, %s4289_s5), 1  ;;  %s5270_s6 = sld [smem:[#allocation16_spill]] }
  0x2a   : > { %s4500_s0 = scalar_select %p1181_p6, %s4285_s8, 1 }
  0x2b   : > { %s4003_s11 = sshll.u32 %s5349_s5, 3  ;;  %s5231_s29 = sshll.u32 %s5349_s5, 4 }
  0x2c   : > { %s5272_s27 = sld [smem:[#allocation17_spill]]  ;;  %s4006_s2 = sshll.u32 %s4500_s0, 5 }
  0x2d   : > { %s5276_s4 = sld [smem:[#allocation19_spill]] }
  0x2e   : > { %s4507_s1 = scalar_lea.vmem %s5268_s12, %s4003_s11  ;;  %s5278_s3 = sld [smem:[#allocation21_spill]] }
  0x2f   : > { %5269 = sst [smem:[#allocation9_spill]] %s4507_s1  ;;  %s4512_s30 = scalar_lea.vmem %s5270_s6, %s4003_s11 }
  0x30   : > { %5271 = sst [smem:[#allocation10_spill]] %s4512_s30 }
  0x31   : > { %s5281_s12 = sld [smem:[#allocation23_spill]] }
  0x32   : > { %s4519_s26 = scalar_lea.vmem %s5272_s27, %s5231_s29  ;;  %s5286_s14 = sld [smem:[#allocation28_spill]] }
  0x33   : > { %5273 = sst [smem:[#allocation11_spill]] %s4519_s26  ;;  %s4533_s30 = scalar_lea.vmem %s5276_s4, %s4006_s2 }
  0x34   : > { %5277 = sst [smem:[#allocation12_spill]] %s4533_s30  ;;  %s4538_s29 = scalar_lea.vmem %s5278_s3, %s4006_s2 }
  0x35   : > { %5279 = sst [smem:[#allocation13_spill]] %s4538_s29  ;;  %s5296_s29 = sshll.u32 %s5349_s5, 4 }
  0x36   : > { %s5285_s26 = sld [smem:[#allocation27_spill]] }
  0x37   : > { %s4547_s1 = scalar_lea.vmem %s5281_s12, %s4006_s2  ;;  %s5287_s16 = sld [smem:[#allocation29_spill]] }
  0x38   : > { %s4573_s30 = scalar_lea.vmem %s5286_s14, %s4006_s2  ;;  %s5290_s20 = sld [smem:[#allocation32_spill]] }
  0x39   : > { %s5297_s21 = sld [smem:[#allocation39_spill]] }
  0x3c   : > { %s4564_s7 = scalar_lea.vmem %s5285_s26, %s4006_s2 }
  0x3d   : > { %s4582_s24 = scalar_lea.vmem %s5287_s16, %s4006_s2  ;;  %s4013_s16 = sshll.u32 %s4500_s0, 6 }
  0x3e   : > { %s4599_s27 = scalar_lea.vmem %s5290_s20, %s4006_s2  ;;  %s4609_s25 = scalar_lea.vmem %s5217_s22, %s4013_s16 }
  0x3f   : > { %5291 = sst [smem:[#allocation14_spill]] %s4599_s27  ;;  %s4628_s27 = scalar_lea.vmem %s5297_s21, %s5296_s29 }
  0x40   : > { %s5298_s16 = sld [smem:[#allocation3_spill]] }
  0x46   : > { %p3813_p7 = scmp.ne.s32.totalorder %s5298_s16, 0 }
  0x47   : > { %s5299_s8 = sld [smem:[#allocation9_spill]] (!%p3813_p7) }
  0x48   : > { %1272 = sbr.rel (%p3813_p7) target bundleno = 82 (0x52), region = 136 }
  0x4d   : > { %v1273_v0 = vld [vmem:[%s5299_s8] sm:$0xf]  ;;  %vm1277_vm0 = vcmask 523264   ;;  %v1274_v1 = vld [vmem:[%s5299_s8 + $0x4] sm:$0x1]  ;;  %vm1279_vm1 = vcmask 517120  }
  0x4e   : > { %v1275_v2 = vunpack.c.l.bf16 %v1273_v0  ;;  %v1276_v3 = vunpack.c.l.bf16 %v1274_v1 }
  0x50   : > { %1278 = vst.msk [vmem:[#allocation2] sm:$0xff] %vm1277_vm0, %v1275_v2 }
  0x51   : > { %1280 = vst.msk [vmem:[#allocation2 + $0x8] sm:$0x3] %vm1279_vm1, %v1276_v3 }
  0x52 PF: > { %s5300_s19 = sld [smem:[#allocation13_spill]]  ;;  %vm1342_vm2 = vcmask 523264   ;;  %vm1454_vm3 = vcmask 1043456   ;;  %s4303_s2 = smov 64   ;;  %vm1450_vm4 = vcmask 64512   ;;  %vm1507_vm5 = vcmask 1044480  }
  0x53   : > { %s5301_s20 = sld [smem:[#allocation12_spill]]  ;;  %s4304_s29 = smov 96   ;;  %vm1472_vm6 = vcmask 80896   ;;  %vm1476_vm7 = vcmask 74752   ;;  %vm2186_vm8 = vcmask 517120   ;;  %vm2439_vm0 = vcmask 97280  }
  0x54   : > { %s5302_s6 = sld [smem:[#allocation22_spill]]  ;;  %s4305_s28 = smov 120   ;;  %vm2443_vm1 = vcmask 91136  }
  0x55   : > { %s5304_s10 = sld [smem:[#allocation20_spill]]  ;;  %s4306_s16 = smov 112  }
  0x56   : > { %s5306_s9 = sld [smem:[#allocation11_spill]]  ;;  %s4307_s8 = smov 104  }
  0x57   : > { %v4637_v8 = vld [vmem:[#allocation2] sm:$0xff]  ;;  %s4310_s21 = smov 48   ;;  %s4311_s3 = smov 88  }
  0x58   : > { %v4023_v4 = vld [vmem:[%s5300_s19 + $0x18] sm:$0xff]  ;;  %v4022_v5 = vld [vmem:[%s5300_s19 + $0x10] sm:$0xff]  ;;  %v4021_v6 = vld [vmem:[%s5300_s19 + $0x8] sm:$0xff]  ;;  %s4314_s26 = smov 72   ;;  %s4315_s12 = smov 24  }
  0x59   : > { %1391 = vmatpush.bf16.msra.mxu1 %v4023_v4  ;;  %v4020_v7 = vld [vmem:[%s5300_s19] sm:$0xff]  ;;  %v4639_v9 = vld [vmem:[#allocation2 + $0x8] sm:$0x3]  ;;  %v4019_v11 = vld [vmem:[%s5301_s20 + $0x18] sm:$0xff]  ;;  %s4308_s19 = smov 56   ;;  %s5307_s18 = sld [smem:[#allocation24_spill]] }
  0x5a   : > { %v1314_v10 = vpack.c.bf16 %v4639_v9, %v4637_v8  ;;  %1350 = vmatpush.bf16.msra.mxu0 %v4019_v11  ;;  %v4018_v12 = vld [vmem:[%s5301_s20 + $0x10] sm:$0xff]  ;;  %v4017_v13 = vld [vmem:[%s5301_s20 + $0x8] sm:$0xff]  ;;  %v4016_v14 = vld [vmem:[%s5301_s20] sm:$0xff]  ;;  %s5303_s23 = scalar_lea.vmem %s5302_s6, %s4500_s0  ;;  %s4309_s20 = smov 40  }
  0x5b   : > { %v4105_v15 = vld [vmem:[%s5303_s23] ss:$0 sm:$0xff]  ;;  %s5305_s11 = scalar_lea.vmem %s5304_s10, %s4500_s0  ;;  %s4312_s6 = smov 80  }
  0x5c   : > { %v4106_v26 = vld [vmem:[%s5305_s11] ss:$0 sm:$0xff]  ;;  %v4685_v51 = vld [vmem:[%s5306_s9 + $0x8] sm:$0x3]  ;;  %s4313_s23 = smov 32   ;;  %s4316_s10 = smov 16  }
  0x5d   : > { %1392 = vmatpush.bf16.msra.mxu1 %v4022_v5  ;;  %v4680_v47 = vld [vmem:[%s5306_s9] sm:$0xff]  ;;  %s5236_s11 = smov 8   ;;  %s5309_s4 = sld [smem:[#allocation10_spill]] }
  0x5e   : > { %1351 = vmatpush.bf16.msra.mxu0 %v4018_v12 }
  0x5f   : > { %s5308_s14 = scalar_lea.vmem %s5307_s18, %s4500_s0 }
  0x61   : > { %1393 = vmatpush.bf16.msra.mxu1 %v4021_v6 }
  0x62   : > { %1352 = vmatpush.bf16.msra.mxu0 %v4017_v13 }
  0x65   : > { %1394 = vmatpush.bf16.msra.mxu1 %v4020_v7  ;;  %v1305_v7 = vld [vmem:[%s4547_s1] sm:$0xf] }
  0x66   : > { %1353 = vmatpush.bf16.msra.mxu0 %v4016_v14 }
  0x68   : > { %3847 = vmatmul.msk.bf16.vlgmr.msra.gmra.mxu1 %vm1342_vm2, %v1314_v10 }
  0x69   : > { %3830 = vmatmul.msk.bf16.vlgmr.msra.gmra.mxu0 %vm1342_vm2, %v1314_v10  ;;  %v1618_v10 = vsel %vm1454_vm3, %v1305_v7, 0 }
  0x6a   : > { %1627 = vmatpush.bf16.msrb.mxu1 %v1618_v10 }
  0xe5   : > { %v1396_v16 = vpop.f32.mrf.mxu1 }
  0xe6   : > { %v1397_v17 = vadd.f32 %v4105_v15, %v1396_v16  ;;  %v1355_v25 = vpop.f32.mrf.mxu0 }
  0xe7   : > { %v1356_v28 = vadd.f32 %v4106_v26, %v1355_v25 }
  0xe8   : > { %1403 = vxpose.xlu0.b32.start [1/2] (short) (narrow) %v1397_v17, 64  ;;  %v1443_v19 = vpack.c.bf16 %v1397_v17, %v1397_v17 }
  0xe9   : > { %v1401_v30 = vpack.c.bf16 %v1356_v28, %v1356_v28 }
  0xea   : > { %v1499_v22 = vunpack.c.l.b16 %v1443_v19 }
  0xeb   : > { %v1447_v33 = vunpack.c.l.b16 %v1401_v30 }
  0xed   : > { %v1398_v18 = vpop.f32.mrf.mxu1 }
  0xee   : > { %v1399_v20 = vadd.f32 %v4105_v15, %v1398_v18  ;;  %v1357_v27 = vpop.f32.mrf.mxu0 }
  0xef   : > { %v1358_v29 = vadd.f32 %v4106_v26, %v1357_v27 }
  0xf0   : > { %v1444_v21 = vpack.c.bf16 %v1399_v20, %v1399_v20  ;;  %1404 = vxpose.xlu0.b32.end [2/2] (short) (narrow) %v1399_v20, 64 }
  0xf1   : > { %v1402_v31 = vpack.c.bf16 %v1358_v29, %v1358_v29 }
  0xf2   : > { %v1500_v23 = vunpack.c.l.b16 %v1444_v21 }
  0xf3   : > { %v1448_v34 = vunpack.c.l.b16 %v1402_v31 }
  0xf4   : > { %v4654_v24 = vpack.c.b16 %v1500_v23, %v1499_v22 }
  0xf5   : > { %v4664_v37 = vpack.c.b16 %v1448_v34, %v1447_v33 }
 0x18c   : > { %v1419_v32 = vpop.trf.xlu0 }
 0x18d   : > { %v1435_v35 = vpack.c.bf16 %v1419_v32, %v1419_v32 }
 0x18e   : > { %1502 = vrot.lane.b32.xlu0 %v4654_v24, %s4303_s2 }
 0x18f   : > { %v1456_v36 = vsel %vm1454_vm3, %v1435_v35, 0 }
 0x190   : > { %1465 = vmatpush.bf16.msra.mxu2 %v1456_v36 }
 0x193   : > { %3848 = vmatmul.msk.bf16.vlgmr.msra.gmra.mxu2 %vm1450_vm4, %v4664_v37 }
 0x194   : > { %v1420_v38 = vpop.trf.xlu0 }
 0x195   : > { %v1436_v56 = vpack.c.bf16 %v1420_v38, %v1420_v38 }
 0x196   : > { %1814 = vrot.lane.b32.xlu0 %v4664_v37, %s4304_s29 }
 0x197   : > { %v1532_v58 = vsel %vm1454_vm3, %v1436_v56, 0 }
 0x198   : > { %1541 = vmatpush.bf16.msrb.mxu2 %v1532_v58 }
 0x19c   : > { %v1421_v39 = vpop.trf.xlu0 }
 0x19d   : > { %v1437_v55 = vpack.c.bf16 %v1421_v39, %v1421_v39 }
 0x19f   : > { %v1640_v57 = vsel %vm1454_vm3, %v1437_v55, 0 }
 0x1a0   : > { %1649 = vmatpush.bf16.msra.mxu2 %v1640_v57 }
 0x1a4   : > { %v1422_v40 = vpop.trf.xlu0 }
 0x1a5   : > { %v1438_v3 = vpack.c.bf16 %v1422_v40, %v1422_v40 }
 0x1a7   : > { %v1730_v6 = vsel %vm1454_vm3, %v1438_v3, 0 }
 0x1a8   : > { %1739 = vmatpush.bf16.msra.mxu1 %v1730_v6 }
 0x1ac   : > { %v4670_v41 = vpop.trf.xlu0 }
 0x1b4   : > { %v4672_v42 = vpop.trf.xlu0 }
 0x1bc   : > { %v4674_v43 = vpop.trf.xlu0 }
 0x1c4   : > { %v4676_v44 = vpop.trf.xlu0 }
 0x200   : > { %v1503_v45 = vpop.permute.xlu0 %1502 }
 0x201   : > { %v1509_v46 = vsel %vm1507_vm5, %v1503_v45, 0 }
 0x202   : > { %1518 = vmatpush.bf16.msrb.mxu0 %v1509_v46 }
 0x216   : > { %v1467_v48 = vpop.f32.mrf.mxu2 }
 0x217   : > { %v1468_v49 = vadd.f32 %v1467_v48, %v4680_v47 }
 0x219   : > { %v1473_v50 = vsel %vm1472_vm6, %v1468_v49, -inf }
 0x21a   : > { %1474 = vmax.xlane.f32.xlu1 %v1473_v50 }
 0x21e   : > { %v1469_v52 = vpop.f32.mrf.mxu2 }
 0x21f   : > { %v1470_v53 = vadd.f32 %v1469_v52, %v4685_v51 }
 0x221   : > { %v1477_v54 = vsel %vm1476_vm7, %v1470_v53, -inf }
 0x222   : > { %1478 = vmax.xlane.f32.xlu1 %v1477_v54 }
 0x23b   : > { %1526 = vrot.lane.b32.xlu1 %v4664_v37, %s4305_s28 }
 0x28d   : > { %v1475_v59 = vpop.xlane.xlu1 %1474 }
 0x28e   : > { %v1480_v60 = vsub.f32 %v1468_v49, %v1475_v59 }
 0x290   : > { %v1482_v61 = vmul.f32 1.442695, %v1480_v60 }
 0x292   : > { %4120 = vpow2.f32 %v1482_v61 }
 0x295   : > { %v1479_v62 = vpop.xlane.xlu1 %1478 }
 0x296   : > { %v1481_v63 = vsub.f32 %v1470_v53, %v1479_v62 }
 0x298   : > { %v4121_v0 = vpop.eup %4120  ;;  %v1484_v1 = vmul.f32 1.442695, %v1481_v63 }
 0x299   : > { %v1486_v2 = vsel %vm1472_vm6, %v4121_v0, 0.0 }
 0x29a   : > { %4122 = vpow2.f32 %v1484_v1  ;;  %1487 = vadd.xlane.f32.xlu2 %v1486_v2 }
 0x2a0   : > { %v4123_v4 = vpop.eup %4122 }
 0x2a1   : > { %v1489_v5 = vsel %vm1476_vm7, %v4123_v4, 0.0 }
 0x2a2   : > { %1490 = vadd.xlane.f32.xlu2 %v1489_v5 }
 0x2ad   : > { %v1527_v11 = vpop.permute.xlu1 %1526 }
 0x2ae   : > { %3850 = vmatmul.msk.bf16.vlgmr.msrb.gmra.mxu2 %vm1450_vm4, %v1527_v11 }
 0x2ba   : > { %1634 = vrot.lane.b32.xlu2 %v4664_v37, %s4306_s16 }
 0x2c2   : > { %1724 = vrot.lane.b32.xlu2 %v4664_v37, %s4307_s8 }
 0x30d   : > { %v1488_v12 = vpop.xlane.xlu2 %1487 }
 0x30e   : > { %4124 = vrcp.f32 %v1488_v12 }
 0x314   : > { %v4125_v14 = vpop.eup %4124 }
 0x315   : > { %v1491_v13 = vpop.xlane.xlu2 %1490  ;;  %v1494_v16 = vmul.f32 %v4125_v14, %v4121_v0 }
 0x316   : > { %4126 = vrcp.f32 %v1491_v13 }
 0x31c   : > { %v4127_v15 = vpop.eup %4126 }
 0x31d   : > { %v1495_v17 = vmul.f32 %v4127_v15, %v4123_v4  ;;  %v1635_v18 = vpop.permute.xlu2 %1634 }
 0x31e   : > { %3854 = vmatmul.msk.bf16.vlgmr.msra.gmra.mxu2 %vm1450_vm4, %v1635_v18 }
 0x31f   : > { %v1496_v19 = vpack.c.bf16 %v1495_v17, %v1494_v16 }
 0x321   : > { %3849 = vmatmul.msk.bf16.vlgmr.msrb.gmra.mxu0 %vm1472_vm6, %v1496_v19 }
 0x325   : > { %v1725_v33 = vpop.permute.xlu2 %1724 }
 0x331   : > { %v1543_v20 = vpop.f32.mrf.mxu2 }
 0x332   : > { %v1544_v21 = vadd.f32 %v1543_v20, %v4680_v47 }
 0x334   : > { %v1548_v22 = vsel %vm1472_vm6, %v1544_v21, -inf }
 0x335   : > { %1549 = vmax.xlane.f32.xlu1 %v1548_v22 }
 0x339   : > { %v1545_v23 = vpop.f32.mrf.mxu2 }
 0x33a   : > { %v1546_v25 = vadd.f32 %v1545_v23, %v4685_v51 }
 0x33c   : > { %v1551_v26 = vsel %vm1476_vm7, %v1546_v25, -inf }
 0x33d   : > { %1552 = vmax.xlane.f32.xlu2 %v1551_v26 }
 0x39e   : > { %v1520_v27 = vpop.f32.mrf.mxu0 }
 0x3a1   : > { %v1651_v28 = vpop.f32.mrf.mxu2 }
 0x3a2   : > { %v1652_v29 = vadd.f32 %v1651_v28, %v4680_v47 }
 0x3a4   : > { %v1656_v30 = vsel %vm1472_vm6, %v1652_v29, -inf }
 0x3a5   : > { %1657 = vmax.xlane.f32.xlu1 %v1656_v30 }
 0x3a6   : > { %v1522_v31 = vpop.f32.mrf.mxu0 }
 0x3a7   : > { %v1525_v32 = vpack.c.bf16 %v1522_v31, %v1520_v27 }
 0x3a8   : > { %v1550_v34 = vpop.xlane.xlu1 %1549 }
 0x3a9   : > { %v1554_v35 = vsub.f32 %v1544_v21, %v1550_v34  ;;  %3853 = vmatmul.msk.bf16.vlgmr.msrb.gmra.mxu1 %vm1450_vm4, %v1525_v32  ;;  %v1653_v36 = vpop.f32.mrf.mxu2 }
 0x3aa   : > { %v1654_v38 = vadd.f32 %v1653_v36, %v4685_v51  ;;  %v1306_v36 = vld [vmem:[%s4547_s1 + $0x4] sm:$0xf] }
 0x3ab   : > { %v1556_v39 = vmul.f32 1.442695, %v1554_v35 }
 0x3ac   : > { %v1659_v40 = vsel %vm1476_vm7, %v1654_v38, -inf }
 0x3ad   : > { %4128 = vpow2.f32 %v1556_v39  ;;  %1660 = vmax.xlane.f32.xlu2 %v1659_v40 }
 0x3b0   : > { %v1553_v45 = vpop.xlane.xlu2 %1552 }
 0x3b1   : > { %v1555_v46 = vsub.f32 %v1546_v25, %v1553_v45  ;;  %v1307_v45 = vld [vmem:[%s4547_s1 + $0x8] sm:$0xf] }
 0x3b3   : > { %v4714_v48 = vpop.eup %4128  ;;  %v1558_v49 = vmul.f32 1.442695, %v1555_v46  ;;  %v1706_v46 = vsel %vm1454_vm3, %v1307_v45, 0 }
 0x3b4   : > { %v1560_v50 = vsel %vm1472_vm6, %v4714_v48, 0.0 }
 0x3b5   : > { %4130 = vpow2.f32 %v1558_v49  ;;  %1561 = vadd.xlane.f32.xlu1 %v1560_v50  ;;  %v1308_v50 = vld [vmem:[%s4547_s1 + $0xc] sm:$0xf] }
 0x3b9   : > { %3857 = vmatmul.msk.bf16.vlgmr.msra.gmra.mxu1 %vm1450_vm4, %v1725_v33  ;;  %v1309_v33 = vld [vmem:[%s4547_s1 + $0x10] sm:$0xf] }
 0x3ba   : > { %v1886_v34 = vsel %vm1454_vm3, %v1309_v33, 0 }
 0x3bb   : > { %v4131_v52 = vpop.eup %4130 }
 0x3bc   : > { %v1563_v53 = vsel %vm1476_vm7, %v4131_v52, 0.0 }
 0x3bd   : > { %1564 = vadd.xlane.f32.xlu2 %v1563_v53 }
 0x418   : > { %v1658_v54 = vpop.xlane.xlu1 %1657 }
 0x419   : > { %v1662_v55 = vsub.f32 %v1652_v29, %v1658_v54 }
 0x41b   : > { %v1664_v56 = vmul.f32 1.442695, %v1662_v55  ;;  %v1441_v55 = vpack.c.bf16 %v4674_v43, %v4674_v43 }
 0x41d   : > { %4132 = vpow2.f32 %v1664_v56 }
 0x420   : > { %v1661_v3 = vpop.xlane.xlu2 %1660 }
 0x421   : > { %v1663_v4 = vsub.f32 %v1654_v38, %v1661_v3  ;;  %v1598_v38 = vsel %vm1454_vm3, %v1306_v36, 0 }
 0x422   : > { %1607 = vmatpush.bf16.msra.mxu0 %v1598_v38 }
 0x423   : > { %v4720_v57 = vpop.eup %4132  ;;  %v1666_v5 = vmul.f32 1.442695, %v1663_v4  ;;  %v2000_v4 = vsel %vm1454_vm3, %v1441_v55, 0 }
 0x424   : > { %v1668_v58 = vsel %vm1472_vm6, %v4720_v57, 0.0 }
 0x425   : > { %1669 = vadd.xlane.f32.xlu2 %v1668_v58  ;;  %4134 = vpow2.f32 %v1666_v5 }
 0x426   : > { %v4724_v59 = vpop.f32.mrf.mxu1  ;;  %1715 = vmatpush.bf16.msrb.mxu0 %v1706_v46 }
 0x428   : > { %v1562_v10 = vpop.xlane.xlu1 %1561 }
 0x42b   : > { %v4135_v6 = vpop.eup %4134 }
 0x42c   : > { %v1671_v7 = vsel %vm1476_vm7, %v4135_v6, 0.0 }
 0x42e   : > { %v4726_v60 = vpop.f32.mrf.mxu1 }
 0x430   : > { %v1565_v11 = vpop.xlane.xlu2 %1564 }
 0x436   : > { %v1741_v61 = vpop.f32.mrf.mxu1 }
 0x437   : > { %v1742_v62 = vadd.f32 %v1741_v61, %v4680_v47 }
 0x439   : > { %v1746_v63 = vsel %vm1472_vm6, %v1742_v62, -inf }
 0x43a   : > { %1747 = vmax.xlane.f32.xlu1 %v1746_v63  ;;  %v1440_v63 = vpack.c.bf16 %v4672_v42, %v4672_v42  ;;  %v1439_v42 = vpack.c.bf16 %v4670_v41, %v4670_v41 }
 0x43c   : > { %v1910_v43 = vsel %vm1454_vm3, %v1440_v63, 0 }
 0x43e   : > { %v1743_v0 = vpop.f32.mrf.mxu1 }
 0x43f   : > { %v1744_v1 = vadd.f32 %v1743_v0, %v4685_v51 }
 0x441   : > { %v1749_v2 = vsel %vm1476_vm7, %v1744_v1, -inf }
 0x442   : > { %1750 = vmax.xlane.f32.xlu2 %v1749_v2 }
 0x453   : > { %1571 = vrot.lane.b32.xlu1 %v4654_v24, %s4308_s19 }
 0x45a   : > { %1769 = vrot.lane.b32.xlu2 %v4654_v24, %s4309_s20 }
 0x47d   : > { %1672 = vadd.xlane.f32.xlu1 %v1671_v7  ;;  %v1820_v7 = vsel %vm1454_vm3, %v1439_v42, 0 }
 0x498   : > { %v1670_v12 = vpop.xlane.xlu2 %1669 }
 0x4ad   : > { %v1748_v13 = vpop.xlane.xlu1 %1747 }
 0x4ae   : > { %v1752_v14 = vsub.f32 %v1742_v62, %v1748_v13  ;;  %v1796_v62 = vsel %vm1454_vm3, %v1308_v50, 0 }
 0x4b0   : > { %v1754_v15 = vmul.f32 1.442695, %v1752_v14 }
 0x4b2   : > { %4136 = vpow2.f32 %v1754_v15 }
 0x4b5   : > { %v1751_v16 = vpop.xlane.xlu2 %1750 }
 0x4b6   : > { %v1753_v17 = vsub.f32 %v1744_v1, %v1751_v16 }
 0x4b8   : > { %v4137_v18 = vpop.eup %4136  ;;  %v1756_v19 = vmul.f32 1.442695, %v1753_v17  ;;  %v1815_v17 = vpop.permute.xlu0 %1814 }
 0x4b9   : > { %v1758_v20 = vsel %vm1472_vm6, %v4137_v18, 0.0 }
 0x4ba   : > { %4138 = vpow2.f32 %v1756_v19  ;;  %1759 = vadd.xlane.f32.xlu2 %v1758_v20 }
 0x4bb   : > { %4140 = vrcp.f32 %v1565_v11 }
 0x4bc   : > { %4142 = vrcp.f32 %v1562_v10 }
 0x4bd   : > { %v1770_v21 = vpop.permute.xlu2 %1769 }
 0x4be   : > { %v1775_v22 = vsel %vm1507_vm5, %v1770_v21, 0 }
 0x4bf   : > { %1784 = vmatpush.bf16.msrb.mxu2 %v1775_v22 }
 0x4c0   : > { %v4139_v23 = vpop.eup %4138 }
 0x4c1   : > { %v4141_v25 = vpop.eup %4140  ;;  %v1761_v26 = vsel %vm1476_vm7, %v4139_v23, 0.0 }
 0x4c2   : > { %1762 = vadd.xlane.f32.xlu2 %v1761_v26  ;;  %v4143_v27 = vpop.eup %4142  ;;  %v1569_v28 = vmul.f32 %v4141_v25, %v4131_v52 }
 0x4c3   : > { %v1568_v31 = vmul.f32 %v4143_v27, %v4714_v48  ;;  %1895 = vmatpush.bf16.msra.mxu2 %v1886_v34 }
 0x4c5   : > { %v1572_v29 = vpop.permute.xlu1 %1571  ;;  %v1570_v32 = vpack.c.bf16 %v1569_v28, %v1568_v31 }
 0x4c6   : > { %v1577_v30 = vsel %vm1507_vm5, %v1572_v29, 0 }
 0x4c7   : > { %1586 = vmatpush.bf16.msra.mxu3 %v1577_v30 }
 0x4ca   : > { %3851 = vmatmul.msk.bf16.vlgmr.msra.gmra.mxu3 %vm1472_vm6, %v1570_v32 }
 0x4da   : > { %1679 = vrot.lane.b32.xlu2 %v4654_v24, %s4310_s21 }
 0x4e2   : > { %1904 = vrot.lane.b32.xlu2 %v4664_v37, %s4311_s3 }
 0x4f0   : > { %v1673_v39 = vpop.xlane.xlu1 %1672 }
 0x4f1   : > { %4144 = vrcp.f32 %v1673_v39 }
 0x4f7   : > { %v4145_v48 = vpop.eup %4144 }
 0x4f8   : > { %v1677_v54 = vmul.f32 %v4145_v48, %v4135_v6 }
 0x52d   : > { %v1760_v35 = vpop.xlane.xlu2 %1759 }
 0x52e   : > { %4146 = vrcp.f32 %v1760_v35 }
 0x52f   : > { %4148 = vrcp.f32 %v1670_v12 }
 0x534   : > { %v4147_v49 = vpop.eup %4146 }
 0x535   : > { %v1763_v40 = vpop.xlane.xlu2 %1762  ;;  %v4149_v52 = vpop.eup %4148  ;;  %v1766_v56 = vmul.f32 %v4147_v49, %v4137_v18 }
 0x536   : > { %4150 = vrcp.f32 %v1763_v40  ;;  %v1676_v0 = vmul.f32 %v4149_v52, %v4720_v57 }
 0x538   : > { %v1678_v3 = vpack.c.bf16 %v1677_v54, %v1676_v0 }
 0x53c   : > { %v4151_v53 = vpop.eup %4150 }
 0x53d   : > { %v1767_v58 = vmul.f32 %v4151_v53, %v4139_v23  ;;  %v1680_v61 = vpop.permute.xlu2 %1679 }
 0x53e   : > { %v1685_v1 = vsel %vm1507_vm5, %v1680_v61, 0 }
 0x53f   : > { %v1768_v2 = vpack.c.bf16 %v1767_v58, %v1766_v56  ;;  %1694 = vmatpush.bf16.msrb.mxu3 %v1685_v1 }
 0x541   : > { %3858 = vmatmul.msk.bf16.vlgmr.msrb.gmra.mxu2 %vm1472_vm6, %v1768_v2  ;;  %v1310_v2 = vld [vmem:[%s4547_s1 + $0x14] sm:$0xf] }
 0x542   : > { %2009 = vmatpush.bf16.msrb.mxu2 %v2000_v4  ;;  %3855 = vmatmul.msk.bf16.vlgmr.msrb.gmra.mxu3 %vm1472_vm6, %v1678_v3  ;;  %v1976_v3 = vsel %vm1454_vm3, %v1310_v2, 0 }
 0x543   : > { %1805 = vmatpush.bf16.msra.mxu3 %v1796_v62 }
 0x545   : > { %v1905_v16 = vpop.permute.xlu2 %1904 }
 0x547   : > { %1919 = vmatpush.bf16.msrb.mxu3 %v1910_v43 }
 0x54d   : > { %v1588_v5 = vpop.f32.mrf.mxu3 }
 0x555   : > { %v1590_v57 = vpop.f32.mrf.mxu3 }
 0x556   : > { %v1593_v6 = vpack.c.bf16 %v1590_v57, %v1588_v5 }
 0x558   : > { %3852 = vmatmul.msk.bf16.vlgmr.msra.gmra.mxu0 %vm1450_vm4, %v1593_v6 }
 0x559   : > { %1829 = vmatpush.bf16.msra.mxu0 %v1820_v7 }
 0x5c4   : > { %v1786_v10 = vpop.f32.mrf.mxu2 }
 0x5c5   : > { %v1696_v11 = vpop.f32.mrf.mxu3 }
 0x5cc   : > { %v1788_v12 = vpop.f32.mrf.mxu2 }
 0x5cd   : > { %v1791_v13 = vpack.c.bf16 %v1788_v12, %v1786_v10  ;;  %v1698_v14 = vpop.f32.mrf.mxu3  ;;  %v1442_v12 = vpack.c.bf16 %v4676_v44, %v4676_v44 }
 0x5ce   : > { %v1701_v15 = vpack.c.bf16 %v1698_v14, %v1696_v11 }
 0x5cf   : > { %3859 = vmatmul.msk.bf16.vlgmr.msra.gmra.mxu3 %vm1450_vm4, %v1791_v13 }
 0x5d0   : > { %3856 = vmatmul.msk.bf16.vlgmr.msrb.gmra.mxu0 %vm1450_vm4, %v1701_v15 }
 0x5d5   : > { %v1609_v41 = vpop.f32.mrf.mxu0 }
 0x5d6   : > { %v1630_v19 = vadd.f32 %v4724_v59, %v1609_v41 }
 0x5dd   : > { %v1611_v18 = vpop.f32.mrf.mxu0 }
 0x5de   : > { %v1632_v26 = vadd.f32 %v4726_v60, %v1611_v18 }
 0x5df   : > { %3863 = vmatmul.msk.bf16.vlgmr.msrb.gmra.mxu3 %vm1450_vm4, %v1905_v16  ;;  %v2090_v16 = vsel %vm1454_vm3, %v1442_v12, 0 }
 0x5e0   : > { %3860 = vmatmul.msk.bf16.vlgmr.msra.gmra.mxu0 %vm1450_vm4, %v1815_v17 }
 0x64d   : > { %v1717_v20 = vpop.f32.mrf.mxu0 }
 0x64e   : > { %v1722_v21 = vadd.f32 %v1717_v20, %v1630_v19 }
 0x652   : > { %v1807_v22 = vpop.f32.mrf.mxu3 }
 0x653   : > { %v4774_v23 = vadd.f32 %v1807_v22, %v1722_v21 }
 0x655   : > { %v1719_v25 = vpop.f32.mrf.mxu0 }
 0x656   : > { %v1723_v27 = vadd.f32 %v1719_v25, %v1632_v26 }
 0x65a   : > { %v1809_v28 = vpop.f32.mrf.mxu3 }
 0x65b   : > { %v4777_v29 = vadd.f32 %v1809_v28, %v1723_v27 }
 0x65d   : > { %v1831_v30 = vpop.f32.mrf.mxu0 }
 0x65e   : > { %v1832_v31 = vadd.f32 %v1831_v30, %v4680_v47 }
 0x660   : > { %v1836_v32 = vsel %vm1472_vm6, %v1832_v31, -inf }
 0x661   : > { %1837 = vmax.xlane.f32.xlu1 %v1836_v32 }
 0x662   : > { %v1921_v33 = vpop.f32.mrf.mxu3 }
 0x663   : > { %v1922_v59 = vadd.f32 %v1921_v33, %v4680_v47 }
 0x665   : > { %v1833_v34 = vpop.f32.mrf.mxu0  ;;  %v1926_v35 = vsel %vm1472_vm6, %v1922_v59, -inf }
 0x666   : > { %v1834_v36 = vadd.f32 %v1833_v34, %v4685_v51  ;;  %1927 = vmax.xlane.f32.xlu0 %v1926_v35 }
 0x668   : > { %v1839_v60 = vsel %vm1476_vm7, %v1834_v36, -inf }
 0x669   : > { %1840 = vmax.xlane.f32.xlu2 %v1839_v60 }
 0x66a   : > { %v1923_v50 = vpop.f32.mrf.mxu3 }
 0x66b   : > { %v1924_v53 = vadd.f32 %v1923_v50, %v4685_v51 }
 0x66d   : > { %v1929_v58 = vsel %vm1476_vm7, %v1924_v53, -inf }
 0x67a   : > { %1994 = vrot.lane.b32.xlu0 %v4664_v37, %s4312_s6 }
 0x681   : > { %1859 = vrot.lane.b32.xlu2 %v4654_v24, %s4313_s23 }
 0x689   : > { %2084 = vrot.lane.b32.xlu2 %v4664_v37, %s4314_s26 }
 0x6d4   : > { %v1838_v38 = vpop.xlane.xlu1 %1837 }
 0x6d5   : > { %v1842_v39 = vsub.f32 %v1832_v31, %v1838_v38 }
 0x6d7   : > { %v1844_v40 = vmul.f32 1.442695, %v1842_v39 }
 0x6d9   : > { %4152 = vpow2.f32 %v1844_v40  ;;  %v1928_v54 = vpop.xlane.xlu0 %1927 }
 0x6da   : > { %v1932_v37 = vsub.f32 %v1922_v59, %v1928_v54 }
 0x6dc   : > { %v1841_v45 = vpop.xlane.xlu2 %1840  ;;  %v1934_v61 = vmul.f32 1.442695, %v1932_v37 }
 0x6dd   : > { %v1843_v48 = vsub.f32 %v1834_v36, %v1841_v45 }
 0x6df   : > { %v4153_v46 = vpop.eup %4152  ;;  %v1846_v52 = vmul.f32 1.442695, %v1843_v48 }
 0x6e0   : > { %v1848_v49 = vsel %vm1472_vm6, %v4153_v46, 0.0 }
 0x6e1   : > { %1849 = vadd.xlane.f32.xlu1 %v1848_v49  ;;  %4154 = vpow2.f32 %v1846_v52 }
 0x6e2   : > { %4156 = vpow2.f32 %v1934_v61 }
 0x6e4   : > { %v1860_v55 = vpop.permute.xlu2 %1859 }
 0x6e5   : > { %v1865_v56 = vsel %vm1507_vm5, %v1860_v55, 0 }
 0x6e6   : > { %1874 = vmatpush.bf16.msrb.mxu1 %v1865_v56 }
 0x6e7   : > { %v4155_v62 = vpop.eup %4154 }
 0x6e8   : > { %v1851_v63 = vsel %vm1476_vm7, %v4155_v62, 0.0  ;;  %v4157_v0 = vpop.eup %4156 }
 0x6e9   : > { %1930 = vmax.xlane.f32.xlu1 %v1929_v58  ;;  %v1938_v1 = vsel %vm1472_vm6, %v4157_v0, 0.0 }
 0x6ea   : > { %1985 = vmatpush.bf16.msra.mxu1 %v1976_v3 }
 0x6ec   : > { %v1995_v30 = vpop.permute.xlu0 %1994  ;;  %v2085_v40 = vpop.permute.xlu2 %2084 }
 0x6f1   : > { %1852 = vadd.xlane.f32.xlu1 %v1851_v63 }
 0x6f9   : > { %1939 = vadd.xlane.f32.xlu1 %v1938_v1 }
 0x754   : > { %v1850_v4 = vpop.xlane.xlu1 %1849 }
 0x75c   : > { %v1931_v43 = vpop.xlane.xlu1 %1930 }
 0x75d   : > { %v1933_v5 = vsub.f32 %v1924_v53, %v1931_v43 }
 0x75f   : > { %v1936_v42 = vmul.f32 1.442695, %v1933_v5 }
 0x761   : > { %4158 = vpow2.f32 %v1936_v42 }
 0x762   : > { %4160 = vrcp.f32 %v1850_v4 }
 0x764   : > { %v1853_v57 = vpop.xlane.xlu1 %1852 }
 0x765   : > { %4162 = vrcp.f32 %v1853_v57 }
 0x767   : > { %v4159_v6 = vpop.eup %4158 }
 0x768   : > { %v1941_v7 = vsel %vm1476_vm7, %v4159_v6, 0.0  ;;  %v4161_v10 = vpop.eup %4160 }
 0x769   : > { %1942 = vadd.xlane.f32.xlu1 %v1941_v7  ;;  %v1856_v13 = vmul.f32 %v4161_v10, %v4153_v46 }
 0x76b   : > { %v4163_v11 = vpop.eup %4162 }
 0x76c   : > { %v1857_v14 = vmul.f32 %v4163_v11, %v4155_v62  ;;  %v1940_v17 = vpop.xlane.xlu1 %1939 }
 0x76e   : > { %v1858_v15 = vpack.c.bf16 %v1857_v14, %v1856_v13 }
 0x770   : > { %3861 = vmatmul.msk.bf16.vlgmr.msrb.gmra.mxu1 %vm1472_vm6, %v1858_v15 }
 0x771   : > { %2099 = vmatpush.bf16.msrb.mxu1 %v2090_v16 }
 0x782   : > { %1949 = vrot.lane.b32.xlu1 %v4654_v24, %s4315_s12 }
 0x7dc   : > { %v1943_v41 = vpop.xlane.xlu1 %1942 }
 0x7dd   : > { %4164 = vrcp.f32 %v1943_v41 }
 0x7de   : > { %4166 = vrcp.f32 %v1940_v17 }
 0x7e3   : > { %v4165_v19 = vpop.eup %4164 }
 0x7e4   : > { %v4167_v20 = vpop.eup %4166  ;;  %v1947_v44 = vmul.f32 %v4165_v19, %v4159_v6 }
 0x7e5   : > { %v1946_v22 = vmul.f32 %v4167_v20, %v4157_v0 }
 0x7e7   : > { %v1948_v28 = vpack.c.bf16 %v1947_v44, %v1946_v22 }
 0x7ed   : > { %v1876_v18 = vpop.f32.mrf.mxu1 }
 0x7f4   : > { %v1950_v21 = vpop.permute.xlu1 %1949 }
 0x7f5   : > { %v1955_v25 = vsel %vm1507_vm5, %v1950_v21, 0  ;;  %v1878_v26 = vpop.f32.mrf.mxu1 }
 0x7f6   : > { %v1881_v27 = vpack.c.bf16 %v1878_v26, %v1876_v18  ;;  %1964 = vmatpush.bf16.msrb.mxu0 %v1955_v25 }
 0x7f8   : > { %3862 = vmatmul.msk.bf16.vlgmr.msra.gmra.mxu2 %vm1450_vm4, %v1881_v27 }
 0x7f9   : > { %3864 = vmatmul.msk.bf16.vlgmr.msrb.gmra.mxu0 %vm1472_vm6, %v1948_v28 }
 0x808   : > { %3866 = vmatmul.msk.bf16.vlgmr.msrb.gmra.mxu2 %vm1450_vm4, %v1995_v30 }
 0x876   : > { %v1966_v31 = vpop.f32.mrf.mxu0 }
 0x87b   : > { %v1897_v32 = vpop.f32.mrf.mxu2 }
 0x87c   : > { %v1902_v33 = vadd.f32 %v1897_v32, %v4774_v23 }
 0x87e   : > { %v1968_v59 = vpop.f32.mrf.mxu0 }
 0x87f   : > { %v1971_v34 = vpack.c.bf16 %v1968_v59, %v1966_v31  ;;  %v1311_v31 = vld [vmem:[%s4547_s1 + $0x18] sm:$0xf] }
 0x880   : > { %v2066_v32 = vsel %vm1454_vm3, %v1311_v31, 0 }
 0x881   : > { %3865 = vmatmul.msk.bf16.vlgmr.msra.gmra.mxu1 %vm1450_vm4, %v1971_v34  ;;  %2075 = vmatpush.bf16.msra.mxu0 %v2066_v32  ;;  %v4024_v32 = vld [vmem:[%s4564_s7] sm:$0xff] }
 0x883   : > { %v1899_v35 = vpop.f32.mrf.mxu2 }
 0x884   : > { %v1903_v36 = vadd.f32 %v1899_v35, %v4777_v29 }
 0x88b   : > { %v2011_v60 = vpop.f32.mrf.mxu2 }
 0x88c   : > { %v2012_v38 = vadd.f32 %v2011_v60, %v4680_v47 }
 0x88e   : > { %v2016_v39 = vsel %vm1472_vm6, %v2012_v38, -inf }
 0x88f   : > { %2017 = vmax.xlane.f32.xlu2 %v2016_v39 }
 0x891   : > { %3869 = vmatmul.msk.bf16.vlgmr.msrb.gmra.mxu1 %vm1450_vm4, %v2085_v40  ;;  %v4031_v40 = vld [vmem:[%s4573_s30 + $0x18] sm:$0xff] }
 0x892   : > { %2357 = vmatpush.bf16.msra.mxu1 %v4031_v40 }
 0x893   : > { %v2013_v54 = vpop.f32.mrf.mxu2 }
 0x894   : > { %v2014_v56 = vadd.f32 %v2013_v54, %v4685_v51 }
 0x896   : > { %v2019_v62 = vsel %vm1476_vm7, %v2014_v56, -inf }
 0x8fe   : > { %v1987_v45 = vpop.f32.mrf.mxu1 }
 0x8ff   : > { %v4816_v46 = vadd.f32 %v1987_v45, %v1902_v33  ;;  %v1312_v33 = vld [vmem:[%s4547_s1 + $0x1c] sm:$0xf]  ;;  %v4030_v45 = vld [vmem:[%s4573_s30 + $0x10] sm:$0xff]  ;;  %s5311_s1 = sld [smem:[#allocation25_spill]] }
 0x900   : > { %v2156_v59 = vsel %vm1454_vm3, %v1312_v33, 0  ;;  %2358 = vmatpush.bf16.msra.mxu1 %v4030_v45 }
 0x902   : > { %v2018_v49 = vpop.xlane.xlu2 %2017 }
 0x903   : > { %v2022_v29 = vsub.f32 %v2012_v38, %v2018_v49 }
 0x905   : > { %v2024_v55 = vmul.f32 1.442695, %v2022_v29  ;;  %s5312_s9 = scalar_lea.vmem %s5311_s1, %s4500_s0 }
 0x906   : > { %v1989_v23 = vpop.f32.mrf.mxu1 }
 0x907   : > { %v4818_v48 = vadd.f32 %v1989_v23, %v1903_v36  ;;  %4168 = vpow2.f32 %v2024_v55 }
 0x90d   : > { %v4169_v63 = vpop.eup %4168 }
 0x90e   : > { %v2101_v50 = vpop.f32.mrf.mxu1 }
 0x90f   : > { %v2102_v52 = vadd.f32 %v2101_v50, %v4680_v47  ;;  %v2028_v47 = vsel %vm1472_vm6, %v4169_v63, 0.0  ;;  %v4107_v50 = vld [vmem:[%s5308_s14] ss:$0 sm:$0xff]  ;;  %s5315_s14 = scalar_lea.vmem %s5208_s13, %s4500_s0 }
 0x911   : > { %v2106_v53 = vsel %vm1472_vm6, %v2102_v52, -inf }
 0x912   : > { %2107 = vmax.xlane.f32.xlu0 %v2106_v53 }
 0x916   : > { %v2103_v37 = vpop.f32.mrf.mxu1 }
 0x917   : > { %v2104_v58 = vadd.f32 %v2103_v37, %v4685_v51 }
 0x919   : > { %v2109_v61 = vsel %vm1476_vm7, %v2104_v58, -inf }
 0x91a   : > { %2110 = vmax.xlane.f32.xlu1 %v2109_v61  ;;  %2020 = vmax.xlane.f32.xlu0 %v2019_v62 }
 0x922   : > { %2029 = vadd.xlane.f32.xlu0 %v2028_v47  ;;  %v4029_v47 = vld [vmem:[%s4573_s30 + $0x8] sm:$0xff] }
 0x923   : > { %2359 = vmatpush.bf16.msra.mxu1 %v4029_v47 }
 0x936   : > { %2039 = vrot.lane.b32.xlu0 %v4654_v24, %s4316_s10 }
 0x985   : > { %v2108_v0 = vpop.xlane.xlu0 %2107 }
 0x986   : > { %v2112_v1 = vsub.f32 %v2102_v52, %v2108_v0  ;;  %v4028_v0 = vld [vmem:[%s4573_s30] sm:$0xff]  ;;  %s5325_s30 = sld [smem:[#allocation33_spill]] }
 0x987   : > { %2360 = vmatpush.bf16.msra.mxu1 %v4028_v0 }
 0x988   : > { %v2114_v2 = vmul.f32 1.442695, %v2112_v1  ;;  %v3891_v1 = vld [vmem:[%s5309_s4] sm:$0xf] }
 0x98a   : > { %4170 = vpow2.f32 %v2114_v2  ;;  %v4015_v2 = vld [vmem:[%s5309_s4] sm:$0x30]  ;;  %s5310_s4 = scalar_lea.vmem %s5210_s15, %s4500_s0 }
 0x98d   : > { %v2111_v51 = vpop.xlane.xlu1 %2110  ;;  %v2021_v3 = vpop.xlane.xlu0 %2020 }
 0x98e   : > { %v2113_v4 = vsub.f32 %v2104_v58, %v2111_v51  ;;  %v2023_v43 = vsub.f32 %v2014_v56, %v2021_v3 }
 0x990   : > { %v4171_v5 = vpop.eup %4170  ;;  %v2116_v42 = vmul.f32 1.442695, %v2113_v4  ;;  %v2026_v57 = vmul.f32 1.442695, %v2023_v43 }
 0x991   : > { %v2118_v6 = vsel %vm1472_vm6, %v4171_v5, 0.0 }
 0x992   : > { %4172 = vpow2.f32 %v2116_v42  ;;  %2119 = vadd.xlane.f32.xlu1 %v2118_v6 }
 0x993   : > { %4174 = vpow2.f32 %v2026_v57 }
 0x995   : > { %v2030_v13 = vpop.xlane.xlu0 %2029 }
 0x998   : > { %v4173_v7 = vpop.eup %4172 }
 0x999   : > { %v4175_v10 = vpop.eup %4174  ;;  %v2121_v11 = vsel %vm1476_vm7, %v4173_v7, 0.0 }
 0x99a   : > { %2122 = vadd.xlane.f32.xlu2 %v2121_v11  ;;  %v2031_v12 = vsel %vm1476_vm7, %v4175_v10, 0.0 }
 0x99b   : > { %2032 = vadd.xlane.f32.xlu1 %v2031_v12 }
 0x9a8   : > { %v2040_v14 = vpop.permute.xlu0 %2039 }
 0x9a9   : > { %v2045_v15 = vsel %vm1507_vm5, %v2040_v14, 0 }
 0x9aa   : > { %2054 = vmatpush.bf16.msra.mxu3 %v2045_v15 }
 0x9ae   : > { %2165 = vmatpush.bf16.msrb.mxu3 %v2156_v59 }
 0x9b2   : > { %2129 = vrot.lane.b32.xlu2 %v4654_v24, %s5236_s11 }
 0xa05   : > { %v2120_v16 = vpop.xlane.xlu1 %2119 }
 0xa06   : > { %4176 = vrcp.f32 %v2120_v16  ;;  %v4110_v16 = vld [vmem:[%s5310_s4] ss:$0 sm:$0xff]  ;;  %s5313_s4 = sld [smem:[#allocation26_spill]] }
 0xa07   : > { %4178 = vrcp.f32 %v2030_v13 }
 0xa0c   : > { %v4177_v18 = vpop.eup %4176  ;;  %s5314_s11 = scalar_lea.vmem %s5313_s4, %s4500_s0  ;;  %s5326_s4 = scalar_lea.vmem %s5325_s30, %s4500_s0 }
 0xa0d   : > { %v2123_v17 = vpop.xlane.xlu2 %2122  ;;  %v4179_v19 = vpop.eup %4178  ;;  %v2126_v21 = vmul.f32 %v4177_v18, %v4171_v5 }
 0xa0e   : > { %4180 = vrcp.f32 %v2123_v17  ;;  %v2033_v41 = vpop.xlane.xlu1 %2032  ;;  %v2036_v26 = vmul.f32 %v4179_v19, %v4169_v63 }
 0xa0f   : > { %4182 = vrcp.f32 %v2033_v41 }
 0xa14   : > { %v4181_v20 = vpop.eup %4180 }
 0xa15   : > { %v4183_v44 = vpop.eup %4182  ;;  %v2127_v22 = vmul.f32 %v4181_v20, %v4173_v7  ;;  %v2130_v25 = vpop.permute.xlu2 %2129 }
 0xa16   : > { %v2037_v27 = vmul.f32 %v4183_v44, %v4175_v10  ;;  %v2135_v24 = vsel %vm1507_vm5, %v2130_v25, 0  ;;  %vm2474_vm5 = vcmask 1045504  }
 0xa17   : > { %v2128_v28 = vpack.c.bf16 %v2127_v22, %v2126_v21  ;;  %2144 = vmatpush.bf16.msra.mxu2 %v2135_v24  ;;  %v4027_v21 = vld [vmem:[%s4564_s7 + $0x18] sm:$0xff]  ;;  %v4025_v24 = vld [vmem:[%s4564_s7 + $0x8] sm:$0xff] }
 0xa18   : > { %v2038_v30 = vpack.c.bf16 %v2037_v27, %v2036_v26  ;;  %2308 = vmatpush.bf16.msrb.mxu0 %v4027_v21  ;;  %v4026_v27 = vld [vmem:[%s4564_s7 + $0x10] sm:$0xff] }
 0xa1a   : > { %3867 = vmatmul.msk.bf16.vlgmr.msra.gmra.mxu3 %vm1472_vm6, %v2038_v30  ;;  %3870 = vmatmul.msk.bf16.vlgmr.msra.gmra.mxu2 %vm1472_vm6, %v2128_v28 }
 0xa1c   : > { %2309 = vmatpush.bf16.msrb.mxu0 %v4026_v27 }
 0xa20   : > { %2310 = vmatpush.bf16.msrb.mxu0 %v4025_v24 }
 0xa24   : > { %2311 = vmatpush.bf16.msrb.mxu0 %v4024_v32 }
 0xa9d   : > { %v2056_v34 = vpop.f32.mrf.mxu3  ;;  %v2146_v35 = vpop.f32.mrf.mxu2 }
 0xaa5   : > { %v2058_v36 = vpop.f32.mrf.mxu3  ;;  %v2148_v60 = vpop.f32.mrf.mxu2 }
 0xaa6   : > { %v2061_v38 = vpack.c.bf16 %v2058_v36, %v2056_v34  ;;  %v2151_v39 = vpack.c.bf16 %v2148_v60, %v2146_v35 }
 0xaa8   : > { %3868 = vmatmul.msk.bf16.vlgmr.msra.gmra.mxu0 %vm1450_vm4, %v2061_v38  ;;  %3871 = vmatmul.msk.bf16.vlgmr.msrb.gmra.mxu3 %vm1450_vm4, %v2151_v39 }
 0xb25   : > { %v2077_v23 = vpop.f32.mrf.mxu0 }
 0xb26   : > { %v2082_v49 = vadd.f32 %v2077_v23, %v4816_v46 }
 0xb2b   : > { %v2167_v52 = vpop.f32.mrf.mxu3 }
 0xb2c   : > { %v2172_v29 = vadd.f32 %v2167_v52, %v2082_v49 }
 0xb2d   : > { %v2079_v54 = vpop.f32.mrf.mxu0 }
 0xb2e   : > { %v2177_v53 = vadd.f32 %v4107_v50, %v2172_v29  ;;  %v2083_v56 = vadd.f32 %v2079_v54, %v4818_v48  ;;  %v3892_v48 = vor.u32 %v4015_v2, %v3891_v1 }
 0xb30   : > { %v2179_v55 = vadd.f32 %v2177_v53, %v4637_v8  ;;  %v4318_v8 = vmov 64.0   ;;  %3909 = vmatmul.msk.bf16.vlgmr.msra.gmra.mxu1 %vm1342_vm2, %v3892_v48  ;;  %v4108_v53 = vld [vmem:[%s5312_s9] ss:$0 sm:$0xff] }
 0xb31   : > { %4184 = vrcp.f32 %v4318_v8  ;;  %v4111_v48 = vld [vmem:[%s5315_s14] ss:$0 sm:$0xff]  ;;  %s5327_s14 = sld [smem:[#allocation34_spill]] }
 0xb32   : > { %v2183_v37 = vsel %vm1342_vm2, %v2179_v55, 0.0 }
 0xb33   : > { %v2169_v46 = vpop.f32.mrf.mxu3  ;;  %2184 = vadd.xlane.f32.xlu1 %v2183_v37  ;;  %v4109_v37 = vld [vmem:[%s5314_s11] ss:$0 sm:$0xff] }
 0xb34   : > { %v2173_v58 = vadd.f32 %v2169_v46, %v2083_v56 }
 0xb36   : > { %v2178_v61 = vadd.f32 %v4107_v50, %v2173_v58 }
 0xb37   : > { %v4185_v51 = vpop.eup %4184 }
 0xb38   : > { %v2180_v62 = vadd.f32 %v2178_v61, %v4639_v9  ;;  %v2191_v3 = vmul.f32 64.0, %v4185_v51  ;;  %vm2195_vm9 = vweird.f32 %v4185_v51 }
 0xb3a   : > { %v2187_v63 = vsel %vm2186_vm8, %v2180_v62, 0.0  ;;  %v2192_v4 = vsub.f32 1.0, %v2191_v3 }
 0xb3b   : > { %2188 = vadd.xlane.f32.xlu1 %v2187_v63 }
 0xb3c   : > { %v2193_v43 = vmul.f32 %v4185_v51, %v2192_v4 }
 0xb3e   : > { %v2194_v9 = vadd.f32 %v4185_v51, %v2193_v43 }
 0xb40   : > { %v4862_v5 = vsel %vm2195_vm9, %v4185_v51, %v2194_v9 }
 0xba6   : > { %v2185_v42 = vpop.xlane.xlu1 %2184 }
 0xba7   : > { %v2197_v57 = vmul.f32 %v4862_v5, %v2185_v42 }
 0xba9   : > { %v2199_v6 = vsub.f32 %v2179_v55, %v2197_v57 }
 0xbab   : > { %v2201_v7 = vmul.f32 %v2199_v6, %v2199_v6 }
 0xbad   : > { %v2203_v10 = vsel %vm1342_vm2, %v2201_v7, 0.0  ;;  %v2362_v17 = vpop.f32.mrf.mxu1 }
 0xbae   : > { %2204 = vadd.xlane.f32.xlu1 %v2203_v10  ;;  %v2189_v11 = vpop.xlane.xlu1 %2188  ;;  %v2363_v41 = vadd.f32 %v4110_v16, %v2362_v17 }
 0xbaf   : > { %v2198_v12 = vmul.f32 %v4862_v5, %v2189_v11 }
 0xbb0   : > { %2369 = vxpose.xlu2.b32.start [1/2] (short) (narrow) %v2363_v41, 64  ;;  %v2409_v20 = vpack.c.bf16 %v2363_v41, %v2363_v41 }
 0xbb1   : > { %v2200_v13 = vsub.f32 %v2180_v62, %v2198_v12 }
 0xbb2   : > { %v2466_v22 = vunpack.c.l.b16 %v2409_v20 }
 0xbb3   : > { %v2202_v14 = vmul.f32 %v2200_v13, %v2200_v13 }
 0xbb5   : > { %v2206_v15 = vsel %vm2186_vm8, %v2202_v14, 0.0  ;;  %v2364_v18 = vpop.f32.mrf.mxu1 }
 0xbb6   : > { %2207 = vadd.xlane.f32.xlu0 %v2206_v15  ;;  %v2365_v19 = vadd.f32 %v4110_v16, %v2364_v18 }
 0xbb8   : > { %v2410_v44 = vpack.c.bf16 %v2365_v19, %v2365_v19  ;;  %2370 = vxpose.xlu2.b32.end [2/2] (short) (narrow) %v2365_v19, 64 }
 0xbba   : > { %v2467_v25 = vunpack.c.l.b16 %v2410_v44 }
 0xbbc   : > { %v4874_v26 = vpack.c.b16 %v2467_v25, %v2466_v22 }
 0xc21   : > { %v2205_v28 = vpop.xlane.xlu1 %2204 }
 0xc22   : > { %v2209_v30 = vmul.f32 %v2205_v28, %v4862_v5 }
 0xc24   : > { %v2211_v31 = vadd.f32 1e-05, %v2209_v30 }
 0xc26   : > { %4186 = vrsqrt.f32 %v2211_v31  ;;  %vm2219_vm11 = vweird.f32 %v2211_v31 }
 0xc29   : > { %v2208_v33 = vpop.xlane.xlu0 %2207 }
 0xc2a   : > { %v2210_v59 = vmul.f32 %v2208_v33, %v4862_v5 }
 0xc2c   : > { %v4187_v34 = vpop.eup %4186  ;;  %v2212_v35 = vadd.f32 1e-05, %v2210_v59 }
 0xc2d   : > { %v2214_v36 = vmul.f32 %v4187_v34, %v2211_v31  ;;  %vm2220_vm10 = vweird.f32 %v4187_v34 }
 0xc2e   : > { %4188 = vrsqrt.f32 %v2212_v35  ;;  %vm2221_vm12 = vmor %vm2219_vm11, %vm2220_vm10  ;;  %vm2229_vm14 = vweird.f32 %v2212_v35 }
 0xc2f   : > { %v2215_v60 = vmul.f32 %v4187_v34, %v2214_v36 }
 0xc31   : > { %v2216_v38 = vmul.f32 0.5, %v2215_v60 }
 0xc33   : > { %v2217_v39 = vsub.f32 1.5, %v2216_v38 }
 0xc34   : > { %v4189_v40 = vpop.eup %4188 }
 0xc35   : > { %v2218_v45 = vmul.f32 %v4187_v34, %v2217_v39  ;;  %v2224_v23 = vmul.f32 %v4189_v40, %v2212_v35  ;;  %vm2230_vm13 = vweird.f32 %v4189_v40 }
 0xc36   : > { %vm2231_vm15 = vmor %vm2229_vm14, %vm2230_vm13 }
 0xc37   : > { %v2225_v49 = vmul.f32 %v4189_v40, %v2224_v23  ;;  %v2222_v50 = vsel %vm2221_vm12, %v4187_v34, %v2218_v45 }
 0xc38   : > { %v2233_v54 = vmul.f32 %v2222_v50, %v2199_v6 }
 0xc39   : > { %v2226_v52 = vmul.f32 0.5, %v2225_v49 }
 0xc3a   : > { %v2238_v46 = vmul.f32 %v4108_v53, %v2233_v54 }
 0xc3b   : > { %v2227_v29 = vsub.f32 1.5, %v2226_v52 }
 0xc3c   : > { %v4891_v62 = vadd.f32 %v4109_v37, %v2238_v46 }
 0xc3d   : > { %v2228_v55 = vmul.f32 %v4189_v40, %v2227_v29 }
 0xc3f   : > { %v2232_v56 = vsel %vm2231_vm15, %v4189_v40, %v2228_v55 }
 0xc40   : > { %v2234_v58 = vmul.f32 %v2232_v56, %v2200_v13 }
 0xc42   : > { %v2239_v61 = vmul.f32 %v4108_v53, %v2234_v58 }
 0xc44   : > { %v4893_v63 = vadd.f32 %v4109_v37, %v2239_v61 }
 0xc46   : > { %v2273_v47 = vpack.c.bf16 %v4893_v63, %v4891_v62 }
 0xc48   : > { %3888 = vmatmul.msk.bf16.vlgmr.msrb.gmra.mxu0 %vm1342_vm2, %v2273_v47 }
 0xc49   : > { %v2385_v0 = vpop.trf.xlu2 }
 0xc4a   : > { %v2401_v1 = vpack.c.bf16 %v2385_v0, %v2385_v0 }
 0xc4c   : > { %v2423_v2 = vsel %vm1454_vm3, %v2401_v1, 0 }
 0xc4d   : > { %2432 = vmatpush.bf16.msrb.mxu2 %v2423_v2 }
 0xc51   : > { %v2386_v51 = vpop.trf.xlu2 }
 0xc52   : > { %v2402_v3 = vpack.c.bf16 %v2386_v51, %v2386_v51 }
 0xc54   : > { %v2499_v4 = vsel %vm1454_vm3, %v2402_v3, 0 }
 0xc55   : > { %2508 = vmatpush.bf16.msra.mxu0 %v2499_v4 }
 0xc59   : > { %v2387_v6 = vpop.trf.xlu2 }
 0xc5a   : > { %v2403_v7 = vpack.c.bf16 %v2387_v6, %v2387_v6 }
 0xc5c   : > { %v2607_v11 = vsel %vm1454_vm3, %v2403_v7, 0 }
 0xc5d   : > { %2616 = vmatpush.bf16.msrb.mxu0 %v2607_v11 }
 0xc61   : > { %v4920_v15 = vpop.trf.xlu2 }
 0xc62   : > { %v2404_v3 = vpack.c.bf16 %v4920_v15, %v4920_v15 }
 0xc64   : > { %v2697_v6 = vsel %vm1454_vm3, %v2404_v3, 0 }
 0xc69   : > { %v4922_v16 = vpop.trf.xlu2 }
 0xc71   : > { %v4924_v17 = vpop.trf.xlu2 }
 0xc79   : > { %v4926_v41 = vpop.trf.xlu2 }
 0xc81   : > { %v4929_v19 = vpop.trf.xlu2 }
 0xcc5   : > { %v2313_v8 = vpop.f32.mrf.mxu0 }
 0xcc6   : > { %v2314_v43 = vadd.f32 %v4111_v48, %v2313_v8 }
 0xcc8   : > { %v2367_v42 = vpack.c.bf16 %v2314_v43, %v2314_v43 }
 0xcca   : > { %v2416_v12 = vunpack.c.l.b16 %v2367_v42 }
 0xccd   : > { %v2315_v9 = vpop.f32.mrf.mxu0 }
 0xcce   : > { %v2316_v57 = vadd.f32 %v4111_v48, %v2315_v9  ;;  %v2264_v48 = vld [vmem:[%s4582_s24] sm:$0xf] }
 0xccf   : > { %v2585_v9 = vsel %vm1454_vm3, %v2264_v48, 0 }
 0xcd0   : > { %v2368_v10 = vpack.c.bf16 %v2316_v57, %v2316_v57 }
 0xcd2   : > { %v2417_v13 = vunpack.c.l.b16 %v2368_v10 }
 0xcd4   : > { %v4906_v14 = vpack.c.b16 %v2417_v13, %v2416_v12 }
 0xcd6   : > { %2601 = vrot.lane.b32.xlu2 %v4906_v14, %s4306_s16  ;;  %2493 = vrot.lane.b32.xlu0 %v4906_v14, %s4305_s28  ;;  %s5316_s16 = sld [smem:[#allocation18_spill]] }
 0xcd7   : > { %3910 = vmatmul.msk.bf16.vlgmr.msrb.gmra.mxu2 %vm1450_vm4, %v4906_v14 }
 0xcde   : > { %2781 = vrot.lane.b32.xlu2 %v4906_v14, %s4304_s29  ;;  %2691 = vrot.lane.b32.xlu0 %v4906_v14, %s4307_s8  ;;  %s5317_s8 = scalar_lea.vmem %s5316_s16, %s5349_s5  ;;  %s5318_s5 = smov 8  }
 0xcdf   : > { %v4936_v20 = vld [vmem:[%s5317_s8] ss:$0 sm:$0xff]  ;;  %s5328_s29 = scalar_lea.vmem %s5327_s14, %s4500_s0  ;;  %s5329_s16 = sld [smem:[#allocation35_spill]] }
 0xce5   : > { %s5330_s8 = scalar_lea.vmem %s5329_s16, %s4500_s0 }
 0xce6   : > { %2871 = vrot.lane.b32.xlu2 %v4906_v14, %s4311_s3 }
 0xd30   : > { %v2602_v44 = vpop.permute.xlu2 %2601 }
 0xd48   : > { %v2494_v18 = vpop.permute.xlu0 %2493 }
 0xd49   : > { %3912 = vmatmul.msk.bf16.vlgmr.msra.gmra.mxu0 %vm1450_vm4, %v2494_v18 }
 0xd50   : > { %v2692_v37 = vpop.permute.xlu0 %2691 }
 0xd59   : > { %3916 = vmatmul.msk.bf16.vlgmr.msrb.gmra.mxu0 %vm1450_vm4, %v2602_v44 }
 0xd5a   : > { %v2434_v21 = vpop.f32.mrf.mxu2 }
 0xd5b   : > { %v2435_v22 = vadd.f32 %v4936_v20, %v2434_v21 }
 0xd5d   : > { %v2440_v25 = vsel %vm2439_vm0, %v2435_v22, -inf }
 0xd5e   : > { %2441 = vmax.xlane.f32.xlu1 %v2440_v25 }
 0xd62   : > { %v2436_v27 = vpop.f32.mrf.mxu2 }
 0xd63   : > { %v2437_v24 = vadd.f32 %v4936_v20, %v2436_v27 }
 0xd65   : > { %v2444_v28 = vsel %vm2443_vm1, %v2437_v24, -inf }
 0xd66   : > { %2445 = vmax.xlane.f32.xlu1 %v2444_v28 }
 0xdc6   : > { %v2510_v30 = vpop.f32.mrf.mxu0 }
 0xdc7   : > { %v2511_v53 = vadd.f32 %v4936_v20, %v2510_v30 }
 0xdc9   : > { %v2515_v54 = vsel %vm2439_vm0, %v2511_v53, -inf }
 0xdce   : > { %v2512_v31 = vpop.f32.mrf.mxu0 }
 0xdcf   : > { %v2513_v32 = vadd.f32 %v4936_v20, %v2512_v31 }
 0xdd1   : > { %v2442_v33 = vpop.xlane.xlu1 %2441  ;;  %v2518_v59 = vsel %vm2443_vm1, %v2513_v32, -inf }
 0xdd2   : > { %v2447_v34 = vsub.f32 %v2435_v22, %v2442_v33  ;;  %2519 = vmax.xlane.f32.xlu0 %v2518_v59 }
 0xdd4   : > { %v2449_v35 = vmul.f32 1.442695, %v2447_v34 }
 0xdd6   : > { %4190 = vpow2.f32 %v2449_v35  ;;  %v2618_v36 = vpop.f32.mrf.mxu0 }
 0xdd7   : > { %v2619_v55 = vadd.f32 %v4936_v20, %v2618_v36 }
 0xdd9   : > { %v2446_v60 = vpop.xlane.xlu1 %2445  ;;  %v2623_v56 = vsel %vm2439_vm0, %v2619_v55, -inf }
 0xdda   : > { %v2448_v38 = vsub.f32 %v2437_v24, %v2446_v60 }
 0xddc   : > { %v4191_v39 = vpop.eup %4190  ;;  %v2451_v40 = vmul.f32 1.442695, %v2448_v38 }
 0xddd   : > { %v2453_v45 = vsel %vm2439_vm0, %v4191_v39, 0.0 }
 0xdde   : > { %4192 = vpow2.f32 %v2451_v40  ;;  %2454 = vadd.xlane.f32.xlu1 %v2453_v45  ;;  %v2620_v23 = vpop.f32.mrf.mxu0 }
 0xddf   : > { %v2621_v49 = vadd.f32 %v4936_v20, %v2620_v23 }
 0xde1   : > { %v2626_v50 = vsel %vm2443_vm1, %v2621_v49, -inf }
 0xde2   : > { %2627 = vmax.xlane.f32.xlu0 %v2626_v50 }
 0xde4   : > { %v4193_v52 = vpop.eup %4192 }
 0xde5   : > { %v2456_v29 = vsel %vm2443_vm1, %v4193_v52, 0.0 }
 0xde6   : > { %2457 = vadd.xlane.f32.xlu1 %v2456_v29 }
 0xdff   : > { %2469 = vrot.lane.b32.xlu1 %v4874_v26, %s4303_s2 }
 0xe29   : > { %2516 = vmax.xlane.f32.xlu1 %v2515_v54 }
 0xe31   : > { %2624 = vmax.xlane.f32.xlu1 %v2623_v56 }
 0xe45   : > { %v2520_v46 = vpop.xlane.xlu0 %2519 }
 0xe46   : > { %v2522_v58 = vsub.f32 %v2513_v32, %v2520_v46 }
 0xe48   : > { %v2525_v61 = vmul.f32 1.442695, %v2522_v58 }
 0xe4a   : > { %4194 = vpow2.f32 %v2525_v61 }
 0xe50   : > { %v4955_v47 = vpop.eup %4194 }
 0xe51   : > { %v2530_v0 = vsel %vm2443_vm1, %v4955_v47, 0.0  ;;  %v2455_v1 = vpop.xlane.xlu1 %2454 }
 0xe52   : > { %2531 = vadd.xlane.f32.xlu0 %v2530_v0 }
 0xe55   : > { %v2628_v13 = vpop.xlane.xlu0 %2627 }
 0xe56   : > { %v2630_v21 = vsub.f32 %v2621_v49, %v2628_v13 }
 0xe58   : > { %v2633_v27 = vmul.f32 1.442695, %v2630_v21 }
 0xe59   : > { %v2458_v2 = vpop.xlane.xlu1 %2457 }
 0xe5a   : > { %4196 = vrcp.f32 %v2458_v2 }
 0xe5b   : > { %4198 = vrcp.f32 %v2455_v1 }
 0xe60   : > { %v4197_v8 = vpop.eup %4196 }
 0xe61   : > { %v4199_v51 = vpop.eup %4198  ;;  %v2462_v4 = vmul.f32 %v4197_v8, %v4193_v52 }
 0xe62   : > { %v2461_v42 = vmul.f32 %v4199_v51, %v4191_v39 }
 0xe64   : > { %v2463_v7 = vpack.c.bf16 %v2462_v4, %v2461_v42  ;;  %v2267_v4 = vld [vmem:[%s4582_s24 + $0xc] sm:$0xf] }
 0xe71   : > { %v2470_v43 = vpop.permute.xlu1 %2469 }
 0xe72   : > { %v2476_v57 = vsel %vm2474_vm5, %v2470_v43, 0 }
 0xe73   : > { %2485 = vmatpush.bf16.msra.mxu3 %v2476_v57  ;;  %v2763_v57 = vsel %vm1454_vm3, %v2267_v4, 0 }
 0xe76   : > { %3911 = vmatmul.msk.bf16.vlgmr.msra.gmra.mxu3 %vm2439_vm0, %v2463_v7 }
 0xe77   : > { %2594 = vmatpush.bf16.msrb.mxu3 %v2585_v9 }
 0xe7b   : > { %2706 = vmatpush.bf16.msra.mxu3 %v2697_v6 }
 0xe9c   : > { %v2517_v10 = vpop.xlane.xlu1 %2516 }
 0xe9d   : > { %v2521_v11 = vsub.f32 %v2511_v53, %v2517_v10  ;;  %v2406_v10 = vpack.c.bf16 %v4924_v17, %v4924_v17 }
 0xe9f   : > { %v2523_v12 = vmul.f32 1.442695, %v2521_v11  ;;  %v2877_v13 = vsel %vm1454_vm3, %v2406_v10, 0 }
 0xea1   : > { %4200 = vpow2.f32 %v2523_v12 }
 0xea4   : > { %v2625_v15 = vpop.xlane.xlu1 %2624 }
 0xea5   : > { %v2629_v18 = vsub.f32 %v2619_v55, %v2625_v15  ;;  %v2265_v15 = vld [vmem:[%s4582_s24 + $0x4] sm:$0xf] }
 0xea7   : > { %v4201_v44 = vpop.eup %4200  ;;  %v2631_v22 = vmul.f32 1.442695, %v2629_v18  ;;  %v2565_v18 = vsel %vm1454_vm3, %v2265_v15, 0 }
 0xea8   : > { %v2527_v25 = vsel %vm2439_vm0, %v4201_v44, 0.0  ;;  %2574 = vmatpush.bf16.msra.mxu2 %v2565_v18 }
 0xea9   : > { %4202 = vpow2.f32 %v2631_v22  ;;  %2528 = vadd.xlane.f32.xlu1 %v2527_v25 }
 0xeaa   : > { %4204 = vpow2.f32 %v2633_v27  ;;  %v2268_v27 = vld [vmem:[%s4582_s24 + $0x10] sm:$0xf] }
 0xeaf   : > { %v4967_v24 = vpop.eup %4202 }
 0xeb0   : > { %v2635_v28 = vsel %vm2439_vm0, %v4967_v24, 0.0  ;;  %v4205_v30 = vpop.eup %4204 }
 0xeb1   : > { %2636 = vadd.xlane.f32.xlu0 %v2635_v28  ;;  %v2638_v31 = vsel %vm2443_vm1, %v4205_v30, 0.0 }
 0xeb9   : > { %2639 = vadd.xlane.f32.xlu0 %v2638_v31  ;;  %v2853_v31 = vsel %vm1454_vm3, %v2268_v27, 0 }
 0xec5   : > { %v2532_v23 = vpop.xlane.xlu0 %2531 }
 0xef9   : > { %v2487_v32 = vpop.f32.mrf.mxu3 }
 0xf01   : > { %v2489_v33 = vpop.f32.mrf.mxu3 }
 0xf02   : > { %v2492_v59 = vpack.c.bf16 %v2489_v33, %v2487_v32  ;;  %v2407_v32 = vpack.c.bf16 %v4926_v41, %v4926_v41 }
 0xf04   : > { %3915 = vmatmul.msk.bf16.vlgmr.msrb.gmra.mxu3 %vm1450_vm4, %v2492_v59 }
 0xf14   : > { %3919 = vmatmul.msk.bf16.vlgmr.msra.gmra.mxu3 %vm1450_vm4, %v2692_v37 }
 0xf1c   : > { %v2529_v50 = vpop.xlane.xlu1 %2528 }
 0xf24   : > { %v2637_v49 = vpop.xlane.xlu0 %2636 }
 0xf2c   : > { %v2640_v52 = vpop.xlane.xlu0 %2639 }
 0xf87   : > { %v4974_v34 = vpop.f32.mrf.mxu3 }
 0xf8f   : > { %v4976_v35 = vpop.f32.mrf.mxu3 }
 0xf97   : > { %v2708_v36 = vpop.f32.mrf.mxu3 }
 0xf98   : > { %v2709_v60 = vadd.f32 %v4936_v20, %v2708_v36 }
 0xf9a   : > { %v2713_v38 = vsel %vm2439_vm0, %v2709_v60, -inf }
 0xf9b   : > { %2714 = vmax.xlane.f32.xlu1 %v2713_v38  ;;  %v2967_v38 = vsel %vm1454_vm3, %v2407_v32, 0 }
 0xf9f   : > { %v2710_v39 = vpop.f32.mrf.mxu3 }
 0xfa0   : > { %v2711_v40 = vadd.f32 %v4936_v20, %v2710_v39  ;;  %v2405_v39 = vpack.c.bf16 %v4922_v16, %v4922_v16 }
 0xfa2   : > { %v2716_v45 = vsel %vm2443_vm1, %v2711_v40, -inf }
 0xfa3   : > { %2717 = vmax.xlane.f32.xlu0 %v2716_v45 }
 0xfb4   : > { %2538 = vrot.lane.b32.xlu1 %v4874_v26, %s4308_s19  ;;  %s5331_s19 = sld [smem:[#allocation36_spill]] }
 0xfb7   : > { %2646 = vrot.lane.b32.xlu0 %v4874_v26, %s4310_s21 }
0x100e   : > { %v2715_v29 = vpop.xlane.xlu1 %2714 }
0x100f   : > { %v2719_v53 = vsub.f32 %v2709_v60, %v2715_v29 }
0x1011   : > { %v2721_v54 = vmul.f32 1.442695, %v2719_v53 }
0x1013   : > { %4206 = vpow2.f32 %v2721_v54 }
0x1016   : > { %v2718_v55 = vpop.xlane.xlu0 %2717 }
0x1017   : > { %v2720_v56 = vsub.f32 %v2711_v40, %v2718_v55 }
0x1019   : > { %v4207_v37 = vpop.eup %4206  ;;  %v2723_v46 = vmul.f32 1.442695, %v2720_v56 }
0x101a   : > { %v2725_v58 = vsel %vm2439_vm0, %v4207_v37, 0.0 }
0x101b   : > { %4208 = vpow2.f32 %v2723_v46  ;;  %2726 = vadd.xlane.f32.xlu1 %v2725_v58 }
0x101c   : > { %4210 = vrcp.f32 %v2529_v50 }
0x101d   : > { %4212 = vrcp.f32 %v2532_v23  ;;  %v2787_v23 = vsel %vm1454_vm3, %v2405_v39, 0 }
0x101e   : > { %4214 = vrcp.f32 %v2640_v52  ;;  %v2782_v52 = vpop.permute.xlu2 %2781 }
0x101f   : > { %4216 = vrcp.f32 %v2637_v49 }
0x1021   : > { %v4209_v61 = vpop.eup %4208 }
0x1022   : > { %v4211_v0 = vpop.eup %4210  ;;  %v2728_v1 = vsel %vm2443_vm1, %v4209_v61, 0.0 }
0x1023   : > { %2729 = vadd.xlane.f32.xlu0 %v2728_v1  ;;  %v4213_v2 = vpop.eup %4212  ;;  %v2535_v8 = vmul.f32 %v4211_v0, %v4201_v44  ;;  %v2266_v44 = vld [vmem:[%s4582_s24 + $0x8] sm:$0xf] }
0x1024   : > { %v2536_v51 = vmul.f32 %v4213_v2, %v4955_v47  ;;  %v4215_v6 = vpop.eup %4214  ;;  %v2673_v21 = vsel %vm1454_vm3, %v2266_v44, 0 }
0x1025   : > { %v4217_v47 = vpop.eup %4216  ;;  %v2644_v7 = vmul.f32 %v4215_v6, %v4205_v30  ;;  %2682 = vmatpush.bf16.msrb.mxu2 %v2673_v21 }
0x1026   : > { %v2539_v48 = vpop.permute.xlu1 %2538  ;;  %v2537_v43 = vpack.c.bf16 %v2536_v51, %v2535_v8  ;;  %v2643_v11 = vmul.f32 %v4217_v47, %v4967_v24  ;;  %v2872_v56 = vpop.permute.xlu2 %2871 }
0x1027   : > { %v2544_v3 = vsel %vm2474_vm5, %v2539_v48, 0 }
0x1028   : > { %2553 = vmatpush.bf16.msrb.mxu1 %v2544_v3  ;;  %v2645_v12 = vpack.c.bf16 %v2644_v7, %v2643_v11 }
0x1029   : > { %v2647_v9 = vpop.permute.xlu0 %2646 }
0x102a   : > { %v2652_v42 = vsel %vm2474_vm5, %v2647_v9, 0 }
0x102b   : > { %3913 = vmatmul.msk.bf16.vlgmr.msrb.gmra.mxu1 %vm2439_vm0, %v2537_v43 }
0x102c   : > { %2661 = vmatpush.bf16.msra.mxu1 %v2652_v42 }
0x1030   : > { %2772 = vmatpush.bf16.msrb.mxu1 %v2763_v57 }
0x1034   : > { %2736 = vrot.lane.b32.xlu1 %v4874_v26, %s4309_s20  ;;  %s5319_s20 = scalar_lea.vmem %s5212_s17, %s4500_s0 }
0x103b   : > { %3917 = vmatmul.msk.bf16.vlgmr.msra.gmra.mxu1 %vm2439_vm0, %v2645_v12 }
0x103c   : > { %2886 = vmatpush.bf16.msra.mxu1 %v2877_v13 }
0x108e   : > { %v2727_v25 = vpop.xlane.xlu1 %2726 }
0x1096   : > { %v2730_v22 = vpop.xlane.xlu0 %2729 }
0x1097   : > { %4218 = vrcp.f32 %v2730_v22 }
0x1098   : > { %4220 = vrcp.f32 %v2727_v25 }
0x109d   : > { %v4219_v17 = vpop.eup %4218 }
0x109e   : > { %v4221_v24 = vpop.eup %4220  ;;  %v2734_v28 = vmul.f32 %v4219_v17, %v4209_v61 }
0x109f   : > { %v2733_v33 = vmul.f32 %v4221_v24, %v4207_v37 }
0x10a1   : > { %v2735_v60 = vpack.c.bf16 %v2734_v28, %v2733_v33  ;;  %v2269_v33 = vld [vmem:[%s4582_s24 + $0x14] sm:$0xf] }
0x10a6   : > { %v2737_v30 = vpop.permute.xlu1 %2736 }
0x10a7   : > { %v2742_v59 = vsel %vm2474_vm5, %v2737_v30, 0 }
0x10a8   : > { %v2555_v36 = vpop.f32.mrf.mxu1  ;;  %2751 = vmatpush.bf16.msra.mxu0 %v2742_v59 }
0x10ab   : > { %3920 = vmatmul.msk.bf16.vlgmr.msra.gmra.mxu0 %vm2439_vm0, %v2735_v60 }
0x10ac   : > { %2862 = vmatpush.bf16.msrb.mxu0 %v2853_v31 }
0x10b0   : > { %2976 = vmatpush.bf16.msra.mxu0 %v2967_v38  ;;  %v2557_v40 = vpop.f32.mrf.mxu1 }
0x10b1   : > { %v2560_v45 = vpack.c.bf16 %v2557_v40, %v2555_v36  ;;  %v2943_v36 = vsel %vm1454_vm3, %v2269_v33, 0 }
0x10b3   : > { %3914 = vmatmul.msk.bf16.vlgmr.msra.gmra.mxu2 %vm1450_vm4, %v2560_v45 }
0x10b4   : > { %2796 = vmatpush.bf16.msra.mxu2 %v2787_v23 }
0x10b8   : > { %v2663_v41 = vpop.f32.mrf.mxu1 }
0x10c0   : > { %v2665_v49 = vpop.f32.mrf.mxu1 }
0x10c1   : > { %v2668_v50 = vpack.c.bf16 %v2665_v49, %v2663_v41 }
0x10c3   : > { %3918 = vmatmul.msk.bf16.vlgmr.msrb.gmra.mxu2 %vm1450_vm4, %v2668_v50  ;;  %v2408_v50 = vpack.c.bf16 %v4929_v19, %v4929_v19 }
0x10d3   : > { %3922 = vmatmul.msk.bf16.vlgmr.msra.gmra.mxu2 %vm1450_vm4, %v2782_v52 }
0x1128   : > { %v2753_v29 = vpop.f32.mrf.mxu0 }
0x1130   : > { %v2755_v53 = vpop.f32.mrf.mxu0 }
0x1131   : > { %v2758_v54 = vpack.c.bf16 %v2755_v53, %v2753_v29 }
0x1133   : > { %3921 = vmatmul.msk.bf16.vlgmr.msrb.gmra.mxu1 %vm1450_vm4, %v2758_v54  ;;  %v3057_v54 = vsel %vm1454_vm3, %v2408_v50, 0 }
0x1136   : > { %v2576_v16 = vpop.f32.mrf.mxu2 }
0x1137   : > { %v2597_v37 = vadd.f32 %v4974_v34, %v2576_v16 }
0x113e   : > { %v2578_v55 = vpop.f32.mrf.mxu2 }
0x113f   : > { %v2599_v61 = vadd.f32 %v4976_v35, %v2578_v55 }
0x1143   : > { %3925 = vmatmul.msk.bf16.vlgmr.msra.gmra.mxu1 %vm1450_vm4, %v2872_v56 }
0x1146   : > { %v2684_v46 = vpop.f32.mrf.mxu2 }
0x1147   : > { %v2689_v58 = vadd.f32 %v2684_v46, %v2597_v37 }
0x114e   : > { %v2686_v0 = vpop.f32.mrf.mxu2 }
0x114f   : > { %v2690_v1 = vadd.f32 %v2686_v0, %v2599_v61 }
0x1156   : > { %v2798_v2 = vpop.f32.mrf.mxu2 }
0x1157   : > { %v2799_v8 = vadd.f32 %v4936_v20, %v2798_v2 }
0x1159   : > { %v2803_v48 = vsel %vm2439_vm0, %v2799_v8, -inf }
0x115a   : > { %2804 = vmax.xlane.f32.xlu0 %v2803_v48 }
0x115e   : > { %v2800_v51 = vpop.f32.mrf.mxu2 }
0x115f   : > { %v2801_v3 = vadd.f32 %v4936_v20, %v2800_v51 }
0x1161   : > { %v2806_v4 = vsel %vm2443_vm1, %v2801_v3, -inf }
0x1162   : > { %2807 = vmax.xlane.f32.xlu2 %v2806_v4 }
0x117a   : > { %2826 = vrot.lane.b32.xlu2 %v4874_v26, %s4313_s23 }
0x1182   : > { %3051 = vrot.lane.b32.xlu2 %v4906_v14, %s4314_s26 }
0x11b0   : > { %v2774_v34 = vpop.f32.mrf.mxu1 }
0x11b1   : > { %v5030_v35 = vadd.f32 %v2774_v34, %v2689_v58 }
0x11b8   : > { %v2776_v43 = vpop.f32.mrf.mxu1 }
0x11b9   : > { %v5032_v9 = vadd.f32 %v2776_v43, %v2690_v1 }
0x11c0   : > { %v2888_v42 = vpop.f32.mrf.mxu1 }
0x11c1   : > { %v2889_v57 = vadd.f32 %v4936_v20, %v2888_v42 }
0x11c3   : > { %v2893_v6 = vsel %vm2439_vm0, %v2889_v57, -inf }
0x11c4   : > { %2894 = vmax.xlane.f32.xlu0 %v2893_v6 }
0x11c8   : > { %v2890_v47 = vpop.f32.mrf.mxu1 }
0x11c9   : > { %v2891_v7 = vadd.f32 %v4936_v20, %v2890_v47 }
0x11cb   : > { %v2896_v10 = vsel %vm2443_vm1, %v2891_v7, -inf }
0x11cc   : > { %2897 = vmax.xlane.f32.xlu1 %v2896_v10 }
0x11cd   : > { %v2805_v11 = vpop.xlane.xlu0 %2804 }
0x11ce   : > { %v2809_v12 = vsub.f32 %v2799_v8, %v2805_v11 }
0x11d0   : > { %v2811_v13 = vmul.f32 1.442695, %v2809_v12 }
0x11d2   : > { %4222 = vpow2.f32 %v2811_v13 }
0x11d5   : > { %v2808_v15 = vpop.xlane.xlu2 %2807 }
0x11d6   : > { %v2810_v18 = vsub.f32 %v2801_v3, %v2808_v15 }
0x11d8   : > { %v4223_v44 = vpop.eup %4222  ;;  %v2813_v21 = vmul.f32 1.442695, %v2810_v18 }
0x11d9   : > { %v2815_v22 = vsel %vm2439_vm0, %v4223_v44, 0.0 }
0x11da   : > { %4224 = vpow2.f32 %v2813_v21  ;;  %2816 = vadd.xlane.f32.xlu0 %v2815_v22 }
0x11dd   : > { %v2827_v25 = vpop.permute.xlu2 %2826 }
0x11de   : > { %v2832_v17 = vsel %vm2474_vm5, %v2827_v25, 0 }
0x11df   : > { %2841 = vmatpush.bf16.msrb.mxu3 %v2832_v17 }
0x11e0   : > { %v4225_v27 = vpop.eup %4224 }
0x11e1   : > { %v2818_v24 = vsel %vm2443_vm1, %v4225_v27, 0.0 }
0x11e2   : > { %2819 = vadd.xlane.f32.xlu0 %v2818_v24 }
0x11e3   : > { %2952 = vmatpush.bf16.msra.mxu3 %v2943_v36 }
0x11e5   : > { %2961 = vrot.lane.b32.xlu1 %v4906_v14, %s4312_s6  ;;  %v3052_v42 = vpop.permute.xlu2 %3051  ;;  %s5321_s6 = sld [smem:[#allocation30_spill]] }
0x11eb   : > { %s5322_s23 = scalar_lea.vmem %s5321_s6, %s4500_s0 }
0x1237   : > { %v2895_v28 = vpop.xlane.xlu0 %2894 }
0x1238   : > { %v2899_v30 = vsub.f32 %v2889_v57, %v2895_v28 }
0x123a   : > { %v2901_v31 = vmul.f32 1.442695, %v2899_v30 }
0x123c   : > { %4226 = vpow2.f32 %v2901_v31 }
0x123f   : > { %v2898_v32 = vpop.xlane.xlu1 %2897 }
0x1240   : > { %v2900_v59 = vsub.f32 %v2891_v7, %v2898_v32 }
0x1242   : > { %v4227_v60 = vpop.eup %4226  ;;  %v2903_v38 = vmul.f32 1.442695, %v2900_v59 }
0x1243   : > { %v2905_v39 = vsel %vm2439_vm0, %v4227_v60, 0.0 }
0x1244   : > { %4228 = vpow2.f32 %v2903_v38  ;;  %2906 = vadd.xlane.f32.xlu0 %v2905_v39 }
0x124a   : > { %v4229_v40 = vpop.eup %4228 }
0x124b   : > { %v2908_v45 = vsel %vm2443_vm1, %v4229_v40, 0.0 }
0x124c   : > { %2909 = vadd.xlane.f32.xlu0 %v2908_v45 }
0x124d   : > { %v2817_v14 = vpop.xlane.xlu0 %2816 }
0x124e   : > { %4230 = vrcp.f32 %v2817_v14 }
0x1254   : > { %v4231_v41 = vpop.eup %4230 }
0x1255   : > { %v2820_v23 = vpop.xlane.xlu0 %2819  ;;  %v2823_v52 = vmul.f32 %v4231_v41, %v4223_v44 }
0x1256   : > { %4232 = vrcp.f32 %v2820_v23 }
0x1257   : > { %v2962_v48 = vpop.permute.xlu1 %2961 }
0x125c   : > { %v4233_v49 = vpop.eup %4232 }
0x125d   : > { %v2824_v29 = vmul.f32 %v4233_v49, %v4225_v27 }
0x125f   : > { %v2825_v53 = vpack.c.bf16 %v2824_v29, %v2823_v52 }
0x1260   : > { %2916 = vrot.lane.b32.xlu0 %v4874_v26, %s4315_s12 }
0x1261   : > { %3923 = vmatmul.msk.bf16.vlgmr.msrb.gmra.mxu3 %vm2439_vm0, %v2825_v53 }
0x1262   : > { %3066 = vmatpush.bf16.msrb.mxu3 %v3057_v54 }
0x12b7   : > { %v2907_v16 = vpop.xlane.xlu0 %2906 }
0x12bf   : > { %v2910_v55 = vpop.xlane.xlu0 %2909 }
0x12c0   : > { %4234 = vrcp.f32 %v2910_v55 }
0x12c1   : > { %4236 = vrcp.f32 %v2907_v16 }
0x12c6   : > { %v4235_v56 = vpop.eup %4234 }
0x12c7   : > { %v4237_v37 = vpop.eup %4236  ;;  %v2914_v46 = vmul.f32 %v4235_v56, %v4229_v40 }
0x12c8   : > { %v2913_v19 = vmul.f32 %v4237_v37, %v4227_v60 }
0x12ca   : > { %v2915_v0 = vpack.c.bf16 %v2914_v46, %v2913_v19 }
0x12d2   : > { %v2917_v58 = vpop.permute.xlu0 %2916 }
0x12d3   : > { %v2922_v61 = vsel %vm2474_vm5, %v2917_v58, 0 }
0x12d4   : > { %2931 = vmatpush.bf16.msrb.mxu2 %v2922_v61  ;;  %v2270_v61 = vld [vmem:[%s4582_s24 + $0x18] sm:$0xf] }
0x12d7   : > { %3926 = vmatmul.msk.bf16.vlgmr.msrb.gmra.mxu2 %vm2439_vm0, %v2915_v0  ;;  %v3033_v0 = vsel %vm1454_vm3, %v2270_v61, 0 }
0x12d8   : > { %3042 = vmatpush.bf16.msra.mxu2 %v3033_v0 }
0x12e4   : > { %v2843_v1 = vpop.f32.mrf.mxu3 }
0x12ec   : > { %v2845_v2 = vpop.f32.mrf.mxu3 }
0x12ed   : > { %v2848_v8 = vpack.c.bf16 %v2845_v2, %v2843_v1 }
0x12ef   : > { %3924 = vmatmul.msk.bf16.vlgmr.msrb.gmra.mxu0 %vm1450_vm4, %v2848_v8 }
0x12ff   : > { %3928 = vmatmul.msk.bf16.vlgmr.msra.gmra.mxu0 %vm1450_vm4, %v2962_v48 }
0x135a   : > { %v2933_v51 = vpop.f32.mrf.mxu2 }
0x1362   : > { %v2935_v3 = vpop.f32.mrf.mxu2 }
0x1363   : > { %v2938_v4 = vpack.c.bf16 %v2935_v3, %v2933_v51 }
0x1365   : > { %3927 = vmatmul.msk.bf16.vlgmr.msra.gmra.mxu3 %vm1450_vm4, %v2938_v4 }
0x136c   : > { %v2864_v34 = vpop.f32.mrf.mxu0 }
0x136d   : > { %v2869_v43 = vadd.f32 %v2864_v34, %v5030_v35 }
0x1374   : > { %v2866_v57 = vpop.f32.mrf.mxu0 }
0x1375   : > { %v2870_v6 = vadd.f32 %v2866_v57, %v5032_v9  ;;  %3931 = vmatmul.msk.bf16.vlgmr.msrb.gmra.mxu3 %vm1450_vm4, %v3052_v42  ;;  %v2271_v57 = vld [vmem:[%s4582_s24 + $0x1c] sm:$0xf]  ;;  %s5320_s24 = sld [smem:[#allocation14_spill]] }
0x137c   : > { %v2978_v47 = vpop.f32.mrf.mxu0 }
0x137d   : > { %v2979_v7 = vadd.f32 %v4936_v20, %v2978_v47 }
0x137f   : > { %v2983_v10 = vsel %vm2439_vm0, %v2979_v7, -inf }
0x1380   : > { %2984 = vmax.xlane.f32.xlu0 %v2983_v10 }
0x1384   : > { %v2980_v11 = vpop.f32.mrf.mxu0 }
0x1385   : > { %v2981_v12 = vadd.f32 %v4936_v20, %v2980_v11 }
0x1387   : > { %v2986_v13 = vsel %vm2443_vm1, %v2981_v12, -inf }
0x1388   : > { %2987 = vmax.xlane.f32.xlu1 %v2986_v13  ;;  %v4113_v13 = vld [vmem:[%s5319_s20] ss:$0 sm:$0xff]  ;;  %s5332_s20 = scalar_lea.vmem %s5331_s19, %s4500_s0 }
0x13e8   : > { %v2954_v15 = vpop.f32.mrf.mxu3 }
0x13e9   : > { %v5065_v35 = vadd.f32 %v2954_v15, %v2869_v43 }
0x13f0   : > { %v2956_v18 = vpop.f32.mrf.mxu3 }
0x13f1   : > { %v5067_v44 = vadd.f32 %v2956_v18, %v2870_v6  ;;  %v3123_v6 = vsel %vm1454_vm3, %v2271_v57, 0 }
0x13f3   : > { %v2985_v9 = vpop.xlane.xlu0 %2984 }
0x13f4   : > { %v2989_v21 = vsub.f32 %v2979_v7, %v2985_v9 }
0x13f6   : > { %v2991_v22 = vmul.f32 1.442695, %v2989_v21 }
0x13f8   : > { %v3068_v25 = vpop.f32.mrf.mxu3  ;;  %4238 = vpow2.f32 %v2991_v22 }
0x13f9   : > { %v3069_v17 = vadd.f32 %v4936_v20, %v3068_v25 }
0x13fb   : > { %v2988_v27 = vpop.xlane.xlu1 %2987  ;;  %v3073_v24 = vsel %vm2439_vm0, %v3069_v17, -inf }
0x13fc   : > { %v2990_v28 = vsub.f32 %v2981_v12, %v2988_v27  ;;  %3074 = vmax.xlane.f32.xlu2 %v3073_v24 }
0x13fe   : > { %v2993_v30 = vmul.f32 1.442695, %v2990_v28  ;;  %v4239_v31 = vpop.eup %4238 }
0x13ff   : > { %v2995_v36 = vsel %vm2439_vm0, %v4239_v31, 0.0 }
0x1400   : > { %4240 = vpow2.f32 %v2993_v30  ;;  %v3070_v32 = vpop.f32.mrf.mxu3 }
0x1401   : > { %v3071_v33 = vadd.f32 %v4936_v20, %v3070_v32 }
0x1403   : > { %v3076_v59 = vsel %vm2443_vm1, %v3071_v33, -inf }
0x1404   : > { %3077 = vmax.xlane.f32.xlu0 %v3076_v59  ;;  %2996 = vadd.xlane.f32.xlu2 %v2995_v36 }
0x1406   : > { %v4241_v60 = vpop.eup %4240 }
0x1407   : > { %v2998_v38 = vsel %vm2443_vm1, %v4241_v60, 0.0 }
0x1408   : > { %2999 = vadd.xlane.f32.xlu1 %v2998_v38 }
0x1418   : > { %3006 = vrot.lane.b32.xlu0 %v4874_v26, %s4316_s10  ;;  %s5323_s10 = sld [smem:[#allocation31_spill]] }
0x141e   : > { %s5324_s1 = scalar_lea.vmem %s5323_s10, %s4500_s0 }
0x146f   : > { %v3075_v39 = vpop.xlane.xlu2 %3074 }
0x1470   : > { %v3079_v40 = vsub.f32 %v3069_v17, %v3075_v39  ;;  %v4035_v39 = vld [vmem:[%s5320_s24 + $0x18] sm:$0xff] }
0x1471   : > { %3265 = vmatpush.bf16.msrb.mxu2 %v4035_v39 }
0x1472   : > { %v3081_v45 = vmul.f32 1.442695, %v3079_v40  ;;  %v4034_v40 = vld [vmem:[%s5320_s24 + $0x10] sm:$0xff] }
0x1474   : > { %4242 = vpow2.f32 %v3081_v45  ;;  %v4033_v45 = vld [vmem:[%s5320_s24 + $0x8] sm:$0xff] }
0x1475   : > { %3266 = vmatpush.bf16.msrb.mxu2 %v4034_v40 }
0x1477   : > { %v3078_v14 = vpop.xlane.xlu0 %3077  ;;  %v2997_v52 = vpop.xlane.xlu2 %2996 }
0x1478   : > { %v3080_v23 = vsub.f32 %v3071_v33, %v3078_v14 }
0x1479   : > { %3267 = vmatpush.bf16.msrb.mxu2 %v4033_v45 }
0x147a   : > { %v4243_v20 = vpop.eup %4242  ;;  %v3083_v41 = vmul.f32 1.442695, %v3080_v23 }
0x147b   : > { %v3085_v49 = vsel %vm2439_vm0, %v4243_v20, 0.0  ;;  %v3000_v50 = vpop.xlane.xlu1 %2999 }
0x147c   : > { %4244 = vpow2.f32 %v3083_v41  ;;  %3086 = vadd.xlane.f32.xlu2 %v3085_v49  ;;  %v4032_v41 = vld [vmem:[%s5320_s24] sm:$0xff]  ;;  %v4043_v49 = vld [vmem:[%s4609_s25 + $0x38] sm:$0xff]  ;;  %s5333_s24 = sld [smem:[#allocation3_spill]] }
0x147d   : > { %4246 = vrcp.f32 %v3000_v50  ;;  %3268 = vmatpush.bf16.msrb.mxu2 %v4032_v41  ;;  %3329 = vmatpush.bf16.msra.mxu3 %v4043_v49 }
0x147e   : > { %4248 = vrcp.f32 %v2997_v52 }
0x1482   : > { %v4245_v29 = vpop.eup %4244  ;;  %p3983_p8 = scmp.ne.s32.totalorder %s5333_s24, 1 }
0x1483   : > { %v3088_v53 = vsel %vm2443_vm1, %v4245_v29, 0.0  ;;  %v4247_v54 = vpop.eup %4246  ;;  %s5334_s3 = sld [smem:[#allocation37_spill]] (!%p3983_p8) }
0x1484   : > { %3089 = vadd.xlane.f32.xlu1 %v3088_v53  ;;  %v4249_v16 = vpop.eup %4248  ;;  %v3004_v55 = vmul.f32 %v4247_v54, %v4241_v60 }
0x1485   : > { %v3003_v37 = vmul.f32 %v4249_v16, %v4239_v31 }
0x1487   : > { %v3005_v58 = vpack.c.bf16 %v3004_v55, %v3003_v37  ;;  %v4041_v55 = vld [vmem:[%s4609_s25 + $0x28] sm:$0xff] }
0x1489   : > { %s5335_s6 = smov (!%p3983_p8), %s5334_s3 }
0x148a   : > { %v3007_v56 = vpop.permute.xlu0 %3006 }
0x148b   : > { %v3012_v46 = vsel %vm2474_vm5, %v3007_v56, 0 }
0x148c   : > { %3021 = vmatpush.bf16.msrb.mxu1 %v3012_v46  ;;  %v4040_v46 = vld [vmem:[%s4609_s25 + $0x20] sm:$0xff] }
0x148f   : > { %3929 = vmatmul.msk.bf16.vlgmr.msrb.gmra.mxu1 %vm2439_vm0, %v3005_v58 }
0x1490   : > { %3132 = vmatpush.bf16.msra.mxu1 %v3123_v6 }
0x1494   : > { %3096 = vrot.lane.b32.xlu2 %v4874_v26, %s5318_s5 }
0x14ef   : > { %v3087_v19 = vpop.xlane.xlu2 %3086 }
0x14f0   : > { %4250 = vrcp.f32 %v3087_v19 }
0x14f6   : > { %v4251_v48 = vpop.eup %4250 }
0x14f7   : > { %v3097_v1 = vpop.permute.xlu2 %3096  ;;  %v3090_v2 = vpop.xlane.xlu1 %3089  ;;  %v3093_v3 = vmul.f32 %v4251_v48, %v4243_v20 }
0x14f8   : > { %v3102_v8 = vsel %vm2474_vm5, %v3097_v1, 0  ;;  %4252 = vrcp.f32 %v3090_v2 }
0x14f9   : > { %3111 = vmatpush.bf16.msrb.mxu0 %v3102_v8 }
0x14fe   : > { %v4253_v51 = vpop.eup %4252 }
0x14ff   : > { %v3094_v4 = vmul.f32 %v4253_v51, %v4245_v29  ;;  %v4042_v29 = vld [vmem:[%s4609_s25 + $0x30] sm:$0xff]  ;;  %v4114_v51 = vld [vmem:[%s5322_s23] ss:$0 sm:$0xff] }
0x1500   : > { %3330 = vmatpush.bf16.msra.mxu3 %v4042_v29 }
0x1501   : > { %v3095_v34 = vpack.c.bf16 %v3094_v4, %v3093_v3 }
0x1503   : > { %3932 = vmatmul.msk.bf16.vlgmr.msrb.gmra.mxu0 %vm2439_vm0, %v3095_v34 }
0x1504   : > { %3331 = vmatpush.bf16.msra.mxu3 %v4041_v55 }
0x1508   : > { %3332 = vmatpush.bf16.msra.mxu3 %v4040_v46 }
0x150c   : > { %v3023_v26 = vpop.f32.mrf.mxu1 }
0x1514   : > { %v3025_v43 = vpop.f32.mrf.mxu1 }
0x1515   : > { %v3028_v42 = vpack.c.bf16 %v3025_v43, %v3023_v26  ;;  %v4115_v26 = vld [vmem:[%s5324_s1] ss:$0 sm:$0xff] }
0x1517   : > { %3930 = vmatmul.msk.bf16.vlgmr.msra.gmra.mxu2 %vm1450_vm4, %v3028_v42 }
0x1580   : > { %v3113_v47 = vpop.f32.mrf.mxu0 }
0x1588   : > { %v3115_v7 = vpop.f32.mrf.mxu0 }
0x1589   : > { %v3118_v10 = vpack.c.bf16 %v3115_v7, %v3113_v47 }
0x158b   : > { %3933 = vmatmul.msk.bf16.vlgmr.msra.gmra.mxu1 %vm1450_vm4, %v3118_v10  ;;  %v4039_v10 = vld [vmem:[%s4609_s25 + $0x18] sm:$0xff] }
0x158c   : > { %3333 = vmatpush.bf16.msra.mxu3 %v4039_v10 }
0x159a   : > { %v3044_v11 = vpop.f32.mrf.mxu2 }
0x159b   : > { %v3049_v12 = vadd.f32 %v3044_v11, %v5065_v35  ;;  %v4038_v11 = vld [vmem:[%s4609_s25 + $0x10] sm:$0xff] }
0x159c   : > { %3334 = vmatpush.bf16.msra.mxu3 %v4038_v11 }
0x15a2   : > { %v3046_v21 = vpop.f32.mrf.mxu2 }
0x15a3   : > { %v3050_v25 = vadd.f32 %v3046_v21, %v5067_v44 }
0x1608   : > { %v3134_v15 = vpop.f32.mrf.mxu1 }
0x1609   : > { %v3139_v18 = vadd.f32 %v3134_v15, %v3049_v12  ;;  %v4037_v12 = vld [vmem:[%s4609_s25 + $0x8] sm:$0xff] }
0x160a   : > { %3335 = vmatpush.bf16.msra.mxu3 %v4037_v12 }
0x160b   : > { %v3144_v9 = vadd.f32 %v4113_v13, %v3139_v18  ;;  %v4116_v18 = vld [vmem:[%s5326_s4] ss:$0 sm:$0xff]  ;;  %s5336_s4 = sld [smem:[#allocation38_spill]] (!%p3983_p8) }
0x160d   : > { %v3146_v22 = vadd.f32 %v3144_v9, %v4891_v62 }
0x160f   : > { %v3150_v17 = vsel %vm1342_vm2, %v3146_v22, 0.0 }
0x1610   : > { %v3136_v27 = vpop.f32.mrf.mxu1  ;;  %3151 = vadd.xlane.f32.xlu1 %v3150_v17 }
0x1611   : > { %v3140_v24 = vadd.f32 %v3136_v27, %v3050_v25 }
0x1613   : > { %v3145_v28 = vadd.f32 %v4113_v13, %v3140_v24  ;;  %v4036_v13 = vld [vmem:[%s4609_s25] sm:$0xff] }
0x1614   : > { %3336 = vmatpush.bf16.msra.mxu3 %v4036_v13  ;;  %v4117_v24 = vld [vmem:[%s5328_s29] ss:$0 sm:$0xff] }
0x1615   : > { %v3147_v35 = vadd.f32 %v3145_v28, %v4893_v63 }
0x1617   : > { %v3153_v30 = vsel %vm2186_vm8, %v3147_v35, 0.0 }
0x1618   : > { %3154 = vadd.xlane.f32.xlu0 %v3153_v30 }
0x1683   : > { %v3152_v31 = vpop.xlane.xlu1 %3151 }
0x1684   : > { %v3156_v32 = vmul.f32 %v3152_v31, %v4862_v5 }
0x1686   : > { %v3158_v62 = vsub.f32 %v3146_v22, %v3156_v32 }
0x1688   : > { %v3160_v33 = vmul.f32 %v3158_v62, %v3158_v62 }
0x168a   : > { %v3162_v44 = vsel %vm1342_vm2, %v3160_v33, 0.0 }
0x168b   : > { %3163 = vadd.xlane.f32.xlu1 %v3162_v44  ;;  %v3155_v59 = vpop.xlane.xlu0 %3154 }
0x168c   : > { %v3157_v36 = vmul.f32 %v3155_v59, %v4862_v5 }
0x168e   : > { %v3159_v60 = vsub.f32 %v3147_v35, %v3157_v36 }
0x1690   : > { %v3161_v63 = vmul.f32 %v3159_v60, %v3159_v60 }
0x1692   : > { %v3165_v38 = vsel %vm2186_vm8, %v3161_v63, 0.0 }
0x1693   : > { %3166 = vadd.xlane.f32.xlu1 %v3165_v38 }
0x16fe   : > { %v3164_v14 = vpop.xlane.xlu1 %3163 }
0x16ff   : > { %v3168_v23 = vmul.f32 %v3164_v14, %v4862_v5 }
0x1701   : > { %v3170_v20 = vadd.f32 1e-05, %v3168_v23 }
0x1703   : > { %4254 = vrsqrt.f32 %v3170_v20  ;;  %vm3178_vm4 = vweird.f32 %v3170_v20 }
0x1706   : > { %v3167_v50 = vpop.xlane.xlu1 %3166 }
0x1707   : > { %v3169_v52 = vmul.f32 %v3167_v50, %v4862_v5 }
0x1709   : > { %v4255_v53 = vpop.eup %4254  ;;  %v3171_v54 = vadd.f32 1e-05, %v3169_v52 }
0x170a   : > { %v3173_v16 = vmul.f32 %v4255_v53, %v3170_v20  ;;  %vm3179_vm3 = vweird.f32 %v4255_v53 }
0x170b   : > { %4256 = vrsqrt.f32 %v3171_v54  ;;  %vm3180_vm6 = vmor %vm3178_vm4, %vm3179_vm3  ;;  %vm3188_vm9 = vweird.f32 %v3171_v54 }
0x170c   : > { %v3174_v56 = vmul.f32 %v4255_v53, %v3173_v16 }
0x170e   : > { %v3175_v37 = vmul.f32 0.5, %v3174_v56 }
0x1710   : > { %v3176_v58 = vsub.f32 1.5, %v3175_v37 }
0x1711   : > { %v4257_v19 = vpop.eup %4256 }
0x1712   : > { %v3177_v61 = vmul.f32 %v4255_v53, %v3176_v58  ;;  %v3183_v0 = vmul.f32 %v4257_v19, %v3171_v54  ;;  %vm3189_vm7 = vweird.f32 %v4257_v19 }
0x1713   : > { %vm3190_vm10 = vmor %vm3188_vm9, %vm3189_vm7 }
0x1714   : > { %v3184_v1 = vmul.f32 %v4257_v19, %v3183_v0  ;;  %v3181_v2 = vsel %vm3180_vm6, %v4255_v53, %v3177_v61  ;;  %v4119_v0 = vld [vmem:[%s5332_s20] ss:$0 sm:$0xff] }
0x1715   : > { %v3192_v3 = vmul.f32 %v3181_v2, %v3158_v62 }
0x1716   : > { %v3185_v8 = vmul.f32 0.5, %v3184_v1 }
0x1717   : > { %v3197_v43 = vmul.f32 %v4114_v51, %v3192_v3 }
0x1718   : > { %v3186_v48 = vsub.f32 1.5, %v3185_v8 }
0x1719   : > { %v3202_v6 = vadd.f32 %v4115_v26, %v3197_v43 }
0x171a   : > { %v3187_v4 = vmul.f32 %v4257_v19, %v3186_v48 }
0x171c   : > { %v3191_v34 = vsel %vm3190_vm10, %v4257_v19, %v3187_v4  ;;  %v4118_v19 = vld [vmem:[%s5330_s8] ss:$0 sm:$0xff] }
0x171d   : > { %v3193_v42 = vmul.f32 %v3191_v34, %v3159_v60 }
0x171f   : > { %v3198_v57 = vmul.f32 %v4114_v51, %v3193_v42 }
0x1721   : > { %v3203_v47 = vadd.f32 %v4115_v26, %v3198_v57 }
0x1723   : > { %v3230_v7 = vpack.c.bf16 %v3203_v47, %v3202_v6 }
0x1725   : > { %3950 = vmatmul.msk.bf16.vlgmr.msrb.gmra.mxu2 %vm1342_vm2, %v3230_v7 }
0x17a8   : > { %v3270_v15 = vpop.f32.mrf.mxu2 }
0x17a9   : > { %v3271_v9 = vadd.f32 %v4116_v18, %v3270_v15 }
0x17ab   : > { %v3275_v25 = vmax.f32 %v3271_v9, 0.0 }
0x17b0   : > { %v3272_v21 = vpop.f32.mrf.mxu2 }
0x17b1   : > { %v3273_v22 = vadd.f32 %v4116_v18, %v3272_v21 }
0x17b3   : > { %v3276_v17 = vmax.f32 %v3273_v22, 0.0 }
0x17b5   : > { %v3277_v27 = vpack.c.bf16 %v3276_v17, %v3275_v25 }
0x17b7   : > { %3337 = vmatmul.bf16.vlgmr.msra.gmra.mxu3 %v3277_v27 }
0x183a   : > { %v3338_v28 = vpop.f32.mrf.mxu3 }
0x183b   : > { %v3339_v35 = vadd.f32 %v4117_v24, %v3338_v28 }
0x183d   : > { %v3343_v30 = vadd.f32 %v3339_v35, %v3202_v6 }
0x183f   : > { %v3347_v31 = vsel %vm1342_vm2, %v3343_v30, 0.0 }
0x1840   : > { %3348 = vadd.xlane.f32.xlu2 %v3347_v31 }
0x1842   : > { %v3340_v32 = vpop.f32.mrf.mxu3 }
0x1843   : > { %v3341_v62 = vadd.f32 %v4117_v24, %v3340_v32 }
0x1845   : > { %v3344_v33 = vadd.f32 %v3341_v62, %v3203_v47 }
0x1847   : > { %v3350_v44 = vsel %vm2186_vm8, %v3344_v33, 0.0 }
0x1848   : > { %3351 = vadd.xlane.f32.xlu1 %v3350_v44 }
0x18b3   : > { %v3349_v59 = vpop.xlane.xlu2 %3348 }
0x18b4   : > { %v3353_v36 = vmul.f32 %v3349_v59, %v4862_v5 }
0x18b6   : > { %v3355_v60 = vsub.f32 %v3343_v30, %v3353_v36 }
0x18b8   : > { %v3357_v63 = vmul.f32 %v3355_v60, %v3355_v60 }
0x18ba   : > { %v3359_v38 = vsel %vm1342_vm2, %v3357_v63, 0.0 }
0x18bb   : > { %v3352_v39 = vpop.xlane.xlu1 %3351  ;;  %3360 = vadd.xlane.f32.xlu1 %v3359_v38 }
0x18bc   : > { %v3354_v40 = vmul.f32 %v3352_v39, %v4862_v5 }
0x18be   : > { %v3356_v45 = vsub.f32 %v3344_v33, %v3354_v40 }
0x18c0   : > { %v3358_v14 = vmul.f32 %v3356_v45, %v3356_v45 }
0x18c2   : > { %v3362_v23 = vsel %vm2186_vm8, %v3358_v14, 0.0 }
0x18c3   : > { %3363 = vadd.xlane.f32.xlu1 %v3362_v23 }
0x192e   : > { %v3361_v20 = vpop.xlane.xlu1 %3360 }
0x192f   : > { %v3365_v41 = vmul.f32 %v3361_v20, %v4862_v5 }
0x1931   : > { %v3367_v49 = vadd.f32 1e-05, %v3365_v41 }
0x1933   : > { %4258 = vrsqrt.f32 %v3367_v49  ;;  %vm3375_vm12 = vweird.f32 %v3367_v49 }
0x1936   : > { %v3364_v50 = vpop.xlane.xlu1 %3363 }
0x1937   : > { %v3366_v52 = vmul.f32 %v3364_v50, %v4862_v5 }
0x1939   : > { %v4259_v29 = vpop.eup %4258  ;;  %v3368_v53 = vadd.f32 1e-05, %v3366_v52 }
0x193a   : > { %v3370_v54 = vmul.f32 %v4259_v29, %v3367_v49  ;;  %vm3376_vm11 = vweird.f32 %v4259_v29 }
0x193b   : > { %4260 = vrsqrt.f32 %v3368_v53  ;;  %vm3377_vm13 = vmor %vm3375_vm12, %vm3376_vm11  ;;  %vm3385_vm15 = vweird.f32 %v3368_v53 }
0x193c   : > { %v3371_v16 = vmul.f32 %v4259_v29, %v3370_v54 }
0x193e   : > { %v3372_v55 = vmul.f32 0.5, %v3371_v16 }
0x1940   : > { %v3373_v56 = vsub.f32 1.5, %v3372_v55 }
0x1941   : > { %v4261_v37 = vpop.eup %4260 }
0x1942   : > { %v3374_v46 = vmul.f32 %v4259_v29, %v3373_v56  ;;  %v3380_v58 = vmul.f32 %v4261_v37, %v3368_v53  ;;  %vm3386_vm14 = vweird.f32 %v4261_v37 }
0x1943   : > { %vm3387_vm0 = vmor %vm3385_vm15, %vm3386_vm14 }
0x1944   : > { %v3378_v5 = vsel %vm3377_vm13, %v4259_v29, %v3374_v46  ;;  %v3381_v61 = vmul.f32 %v4261_v37, %v3380_v58 }
0x1945   : > { %v3389_v1 = vmul.f32 %v3378_v5, %v3355_v60 }
0x1946   : > { %v3382_v2 = vmul.f32 0.5, %v3381_v61 }
0x1947   : > { %v3394_v8 = vmul.f32 %v4118_v19, %v3389_v1 }
0x1948   : > { %v3383_v48 = vsub.f32 1.5, %v3382_v2 }
0x1949   : > { %v3399_v51 = vadd.f32 %v4119_v0, %v3394_v8 }
0x194a   : > { %v3384_v3 = vmul.f32 %v4261_v37, %v3383_v48 }
0x194b   : > { %3401 = vst.msk [vmem:[#allocation2] sm:$0xff] %vm1342_vm2, %v3399_v51 }
0x194c   : > { %v3388_v4 = vsel %vm3387_vm0, %v4261_v37, %v3384_v3 }
0x194d   : > { %v3390_v34 = vmul.f32 %v3388_v4, %v3356_v45 }
0x194f   : > { %v3395_v26 = vmul.f32 %v4118_v19, %v3390_v34  ;;  %3406 = sbr.rel (%p3983_p8) target bundleno = 6637 (0x19ed), region = 140 }
0x1951   : > { %v3400_v43 = vadd.f32 %v4119_v0, %v3395_v26 }
0x1953   : > { %3402 = vst.msk [vmem:[#allocation2 + $0x8] sm:$0x3] %vm2186_vm8, %v3400_v43 }
0x1954   : > { %v4047_v42 = vld [vmem:[%s5334_s3 + $0x18] sm:$0xff]  ;;  %v4046_v57 = vld [vmem:[%s5335_s6 + $0x10] sm:$0xff]  ;;  %v4045_v6 = vld [vmem:[%s5335_s6 + $0x8] sm:$0xff]  ;;  %v3407_v7 = vpack.c.bf16 %v3400_v43, %v3399_v51 }
0x1955   : > { %3451 = vmatpush.bf16.msra.mxu0 %v4047_v42  ;;  %v4044_v47 = vld [vmem:[%s5335_s6] sm:$0xff] }
0x1956   : > { %v4262_v10 = vld [vmem:[%s5336_s4] ss:$0 sm:$0xff] }
0x1959   : > { %3452 = vmatpush.bf16.msra.mxu0 %v4046_v57 }
0x195d   : > { %3453 = vmatpush.bf16.msra.mxu0 %v4045_v6 }
0x1961   : > { %3454 = vmatpush.bf16.msra.mxu0 %v4044_v47 }
0x1964   : > { %4000 = vmatmul.msk.bf16.vlgmr.msra.gmra.mxu0 %vm1342_vm2, %v3407_v7 }
0x19e1   : > { %v3456_v11 = vpop.f32.mrf.mxu0 }
0x19e2   : > { %v3457_v12 = vadd.f32 %v4262_v10, %v3456_v11 }
0x19e4   : > { %3461 = vst [vmem:[%s4628_s27] sm:$0xff] %v3457_v12 }
0x19e9   : > { %v3458_v13 = vpop.f32.mrf.mxu0 }
0x19ea   : > { %v3459_v15 = vadd.f32 %v4262_v10, %v3458_v13 }
0x19ec   : > { %3462 = vst [vmem:[%s4628_s27 + $0x8] sm:$0x3] %v3459_v15 }
0x19ed PF: > { %s5337_s7 = sld [smem:[#allocation6_spill]] }
0x19ee   : > { %s5338_s8 = sld [smem:[#allocation4_spill]] }
0x19ef   : > { %s5339_s5 = sld [smem:[#allocation5_spill]] }
0x19f0   : > { %s5340_s9 = sld [smem:[#allocation7_spill]] }
0x19f1   : > { %s5341_s30 = sld [smem:[#allocation8_spill]] }
0x19f3   : > { %s38_s3 = sadd.s32 1, %s5337_s7  }
0x19f4   : > { %p35_p9 = scmp.ge.s32.totalorder %s38_s3, 6  }
0x19f6   :  { %37 = sbr.rel (!%p35_p9) target bundleno = 26 (0x1a), region = 245 }

</bundles_post_ra>
